<compile_context>
chip_gen: v7x
topology: tpu7x:2x2x1
jax: 0.10.0
libtpu: 0.0.40
codegen_flags: <defaults>
</compile_context>

<pallas_src>
import functools

import jax
import jax.numpy as jnp
from jax.experimental import pallas as pl
from jax.experimental.pallas import tpu as pltpu

NOISE_DIM = 100
NUM_CLASSES = 10
IMAGE_SIZE = 28
CHANNELS = 1
HIDDEN = (128, 256, 512, 1024)
OUT_DIM = CHANNELS * IMAGE_SIZE * IMAGE_SIZE          # 784
OUT_PAD = ((OUT_DIM + 127) // 128) * 128              # 896 (lane-dense output)
BN_EPS = 1e-5
NEG_SLOPE = 0.2


def _leaky_relu(x):
    # 1 vmul + 1 vmax instead of cmp+mul+select.
    return jnp.maximum(x, NEG_SLOPE * x)


def _batch_norm(x, gamma, beta):
    # PyTorch BatchNorm1d training mode: batch statistics, biased variance.
    # One pass: E[x] and E[x^2]; var = E[x^2] - mean^2 (clamped for safety).
    mean = jnp.mean(x, axis=0, keepdims=True)
    ex2 = jnp.mean(x * x, axis=0, keepdims=True)
    var = jnp.maximum(ex2 - mean * mean, 0.0)
    return (x - mean) * jax.lax.rsqrt(var + BN_EPS) * gamma + beta


def _wq_matmul(x, w_ref, s_ref):
    """int8-weight matmul: dequant to bf16, bf16 MXU, f32 accumulation.

    i8 -> f32 -> bf16 keeps both converts on guaranteed Mosaic lowerings
    (a direct i8->bf16 convert would save one VPU pass if supported).
    The per-output-channel scale is one VPU multiply folded before the
    caller's bias add.
    """
    w = w_ref[...].astype(jnp.float32).astype(jnp.bfloat16)
    acc = jnp.dot(x.astype(jnp.bfloat16), w, preferred_element_type=jnp.float32)
    return acc * s_ref[...]


def generator_kernel(noise_ref, labels_ref, cbt_ref,
                     w1_ref, s1_ref,
                     w2_ref, s2_ref, b2_ref, g2_ref, be2_ref,
                     w3_ref, s3_ref, b3_ref, g3_ref, be3_ref,
                     w4_hbm, s4_ref, b4_ref, g4_ref, be4_ref,
                     w5_hbm, s5_ref, b5_ref,
                     o_ref,
                     w4_vmem, w5_vmem, dma_sem):
    # Kick off the two largest weight DMAs immediately; they complete under
    # the layer-1..3 compute instead of blocking the kernel up front.
    cp4 = pltpu.make_async_copy(w4_hbm, w4_vmem, dma_sem.at[0])
    cp5 = pltpu.make_async_copy(w5_hbm, w5_vmem, dma_sem.at[1])
    cp4.start()
    cp5.start()

    batch = o_ref.shape[0]

    # In-kernel class-bias gather: exact one-hot row-select via a tiny matmul.
    #   cb[b] = emb[labels[b]] @ W1[100:, :] + b1   (table precomputed once)
    iota = jax.lax.broadcasted_iota(jnp.int32, (batch, NUM_CLASSES), 1)
    onehot = jnp.where(labels_ref[...] == iota, 1.0, 0.0)          # (B, 10) f32
    cb = jnp.dot(onehot, cbt_ref[...], preferred_element_type=jnp.float32)

    # Layer 1: folded concat -> noise @ W1[:100] * s1 + class_bias, LeakyReLU.
    h = _leaky_relu(_wq_matmul(noise_ref[...], w1_ref, s1_ref) + cb)

    # Layer 2: Linear(128,256) + BN + LeakyReLU
    h = _wq_matmul(h, w2_ref, s2_ref) + b2_ref[...]
    h = _leaky_relu(_batch_norm(h, g2_ref[...], be2_ref[...]))

    # Layer 3: Linear(256,512) + BN + LeakyReLU
    h = _wq_matmul(h, w3_ref, s3_ref) + b3_ref[...]
    h = _leaky_relu(_batch_norm(h, g3_ref[...], be3_ref[...]))

    # Layer 4: Linear(512,1024) + BN + LeakyReLU (wait on prefetched weight
    # right before its matmul).
    cp4.wait()
    h = _wq_matmul(h, w4_vmem, s4_ref) + b4_ref[...]
    h = _leaky_relu(_batch_norm(h, g4_ref[...], be4_ref[...]))

    # Layer 5: Linear(1024, 896-padded) + Tanh (padded cols are zeros -> 0).
    cp5.wait()
    out = _wq_matmul(h, w5_vmem, s5_ref) + b5_ref[...]
    o_ref[...] = jnp.tanh(out)


def _whole_spec(shape):
    # Named helper: each call closes over its own `shape` (no late binding).
    return pl.BlockSpec(shape, lambda: (0,) * len(shape))


@functools.partial(jax.jit, static_argnames=("image_size", "channels"))
def generator_forward(noise, labels, params, *, image_size=IMAGE_SIZE,
                      channels=CHANNELS):
    """noise: (B, 100) f32, labels: (B,) int32.  Returns (B, C, H, W) f32."""
    batch = noise.shape[0]
    out_dim = channels * image_size * image_size
    out_pad = ((out_dim + 127) // 128) * 128

    labels2d = labels.reshape(batch, 1).astype(jnp.int32)

    hbm_names = frozenset(("w4", "w5"))        # manually prefetched in-kernel
    named_args = (
        ("noise", noise), ("labels", labels2d), ("cbt", params["cbt"]),
        ("w1", params["w1"]), ("s1", params["s1"]),
        ("w2", params["w2"]), ("s2", params["s2"]), ("b2", params["b2"]),
        ("g2", params["g2"]), ("be2", params["be2"]),
        ("w3", params["w3"]), ("s3", params["s3"]), ("b3", params["b3"]),
        ("g3", params["g3"]), ("be3", params["be3"]),
        ("w4", params["w4"]), ("s4", params["s4"]), ("b4", params["b4"]),
        ("g4", params["g4"]), ("be4", params["be4"]),
        ("w5", params["w5"]), ("s5", params["s5"]), ("b5", params["b5"]),
    )
    flat_args = tuple(a for _, a in named_args)
    in_specs = [pl.BlockSpec(memory_space=pl.ANY) if n in hbm_names
                else _whole_spec(a.shape) for n, a in named_args]

    out = pl.pallas_call(
        generator_kernel,
        out_shape=jax.ShapeDtypeStruct((batch, out_pad), jnp.float32),
        in_specs=in_specs,
        out_specs=_whole_spec((batch, out_pad)),
        scratch_shapes=[
            pltpu.VMEM(params["w4"].shape, jnp.int8),   # prefetch target for w4
            pltpu.VMEM(params["w5"].shape, jnp.int8),   # prefetch target for w5
            pltpu.SemaphoreType.DMA((2,)),
        ],
        compiler_params=pltpu.CompilerParams(
            vmem_limit_bytes=32 * 1024 * 1024),
    )(*flat_args)

    # Drop the lane padding, reshape NCHW like PyTorch's out.reshape(B,C,H,W).
    return out[:, :out_dim].reshape(batch, channels, image_size, image_size)


def _quantize_per_channel_int8(w):
    """Symmetric per-output-channel int8 quantization: w ~= q * scale."""
    amax = jnp.max(jnp.abs(w), axis=0, keepdims=True)
    scale = jnp.maximum(amax, 1e-8) / 127.0
    q = jnp.clip(jnp.round(w / scale), -127.0, 127.0).astype(jnp.int8)
    return q, scale.astype(jnp.float32)


def init_params(key):
    """Synthetic f32 reference params + the folded/quantized kernel params."""
    dims = (NOISE_DIM + NUM_CLASSES,) + HIDDEN + (OUT_DIM,)
    keys = jax.random.split(key, 6)
    k = iter(keys)

    def linear(kw, fan_in, fan_out):
        lim = 1.0 / jnp.sqrt(jnp.float32(fan_in))
        w = jax.random.uniform(kw, (fan_in, fan_out), jnp.float32, -lim, lim)
        return w, jnp.zeros((1, fan_out), jnp.float32)

    ref = {"emb": jax.random.normal(next(k), (NUM_CLASSES, NUM_CLASSES),
                                    jnp.float32)}
    for i, name in enumerate(("1", "2", "3", "4", "5")):
        ref["w" + name], ref["b" + name] = linear(next(k), dims[i], dims[i + 1])

    params = {}
    # Fold the label half of Linear1 into a per-class bias table (param-only):
    #   concat([z, e]) @ W1 + b1 == z @ W1[:100] + (e @ W1[100:] + b1)
    params["cbt"] = ref["emb"] @ ref["w1"][NOISE_DIM:] + ref["b1"]   # (10,128)
    params["w1"], params["s1"] = _quantize_per_channel_int8(ref["w1"][:NOISE_DIM])

    for name in ("2", "3", "4"):
        params["w" + name], params["s" + name] = _quantize_per_channel_int8(
            ref["w" + name])
        params["b" + name] = ref["b" + name]
        width = ref["b" + name].shape[1]
        # BatchNorm affine params (PyTorch default init: gamma=1, beta=0).
        params["g" + name] = jnp.ones((1, width), jnp.float32)
        params["be" + name] = jnp.zeros((1, width), jnp.float32)

    # Final layer padded to a lane-dense 896-wide output (zero columns).
    pad = OUT_PAD - OUT_DIM
    params["w5"], params["s5"] = _quantize_per_channel_int8(
        jnp.pad(ref["w5"], ((0, 0), (0, pad))))
    params["b5"] = jnp.pad(ref["b5"], ((0, 0), (0, pad)))
    return params, ref


def generator_reference(noise, labels, ref):
    """Pure-JAX f32 reference of the PyTorch module (training-mode BN)."""
    hp = jax.lax.Precision.HIGHEST

    def lrelu(x):
        return jnp.maximum(x, NEG_SLOPE * x)

    def bn(x):
        m = jnp.mean(x, axis=0, keepdims=True)
        v = jnp.mean((x - m) ** 2, axis=0, keepdims=True)
        return (x - m) * jax.lax.rsqrt(v + BN_EPS)

    x = jnp.concatenate([noise, ref["emb"][labels]], axis=-1)
    h = lrelu(jnp.dot(x, ref["w1"], precision=hp) + ref["b1"])
    h = lrelu(bn(jnp.dot(h, ref["w2"], precision=hp) + ref["b2"]))
    h = lrelu(bn(jnp.dot(h, ref["w3"], precision=hp) + ref["b3"]))
    h = lrelu(bn(jnp.dot(h, ref["w4"], precision=hp) + ref["b4"]))
    out = jnp.tanh(jnp.dot(h, ref["w5"], precision=hp) + ref["b5"])
    return out.reshape(noise.shape[0], CHANNELS, IMAGE_SIZE, IMAGE_SIZE)


if __name__ == "__main__":
    key = jax.random.PRNGKey(0)
    k_param, k_noise, k_label = jax.random.split(key, 3)

    batch = 8
    params, ref = init_params(k_param)
    noise = jax.random.normal(k_noise, (batch, NOISE_DIM), jnp.float32)
    labels = jax.random.randint(k_label, (batch,), 0, NUM_CLASSES, jnp.int32)

    images = generator_forward(noise, labels, params)
    jax.block_until_ready(images)

    assert images.shape == (batch, CHANNELS, IMAGE_SIZE, IMAGE_SIZE), images.shape
    assert bool(jnp.all(jnp.isfinite(images)))
    assert bool(jnp.all(jnp.abs(images) <= 1.0))  # tanh range

    # Explicit tolerance vs an f32 reference of the module: int8 weights plus
    # bf16 MXU accumulate to ~1e-2 absolute on the tanh output (BN on layers
    # 2-4 re-normalizes; layers 1 and 5 see the quant error directly).
    expected = generator_reference(noise, labels, ref)
    max_err = float(jnp.max(jnp.abs(images - expected)))
    assert max_err < 0.1, f"max abs err vs f32 reference: {max_err}"

    print("KERNEL_OK")
</pallas_src>

<mosaic_0001>
module attributes {stable_mosaic.version = 11 : i64} {
  func.func @generator_kernel(%arg0: memref<8x100xf32, #tpu.memory_space<vmem>>, %arg1: memref<8x1xi32, #tpu.memory_space<vmem>>, %arg2: memref<10x128xf32, #tpu.memory_space<vmem>>, %arg3: memref<100x128xi8, #tpu.memory_space<vmem>>, %arg4: memref<1x128xf32, #tpu.memory_space<vmem>>, %arg5: memref<128x256xi8, #tpu.memory_space<vmem>>, %arg6: memref<1x256xf32, #tpu.memory_space<vmem>>, %arg7: memref<1x256xf32, #tpu.memory_space<vmem>>, %arg8: memref<1x256xf32, #tpu.memory_space<vmem>>, %arg9: memref<1x256xf32, #tpu.memory_space<vmem>>, %arg10: memref<256x512xi8, #tpu.memory_space<vmem>>, %arg11: memref<1x512xf32, #tpu.memory_space<vmem>>, %arg12: memref<1x512xf32, #tpu.memory_space<vmem>>, %arg13: memref<1x512xf32, #tpu.memory_space<vmem>>, %arg14: memref<1x512xf32, #tpu.memory_space<vmem>>, %arg15: memref<512x1024xi8, #tpu.memory_space<any>>, %arg16: memref<1x1024xf32, #tpu.memory_space<vmem>>, %arg17: memref<1x1024xf32, #tpu.memory_space<vmem>>, %arg18: memref<1x1024xf32, #tpu.memory_space<vmem>>, %arg19: memref<1x1024xf32, #tpu.memory_space<vmem>>, %arg20: memref<1024x896xi8, #tpu.memory_space<any>>, %arg21: memref<1x896xf32, #tpu.memory_space<vmem>>, %arg22: memref<1x896xf32, #tpu.memory_space<vmem>>, %arg23: memref<8x896xf32, #tpu.memory_space<vmem>>, %arg24: memref<512x1024xi8, #tpu.memory_space<vmem>>, %arg25: memref<1024x896xi8, #tpu.memory_space<vmem>>, %arg26: memref<2x!tpu.dma_semaphore, #tpu.memory_space<semaphore_mem>>) attributes {dimension_semantics = [], scalar_prefetch = 0 : i64, scratch_operands = 3 : i64, tpu.core_type = #tpu.core_type<tc>} {
    %c0_i32 = arith.constant 0 : i32
    %0 = tpu.memref_slice %arg26[%c0_i32] : memref<2x!tpu.dma_semaphore, #tpu.memory_space<semaphore_mem>> -> memref<1x!tpu.dma_semaphore, #tpu.memory_space<semaphore_mem>>
    %1 = tpu.memref_squeeze %0 : memref<1x!tpu.dma_semaphore, #tpu.memory_space<semaphore_mem>> -> memref<!tpu.dma_semaphore, #tpu.memory_space<semaphore_mem>>
    tpu.enqueue_dma source(%arg15 : memref<512x1024xi8, #tpu.memory_space<any>>) target(%arg24 : memref<512x1024xi8, #tpu.memory_space<vmem>>) target_semaphore(%1 : memref<!tpu.dma_semaphore, #tpu.memory_space<semaphore_mem>>)
    %c1_i32 = arith.constant 1 : i32
    %2 = tpu.memref_slice %arg26[%c1_i32] : memref<2x!tpu.dma_semaphore, #tpu.memory_space<semaphore_mem>> -> memref<1x!tpu.dma_semaphore, #tpu.memory_space<semaphore_mem>>
    %3 = tpu.memref_squeeze %2 : memref<1x!tpu.dma_semaphore, #tpu.memory_space<semaphore_mem>> -> memref<!tpu.dma_semaphore, #tpu.memory_space<semaphore_mem>>
    tpu.enqueue_dma source(%arg20 : memref<1024x896xi8, #tpu.memory_space<any>>) target(%arg25 : memref<1024x896xi8, #tpu.memory_space<vmem>>) target_semaphore(%3 : memref<!tpu.dma_semaphore, #tpu.memory_space<semaphore_mem>>)
    %4 = tpu.iota {dimensions = array<i32: 1>} : vector<8x10xi32>
    %c0 = arith.constant 0 : index
    %c0_0 = arith.constant 0 : index
    %5 = vector.load %arg1[%c0, %c0_0] : memref<8x1xi32, #tpu.memory_space<vmem>>, vector<8x1xi32>
    %6 = vector.broadcast %5 : vector<8x1xi32> to vector<8x10xi32>
    %7 = arith.cmpi eq, %6, %4 : vector<8x10xi32>
    %cst = arith.constant 1.000000e+00 : f32
    %cst_1 = arith.constant 0.000000e+00 : f32
    %8 = vector.broadcast %cst : f32 to vector<8x10xf32>
    %9 = vector.broadcast %cst_1 : f32 to vector<8x10xf32>
    %10 = arith.select %7, %8, %9 : vector<8x10xi1>, vector<8x10xf32>
    %c0_2 = arith.constant 0 : index
    %c0_3 = arith.constant 0 : index
    %11 = vector.load %arg2[%c0_2, %c0_3] : memref<10x128xf32, #tpu.memory_space<vmem>>, vector<10x128xf32>
    %cst_4 = arith.constant dense<0.000000e+00> : vector<8x128xf32>
    %12 = tpu.matmul %10, %11, %cst_4 {dimension_numbers = #tpu.dot_dimension_numbers<[1], [0], [0], [1], [0, 0, 1, 1], [], []>} : vector<8x10xf32>, vector<10x128xf32>, vector<8x128xf32> -> vector<8x128xf32>
    %c0_5 = arith.constant 0 : index
    %c0_6 = arith.constant 0 : index
    %13 = vector.load %arg0[%c0_5, %c0_6] : memref<8x100xf32, #tpu.memory_space<vmem>>, vector<8x100xf32>
    %c0_7 = arith.constant 0 : index
    %c0_8 = arith.constant 0 : index
    %14 = vector.load %arg3[%c0_7, %c0_8] : memref<100x128xi8, #tpu.memory_space<vmem>>, vector<100x128xi8>
    %15 = arith.sitofp %14 : vector<100x128xi8> to vector<100x128xf32>
    %16 = arith.truncf %15 : vector<100x128xf32> to vector<100x128xbf16>
    %17 = arith.truncf %13 : vector<8x100xf32> to vector<8x100xbf16>
    %cst_9 = arith.constant dense<0.000000e+00> : vector<8x128xf32>
    %18 = tpu.matmul %17, %16, %cst_9 {dimension_numbers = #tpu.dot_dimension_numbers<[1], [0], [0], [1], [0, 0, 1, 1], [], []>} : vector<8x100xbf16>, vector<100x128xbf16>, vector<8x128xf32> -> vector<8x128xf32>
    %c0_10 = arith.constant 0 : index
    %c0_11 = arith.constant 0 : index
    %19 = vector.load %arg4[%c0_10, %c0_11] : memref<1x128xf32, #tpu.memory_space<vmem>>, vector<1x128xf32>
    %20 = vector.broadcast %19 : vector<1x128xf32> to vector<8x128xf32>
    %21 = arith.mulf %18, %20 : vector<8x128xf32>
    %22 = arith.addf %21, %12 : vector<8x128xf32>
    %cst_12 = arith.constant 2.000000e-01 : f32
    %23 = vector.broadcast %cst_12 : f32 to vector<8x128xf32>
    %24 = arith.mulf %23, %22 : vector<8x128xf32>
    %25 = arith.maximumf %22, %24 : vector<8x128xf32>
    %c0_13 = arith.constant 0 : index
    %c0_14 = arith.constant 0 : index
    %26 = vector.load %arg5[%c0_13, %c0_14] : memref<128x256xi8, #tpu.memory_space<vmem>>, vector<128x256xi8>
    %27 = arith.sitofp %26 : vector<128x256xi8> to vector<128x256xf32>
    %28 = arith.truncf %27 : vector<128x256xf32> to vector<128x256xbf16>
    %29 = arith.truncf %25 : vector<8x128xf32> to vector<8x128xbf16>
    %cst_15 = arith.constant dense<0.000000e+00> : vector<8x256xf32>
    %30 = tpu.matmul %29, %28, %cst_15 {dimension_numbers = #tpu.dot_dimension_numbers<[1], [0], [0], [1], [0, 0, 1, 1], [], []>} : vector<8x128xbf16>, vector<128x256xbf16>, vector<8x256xf32> -> vector<8x256xf32>
    %c0_16 = arith.constant 0 : index
    %c0_17 = arith.constant 0 : index
    %31 = vector.load %arg6[%c0_16, %c0_17] : memref<1x256xf32, #tpu.memory_space<vmem>>, vector<1x256xf32>
    %32 = vector.broadcast %31 : vector<1x256xf32> to vector<8x256xf32>
    %33 = arith.mulf %30, %32 : vector<8x256xf32>
    %c0_18 = arith.constant 0 : index
    %c0_19 = arith.constant 0 : index
    %34 = vector.load %arg7[%c0_18, %c0_19] : memref<1x256xf32, #tpu.memory_space<vmem>>, vector<1x256xf32>
    %35 = vector.broadcast %34 : vector<1x256xf32> to vector<8x256xf32>
    %36 = arith.addf %33, %35 : vector<8x256xf32>
    %c0_20 = arith.constant 0 : index
    %c0_21 = arith.constant 0 : index
    %37 = vector.load %arg8[%c0_20, %c0_21] : memref<1x256xf32, #tpu.memory_space<vmem>>, vector<1x256xf32>
    %c0_22 = arith.constant 0 : index
    %c0_23 = arith.constant 0 : index
    %38 = vector.load %arg9[%c0_22, %c0_23] : memref<1x256xf32, #tpu.memory_space<vmem>>, vector<1x256xf32>
    %cst_24 = arith.constant dense<0.000000e+00> : vector<256xf32>
    %39 = vector.multi_reduction <add>, %36, %cst_24 [0] : vector<8x256xf32> to vector<256xf32>
    %40 = vector.shape_cast %39 : vector<256xf32> to vector<1x256xf32>
    %cst_25 = arith.constant 8.000000e+00 : f32
    %41 = vector.broadcast %cst_25 : f32 to vector<1x256xf32>
    %42 = arith.divf %40, %41 : vector<1x256xf32>
    %43 = arith.mulf %36, %36 : vector<8x256xf32>
    %cst_26 = arith.constant dense<0.000000e+00> : vector<256xf32>
    %44 = vector.multi_reduction <add>, %43, %cst_26 [0] : vector<8x256xf32> to vector<256xf32>
    %45 = vector.shape_cast %44 : vector<256xf32> to vector<1x256xf32>
    %cst_27 = arith.constant 8.000000e+00 : f32
    %46 = vector.broadcast %cst_27 : f32 to vector<1x256xf32>
    %47 = arith.divf %45, %46 : vector<1x256xf32>
    %48 = arith.mulf %42, %42 : vector<1x256xf32>
    %49 = arith.subf %47, %48 : vector<1x256xf32>
    %cst_28 = arith.constant 0.000000e+00 : f32
    %50 = vector.broadcast %cst_28 : f32 to vector<1x256xf32>
    %51 = arith.maximumf %49, %50 : vector<1x256xf32>
    %52 = vector.broadcast %42 : vector<1x256xf32> to vector<8x256xf32>
    %53 = arith.subf %36, %52 : vector<8x256xf32>
    %cst_29 = arith.constant 9.99999974E-6 : f32
    %54 = vector.broadcast %cst_29 : f32 to vector<1x256xf32>
    %55 = arith.addf %51, %54 : vector<1x256xf32>
    %56 = math.rsqrt %55 : vector<1x256xf32>
    %57 = vector.broadcast %56 : vector<1x256xf32> to vector<8x256xf32>
    %58 = arith.mulf %53, %57 : vector<8x256xf32>
    %59 = vector.broadcast %37 : vector<1x256xf32> to vector<8x256xf32>
    %60 = arith.mulf %58, %59 : vector<8x256xf32>
    %61 = vector.broadcast %38 : vector<1x256xf32> to vector<8x256xf32>
    %62 = arith.addf %60, %61 : vector<8x256xf32>
    %cst_30 = arith.constant 2.000000e-01 : f32
    %63 = vector.broadcast %cst_30 : f32 to vector<8x256xf32>
    %64 = arith.mulf %63, %62 : vector<8x256xf32>
    %65 = arith.maximumf %62, %64 : vector<8x256xf32>
    %c0_31 = arith.constant 0 : index
    %c0_32 = arith.constant 0 : index
    %66 = vector.load %arg10[%c0_31, %c0_32] : memref<256x512xi8, #tpu.memory_space<vmem>>, vector<256x512xi8>
    %67 = arith.sitofp %66 : vector<256x512xi8> to vector<256x512xf32>
    %68 = arith.truncf %67 : vector<256x512xf32> to vector<256x512xbf16>
    %69 = arith.truncf %65 : vector<8x256xf32> to vector<8x256xbf16>
    %cst_33 = arith.constant dense<0.000000e+00> : vector<8x512xf32>
    %70 = tpu.matmul %69, %68, %cst_33 {dimension_numbers = #tpu.dot_dimension_numbers<[1], [0], [0], [1], [0, 0, 1, 1], [], []>} : vector<8x256xbf16>, vector<256x512xbf16>, vector<8x512xf32> -> vector<8x512xf32>
    %c0_34 = arith.constant 0 : index
    %c0_35 = arith.constant 0 : index
    %71 = vector.load %arg11[%c0_34, %c0_35] : memref<1x512xf32, #tpu.memory_space<vmem>>, vector<1x512xf32>
    %72 = vector.broadcast %71 : vector<1x512xf32> to vector<8x512xf32>
    %73 = arith.mulf %70, %72 : vector<8x512xf32>
    %c0_36 = arith.constant 0 : index
    %c0_37 = arith.constant 0 : index
    %74 = vector.load %arg12[%c0_36, %c0_37] : memref<1x512xf32, #tpu.memory_space<vmem>>, vector<1x512xf32>
    %75 = vector.broadcast %74 : vector<1x512xf32> to vector<8x512xf32>
    %76 = arith.addf %73, %75 : vector<8x512xf32>
    %c0_38 = arith.constant 0 : index
    %c0_39 = arith.constant 0 : index
    %77 = vector.load %arg13[%c0_38, %c0_39] : memref<1x512xf32, #tpu.memory_space<vmem>>, vector<1x512xf32>
    %c0_40 = arith.constant 0 : index
    %c0_41 = arith.constant 0 : index
    %78 = vector.load %arg14[%c0_40, %c0_41] : memref<1x512xf32, #tpu.memory_space<vmem>>, vector<1x512xf32>
    %cst_42 = arith.constant dense<0.000000e+00> : vector<512xf32>
    %79 = vector.multi_reduction <add>, %76, %cst_42 [0] : vector<8x512xf32> to vector<512xf32>
    %80 = vector.shape_cast %79 : vector<512xf32> to vector<1x512xf32>
    %cst_43 = arith.constant 8.000000e+00 : f32
    %81 = vector.broadcast %cst_43 : f32 to vector<1x512xf32>
    %82 = arith.divf %80, %81 : vector<1x512xf32>
    %83 = arith.mulf %76, %76 : vector<8x512xf32>
    %cst_44 = arith.constant dense<0.000000e+00> : vector<512xf32>
    %84 = vector.multi_reduction <add>, %83, %cst_44 [0] : vector<8x512xf32> to vector<512xf32>
    %85 = vector.shape_cast %84 : vector<512xf32> to vector<1x512xf32>
    %cst_45 = arith.constant 8.000000e+00 : f32
    %86 = vector.broadcast %cst_45 : f32 to vector<1x512xf32>
    %87 = arith.divf %85, %86 : vector<1x512xf32>
    %88 = arith.mulf %82, %82 : vector<1x512xf32>
    %89 = arith.subf %87, %88 : vector<1x512xf32>
    %cst_46 = arith.constant 0.000000e+00 : f32
    %90 = vector.broadcast %cst_46 : f32 to vector<1x512xf32>
    %91 = arith.maximumf %89, %90 : vector<1x512xf32>
    %92 = vector.broadcast %82 : vector<1x512xf32> to vector<8x512xf32>
    %93 = arith.subf %76, %92 : vector<8x512xf32>
    %cst_47 = arith.constant 9.99999974E-6 : f32
    %94 = vector.broadcast %cst_47 : f32 to vector<1x512xf32>
    %95 = arith.addf %91, %94 : vector<1x512xf32>
    %96 = math.rsqrt %95 : vector<1x512xf32>
    %97 = vector.broadcast %96 : vector<1x512xf32> to vector<8x512xf32>
    %98 = arith.mulf %93, %97 : vector<8x512xf32>
    %99 = vector.broadcast %77 : vector<1x512xf32> to vector<8x512xf32>
    %100 = arith.mulf %98, %99 : vector<8x512xf32>
    %101 = vector.broadcast %78 : vector<1x512xf32> to vector<8x512xf32>
    %102 = arith.addf %100, %101 : vector<8x512xf32>
    %cst_48 = arith.constant 2.000000e-01 : f32
    %103 = vector.broadcast %cst_48 : f32 to vector<8x512xf32>
    %104 = arith.mulf %103, %102 : vector<8x512xf32>
    %105 = arith.maximumf %102, %104 : vector<8x512xf32>
    %c0_i32_49 = arith.constant 0 : i32
    %106 = tpu.memref_slice %arg26[%c0_i32_49] : memref<2x!tpu.dma_semaphore, #tpu.memory_space<semaphore_mem>> -> memref<1x!tpu.dma_semaphore, #tpu.memory_space<semaphore_mem>>
    %107 = tpu.memref_squeeze %106 : memref<1x!tpu.dma_semaphore, #tpu.memory_space<semaphore_mem>> -> memref<!tpu.dma_semaphore, #tpu.memory_space<semaphore_mem>>
    tpu.wait_dma2 semaphore(%107 : memref<!tpu.dma_semaphore, #tpu.memory_space<semaphore_mem>>) src(%arg15 : memref<512x1024xi8, #tpu.memory_space<any>>) dst(%arg24 : memref<512x1024xi8, #tpu.memory_space<vmem>>)
    %c0_50 = arith.constant 0 : index
    %c0_51 = arith.constant 0 : index
    %108 = vector.load %arg24[%c0_50, %c0_51] : memref<512x1024xi8, #tpu.memory_space<vmem>>, vector<512x1024xi8>
    %109 = arith.sitofp %108 : vector<512x1024xi8> to vector<512x1024xf32>
    %110 = arith.truncf %109 : vector<512x1024xf32> to vector<512x1024xbf16>
    %111 = arith.truncf %105 : vector<8x512xf32> to vector<8x512xbf16>
    %cst_52 = arith.constant dense<0.000000e+00> : vector<8x1024xf32>
    %112 = tpu.matmul %111, %110, %cst_52 {dimension_numbers = #tpu.dot_dimension_numbers<[1], [0], [0], [1], [0, 0, 1, 1], [], []>} : vector<8x512xbf16>, vector<512x1024xbf16>, vector<8x1024xf32> -> vector<8x1024xf32>
    %c0_53 = arith.constant 0 : index
    %c0_54 = arith.constant 0 : index
    %113 = vector.load %arg16[%c0_53, %c0_54] : memref<1x1024xf32, #tpu.memory_space<vmem>>, vector<1x1024xf32>
    %114 = vector.broadcast %113 : vector<1x1024xf32> to vector<8x1024xf32>
    %115 = arith.mulf %112, %114 : vector<8x1024xf32>
    %c0_55 = arith.constant 0 : index
    %c0_56 = arith.constant 0 : index
    %116 = vector.load %arg17[%c0_55, %c0_56] : memref<1x1024xf32, #tpu.memory_space<vmem>>, vector<1x1024xf32>
    %117 = vector.broadcast %116 : vector<1x1024xf32> to vector<8x1024xf32>
    %118 = arith.addf %115, %117 : vector<8x1024xf32>
    %c0_57 = arith.constant 0 : index
    %c0_58 = arith.constant 0 : index
    %119 = vector.load %arg18[%c0_57, %c0_58] : memref<1x1024xf32, #tpu.memory_space<vmem>>, vector<1x1024xf32>
    %c0_59 = arith.constant 0 : index
    %c0_60 = arith.constant 0 : index
    %120 = vector.load %arg19[%c0_59, %c0_60] : memref<1x1024xf32, #tpu.memory_space<vmem>>, vector<1x1024xf32>
    %cst_61 = arith.constant dense<0.000000e+00> : vector<1024xf32>
    %121 = vector.multi_reduction <add>, %118, %cst_61 [0] : vector<8x1024xf32> to vector<1024xf32>
    %122 = vector.shape_cast %121 : vector<1024xf32> to vector<1x1024xf32>
    %cst_62 = arith.constant 8.000000e+00 : f32
    %123 = vector.broadcast %cst_62 : f32 to vector<1x1024xf32>
    %124 = arith.divf %122, %123 : vector<1x1024xf32>
    %125 = arith.mulf %118, %118 : vector<8x1024xf32>
    %cst_63 = arith.constant dense<0.000000e+00> : vector<1024xf32>
    %126 = vector.multi_reduction <add>, %125, %cst_63 [0] : vector<8x1024xf32> to vector<1024xf32>
    %127 = vector.shape_cast %126 : vector<1024xf32> to vector<1x1024xf32>
    %cst_64 = arith.constant 8.000000e+00 : f32
    %128 = vector.broadcast %cst_64 : f32 to vector<1x1024xf32>
    %129 = arith.divf %127, %128 : vector<1x1024xf32>
    %130 = arith.mulf %124, %124 : vector<1x1024xf32>
    %131 = arith.subf %129, %130 : vector<1x1024xf32>
    %cst_65 = arith.constant 0.000000e+00 : f32
    %132 = vector.broadcast %cst_65 : f32 to vector<1x1024xf32>
    %133 = arith.maximumf %131, %132 : vector<1x1024xf32>
    %134 = vector.broadcast %124 : vector<1x1024xf32> to vector<8x1024xf32>
    %135 = arith.subf %118, %134 : vector<8x1024xf32>
    %cst_66 = arith.constant 9.99999974E-6 : f32
    %136 = vector.broadcast %cst_66 : f32 to vector<1x1024xf32>
    %137 = arith.addf %133, %136 : vector<1x1024xf32>
    %138 = math.rsqrt %137 : vector<1x1024xf32>
    %139 = vector.broadcast %138 : vector<1x1024xf32> to vector<8x1024xf32>
    %140 = arith.mulf %135, %139 : vector<8x1024xf32>
    %141 = vector.broadcast %119 : vector<1x1024xf32> to vector<8x1024xf32>
    %142 = arith.mulf %140, %141 : vector<8x1024xf32>
    %143 = vector.broadcast %120 : vector<1x1024xf32> to vector<8x1024xf32>
    %144 = arith.addf %142, %143 : vector<8x1024xf32>
    %cst_67 = arith.constant 2.000000e-01 : f32
    %145 = vector.broadcast %cst_67 : f32 to vector<8x1024xf32>
    %146 = arith.mulf %145, %144 : vector<8x1024xf32>
    %147 = arith.maximumf %144, %146 : vector<8x1024xf32>
    %c1_i32_68 = arith.constant 1 : i32
    %148 = tpu.memref_slice %arg26[%c1_i32_68] : memref<2x!tpu.dma_semaphore, #tpu.memory_space<semaphore_mem>> -> memref<1x!tpu.dma_semaphore, #tpu.memory_space<semaphore_mem>>
    %149 = tpu.memref_squeeze %148 : memref<1x!tpu.dma_semaphore, #tpu.memory_space<semaphore_mem>> -> memref<!tpu.dma_semaphore, #tpu.memory_space<semaphore_mem>>
    tpu.wait_dma2 semaphore(%149 : memref<!tpu.dma_semaphore, #tpu.memory_space<semaphore_mem>>) src(%arg20 : memref<1024x896xi8, #tpu.memory_space<any>>) dst(%arg25 : memref<1024x896xi8, #tpu.memory_space<vmem>>)
    %c0_69 = arith.constant 0 : index
    %c0_70 = arith.constant 0 : index
    %150 = vector.load %arg25[%c0_69, %c0_70] : memref<1024x896xi8, #tpu.memory_space<vmem>>, vector<1024x896xi8>
    %151 = arith.sitofp %150 : vector<1024x896xi8> to vector<1024x896xf32>
    %152 = arith.truncf %151 : vector<1024x896xf32> to vector<1024x896xbf16>
    %153 = arith.truncf %147 : vector<8x1024xf32> to vector<8x1024xbf16>
    %cst_71 = arith.constant dense<0.000000e+00> : vector<8x896xf32>
    %154 = tpu.matmul %153, %152, %cst_71 {dimension_numbers = #tpu.dot_dimension_numbers<[1], [0], [0], [1], [0, 0, 1, 1], [], []>} : vector<8x1024xbf16>, vector<1024x896xbf16>, vector<8x896xf32> -> vector<8x896xf32>
    %c0_72 = arith.constant 0 : index
    %c0_73 = arith.constant 0 : index
    %155 = vector.load %arg21[%c0_72, %c0_73] : memref<1x896xf32, #tpu.memory_space<vmem>>, vector<1x896xf32>
    %156 = vector.broadcast %155 : vector<1x896xf32> to vector<8x896xf32>
    %157 = arith.mulf %154, %156 : vector<8x896xf32>
    %c0_74 = arith.constant 0 : index
    %c0_75 = arith.constant 0 : index
    %158 = vector.load %arg22[%c0_74, %c0_75] : memref<1x896xf32, #tpu.memory_space<vmem>>, vector<1x896xf32>
    %159 = vector.broadcast %158 : vector<1x896xf32> to vector<8x896xf32>
    %160 = arith.addf %157, %159 : vector<8x896xf32>
    %161 = math.tanh %160 : vector<8x896xf32>
    %c0_76 = arith.constant 0 : index
    %c0_77 = arith.constant 0 : index
    %162 = vector.load %arg23[%c0_76, %c0_77] : memref<8x896xf32, #tpu.memory_space<vmem>>, vector<8x896xf32>
    tpu.vector_store %arg23[%c0_76, %c0_77], %161 {strides = array<i32>} : memref<8x896xf32, #tpu.memory_space<vmem>>, vector<8x896xf32>,
    return
  }
}

</mosaic_0001>

<bundles_post_ra>
// kernel: generator_forward.1
= control target key start
LH: loop header
LB: loop body
LE: loop exit
PB: predicated region body
PF: predicated region fallthrough
CT: control target
= control target key end

     0   :  { %s5140_s0 = inlined_call_operand.hbm [shape: f32[8,100], index: 0, kind: input, shape index: {}]   ;;  %s5141_s1 = inlined_call_operand.vmem [shape: s32[8,1], index: 1, kind: input, shape index: {}]   ;;  %s5142_s2 = inlined_call_operand.vmem [shape: f32[10,128], index: 2, kind: input, shape index: {}]   ;;  %s5143_s3 = inlined_call_operand.hbm [shape: s8[100,128], index: 3, kind: input, shape index: {}]   ;;  %s5144_s4 = inlined_call_operand.hbm [shape: f32[1,128], index: 4, kind: input, shape index: {}]   ;;  %s5145_s5 = inlined_call_operand.vmem [shape: s8[128,256], index: 5, kind: input, shape index: {}]   ;;  %s5146_s6 = inlined_call_operand.hbm [shape: f32[1,256], index: 6, kind: input, shape index: {}]   ;;  %s5147_s7 = inlined_call_operand.hbm [shape: f32[1,256], index: 7, kind: input, shape index: {}]   ;;  %s5148_s8 = inlined_call_operand.hbm [shape: f32[1,256], index: 8, kind: input, shape index: {}]   ;;  %s5149_s9 = inlined_call_operand.hbm [shape: f32[1,256], index: 9, kind: input, shape index: {}]   ;;  %s5150_s10 = inlined_call_operand.hbm [shape: s8[256,512], index: 10, kind: input, shape index: {}]   ;;  %s5151_s11 = inlined_call_operand.vmem [shape: f32[1,512], index: 11, kind: input, shape index: {}]   ;;  %s5152_s12 = inlined_call_operand.hbm [shape: f32[1,512], index: 12, kind: input, shape index: {}]   ;;  %s5153_s13 = inlined_call_operand.hbm [shape: f32[1,512], index: 13, kind: input, shape index: {}]   ;;  %s5154_s14 = inlined_call_operand.hbm [shape: f32[1,512], index: 14, kind: input, shape index: {}]   ;;  %s5155_s15 = inlined_call_operand.hbm [shape: s8[512,1024], index: 15, kind: input, shape index: {}]   ;;  %s5156_s16 = inlined_call_operand.hbm [shape: f32[1,1024], index: 16, kind: input, shape index: {}]   ;;  %s5157_s17 = inlined_call_operand.hbm [shape: f32[1,1024], index: 17, kind: input, shape index: {}]   ;;  %s5158_s18 = inlined_call_operand.hbm [shape: f32[1,1024], index: 18, kind: input, shape index: {}]   ;;  %s5159_s19 = inlined_call_operand.hbm [shape: f32[1,1024], index: 19, kind: input, shape index: {}]   ;;  %s5160_s20 = inlined_call_operand.hbm [shape: s8[1024,896], index: 20, kind: input, shape index: {}]   ;;  %s5161_s21 = inlined_call_operand.hbm [shape: f32[1,896], index: 21, kind: input, shape index: {}]   ;;  %s5162_s22 = inlined_call_operand.hbm [shape: f32[1,896], index: 22, kind: input, shape index: {}]   ;;  %s5163_s23 = inlined_call_operand.vmem [shape: f32[8,896], index: 23, kind: output, shape index: {}]  }
   0x1   :  { %5173 = sst [smem:[#allocation48_spill]] %s5140_s0 }
   0x2   :  { %5174 = sst [smem:[#allocation49_spill]] %s5141_s1 }
   0x3   :  { %5175 = sst [smem:[#allocation50_spill]] %s5142_s2 }
   0x4   :  { %5176 = sst [smem:[#allocation51_spill]] %s5143_s3 }
   0x5   :  { %5177 = sst [smem:[#allocation52_spill]] %s5144_s4 }
   0x6   :  { %5178 = sst [smem:[#allocation53_spill]] %s5145_s5 }
   0x7   :  { %5179 = sst [smem:[#allocation54_spill]] %s5146_s6 }
   0x8   :  { %5180 = sst [smem:[#allocation55_spill]] %s5147_s7 }
   0x9   :  { %5181 = sst [smem:[#allocation56_spill]] %s5151_s11 }
   0xa   :  { %5182 = sst [smem:[#allocation57_spill]] %s5160_s20 }
   0xb   :  { %5183 = sst [smem:[#allocation58_spill]] %s5163_s23 }
   0xc   :  { %28 = vsyncpa [#allocation6], 0 }
   0xd   :  { %29 = vsyncpa [#allocation8], 0 }
   0xe   :  { %30 = vsyncpa [#allocation11], 0 }
   0xf   :  { %31 = vsyncpa [#allocation14], 0 }
  0x10   :  { %32 = vsyncpa [#allocation17], 0 }
  0x11   :  { %33 = vsyncpa [#allocation20], 0 }
  0x12   :  { %34 = vsyncpa [#allocation23], 0 }
  0x13   :  { %35 = vsyncpa [#allocation26], 0 }
  0x14   :  { %36 = vsyncpa [#allocation29], 0  ;;  %s4337_s4 = smov [#allocation7]   ;;  %s5184_s5 = sld [smem:[#allocation51_spill]] }
  0x15   :  { %s56_s30 = sshll.u32 %s4337_s4, 4  ;;  %s57_s30 = int_to_ptr.vmem [resolvable:$true] %s56_s30 }
  0x1a   :  { %s3897_s1 = scalar_lea.hbm %s5184_s5, 416 }
  0x1b   :  { %p3898_p0 = scmp.ne.s32.totalorder %s5184_s5, %s3897_s1  ;;  %p3901_p1 = scmp.lt.u32.totalorder %s3897_s1, %s5184_s5 }
  0x1d   :  { %p3903_p2 = pnand %p3901_p1, %p3898_p0 }
  0x1f   :  { %3906 = shalt.err (!%p3903_p2)
}
  0x20   :  { %s3907_s7 = scalar_lea.vmem %s57_s30, 416  ;;  %p3912_p4 = scmp.lt.s32.totalorder %s57_s30, %s57_s30 }
  0x21   :  { %p3908_p3 = scmp.ne.s32.totalorder %s57_s30, %s3907_s7  ;;  %p3913_p5 = scmp.lt.s32.totalorder %s3907_s7, %s3907_s7 }
  0x23   :  { %p3914_p6 = por %p3913_p5, %p3912_p4 }
  0x25   :  { %p3915_p7 = pnand %p3914_p6, %p3908_p3 }
  0x27   :  { %3918 = shalt.err (!%p3915_p7)
}
  0x28   :  { %s4338_s28 = smov 32   ;;  %s4339_s29 = smov 2  }
  0x29   :  { %62 = dma.hbm_to_vmem [thread:$0]  %s5184_s5, 416, %s57_s30, [#allocation8], %s4338_s28, %s4338_s28, %s4339_s29  }
  0x2a   :  { %s4340_s4 = smov [#allocation10]   ;;  %s4341_s25 = smov [#allocation13]  }
  0x2b   :  { %s81_s24 = sshll.u32 %s4340_s4, 4  ;;  %s101_s1 = sshll.u32 %s4341_s25, 4  ;;  %s82_s24 = int_to_ptr.vmem [resolvable:$true] %s81_s24  ;;  %s102_s1 = int_to_ptr.vmem [resolvable:$true] %s101_s1 }
  0x2c   :  { %s5185_s6 = sld [smem:[#allocation54_spill]] }
  0x32   :  { %s3919_s27 = scalar_lea.hbm %s5185_s6, 32 }
  0x33   :  { %p3920_p8 = scmp.ne.s32.totalorder %s5185_s6, %s3919_s27  ;;  %p3923_p9 = scmp.lt.u32.totalorder %s3919_s27, %s5185_s6 }
  0x35   :  { %p3925_p10 = pnand %p3923_p9, %p3920_p8 }
  0x37   :  { %3928 = shalt.err (!%p3925_p10)
}
  0x38   :  { %s3929_s30 = scalar_lea.vmem %s82_s24, 32  ;;  %p3934_p12 = scmp.lt.s32.totalorder %s82_s24, %s82_s24 }
  0x39   :  { %p3930_p11 = scmp.ne.s32.totalorder %s82_s24, %s3929_s30  ;;  %p3935_p13 = scmp.lt.s32.totalorder %s3929_s30, %s3929_s30 }
  0x3b   :  { %p3936_p0 = por %p3935_p13, %p3934_p12 }
  0x3d   :  { %p3937_p1 = pnand %p3936_p0, %p3930_p11 }
  0x3f   :  { %3940 = shalt.err (!%p3937_p1)
}
  0x40   :  { %84 = dma.hbm_to_vmem [thread:$0]  %s5185_s6, 32, %s82_s24, [#allocation11]  }
  0x41   :  { %s3941_s0 = scalar_lea.hbm %s5148_s8, 32 }
  0x42   :  { %p3942_p2 = scmp.ne.s32.totalorder %s5148_s8, %s3941_s0  ;;  %p3945_p3 = scmp.lt.u32.totalorder %s3941_s0, %s5148_s8 }
  0x44   :  { %p3947_p4 = pnand %p3945_p3, %p3942_p2 }
  0x46   :  { %3950 = shalt.err (!%p3947_p4)
}
  0x47   :  { %s3951_s26 = scalar_lea.vmem %s102_s1, 32  ;;  %p3956_p6 = scmp.lt.s32.totalorder %s102_s1, %s102_s1 }
  0x48   :  { %p3952_p5 = scmp.ne.s32.totalorder %s102_s1, %s3951_s26  ;;  %p3957_p7 = scmp.lt.s32.totalorder %s3951_s26, %s3951_s26 }
  0x4a   :  { %p3958_p8 = por %p3957_p7, %p3956_p6 }
  0x4c   :  { %p3959_p9 = pnand %p3958_p8, %p3952_p5 }
  0x4e   :  { %3962 = shalt.err (!%p3959_p9)
}
  0x4f   :  { %104 = dma.hbm_to_vmem [thread:$0]  %s5148_s8, 32, %s102_s1, [#allocation14]  }
  0x50   :  { %s4342_s6 = smov [#allocation16]   ;;  %s3963_s5 = scalar_lea.hbm %s5150_s10, 4096 }
  0x51   :  { %s120_s27 = sshll.u32 %s4342_s6, 4  ;;  %p3964_p10 = scmp.ne.s32.totalorder %s5150_s10, %s3963_s5  ;;  %s121_s27 = int_to_ptr.vmem [resolvable:$true] %s120_s27 }
  0x52   :  { %p3967_p11 = scmp.lt.u32.totalorder %s3963_s5, %s5150_s10 }
  0x54   :  { %p3969_p12 = pnand %p3967_p11, %p3964_p10 }
  0x56   :  { %3972 = shalt.err (!%p3969_p12)
}
  0x57   :  { %s3973_s11 = scalar_lea.vmem %s121_s27, 4096  ;;  %p3978_p0 = scmp.lt.s32.totalorder %s121_s27, %s121_s27 }
  0x58   :  { %p3974_p13 = scmp.ne.s32.totalorder %s121_s27, %s3973_s11  ;;  %p3979_p1 = scmp.lt.s32.totalorder %s3973_s11, %s3973_s11 }
  0x5a   :  { %p3980_p2 = por %p3979_p1, %p3978_p0 }
  0x5c   :  { %p3981_p3 = pnand %p3980_p2, %p3974_p13 }
  0x5e   :  { %3984 = shalt.err (!%p3981_p3)
}
  0x5f   :  { %s4343_s8 = smov 512   ;;  %s4344_s4 = smov [#allocation19]  }
  0x60   :  { %126 = dma.hbm_to_vmem [thread:$0]  %s5150_s10, 4096, %s121_s27, [#allocation17], %s4343_s8, %s4343_s8, %s4338_s28  }
  0x61   :  { %s145_s25 = sshll.u32 %s4344_s4, 4  ;;  %s4345_s26 = smov [#allocation22]   ;;  %s146_s25 = int_to_ptr.vmem [resolvable:$true] %s145_s25 }
  0x62   :  { %s165_s24 = sshll.u32 %s4345_s26, 4  ;;  %s3985_s7 = scalar_lea.hbm %s5153_s13, 64  ;;  %s166_s24 = int_to_ptr.vmem [resolvable:$true] %s165_s24 }
  0x63   :  { %p3986_p4 = scmp.ne.s32.totalorder %s5153_s13, %s3985_s7  ;;  %p3989_p5 = scmp.lt.u32.totalorder %s3985_s7, %s5153_s13 }
  0x65   :  { %p3991_p6 = pnand %p3989_p5, %p3986_p4 }
  0x67   :  { %3994 = shalt.err (!%p3991_p6)
}
  0x68   :  { %s3995_s10 = scalar_lea.vmem %s146_s25, 64  ;;  %p4000_p8 = scmp.lt.s32.totalorder %s146_s25, %s146_s25 }
  0x69   :  { %p3996_p7 = scmp.ne.s32.totalorder %s146_s25, %s3995_s10  ;;  %p4001_p9 = scmp.lt.s32.totalorder %s3995_s10, %s3995_s10 }
  0x6b   :  { %p4002_p10 = por %p4001_p9, %p4000_p8 }
  0x6d   :  { %p4003_p11 = pnand %p4002_p10, %p3996_p7 }
  0x6f   :  { %4006 = shalt.err (!%p4003_p11)
}
  0x70   :  { %148 = dma.hbm_to_vmem [thread:$0]  %s5153_s13, 64, %s146_s25, [#allocation20]  }
  0x71   :  { %s4007_s11 = scalar_lea.hbm %s5156_s16, 128 }
  0x72   :  { %p4008_p12 = scmp.ne.s32.totalorder %s5156_s16, %s4007_s11  ;;  %p4011_p13 = scmp.lt.u32.totalorder %s4007_s11, %s5156_s16 }
  0x74   :  { %p4013_p0 = pnand %p4011_p13, %p4008_p12 }
  0x76   :  { %4016 = shalt.err (!%p4013_p0)
}
  0x77   :  { %s4017_s26 = scalar_lea.vmem %s166_s24, 128  ;;  %p4022_p2 = scmp.lt.s32.totalorder %s166_s24, %s166_s24 }
  0x78   :  { %p4018_p1 = scmp.ne.s32.totalorder %s166_s24, %s4017_s26  ;;  %p4023_p3 = scmp.lt.s32.totalorder %s4017_s26, %s4017_s26 }
  0x7a   :  { %p4024_p4 = por %p4023_p3, %p4022_p2 }
  0x7c   :  { %p4025_p5 = pnand %p4024_p4, %p4018_p1 }
  0x7e   :  { %4028 = shalt.err (!%p4025_p5)
}
  0x7f   :  { %168 = dma.hbm_to_vmem [thread:$0]  %s5156_s16, 128, %s166_s24, [#allocation23]  }
  0x80   :  { %s4346_s2 = smov [#allocation25]   ;;  %s4347_s7 = smov [#allocation28]  }
  0x81   :  { %s185_s6 = sshll.u32 %s4346_s2, 4  ;;  %s205_s30 = sshll.u32 %s4347_s7, 4  ;;  %s186_s6 = int_to_ptr.vmem [resolvable:$true] %s185_s6  ;;  %s206_s30 = int_to_ptr.vmem [resolvable:$true] %s205_s30 }
  0x82   :  { %s4029_s23 = scalar_lea.hbm %s5158_s18, 128 }
  0x83   :  { %p4030_p6 = scmp.ne.s32.totalorder %s5158_s18, %s4029_s23  ;;  %p4033_p7 = scmp.lt.u32.totalorder %s4029_s23, %s5158_s18 }
  0x85   :  { %p4035_p8 = pnand %p4033_p7, %p4030_p6 }
  0x87   :  { %4038 = shalt.err (!%p4035_p8)
}
  0x88   :  { %s4039_s16 = scalar_lea.vmem %s186_s6, 128  ;;  %p4044_p10 = scmp.lt.s32.totalorder %s186_s6, %s186_s6 }
  0x89   :  { %p4040_p9 = scmp.ne.s32.totalorder %s186_s6, %s4039_s16  ;;  %p4045_p11 = scmp.lt.s32.totalorder %s4039_s16, %s4039_s16 }
  0x8b   :  { %p4046_p12 = por %p4045_p11, %p4044_p10 }
  0x8d   :  { %p4047_p13 = pnand %p4046_p12, %p4040_p9 }
  0x8f   :  { %4050 = shalt.err (!%p4047_p13)
}
  0x90   :  { %188 = dma.hbm_to_vmem [thread:$0]  %s5158_s18, 128, %s186_s6, [#allocation26]  }
  0x91   :  { %s4051_s1 = scalar_lea.hbm %s5161_s21, 112 }
  0x92   :  { %p4052_p0 = scmp.ne.s32.totalorder %s5161_s21, %s4051_s1  ;;  %p4055_p1 = scmp.lt.u32.totalorder %s4051_s1, %s5161_s21 }
  0x94   :  { %p4057_p2 = pnand %p4055_p1, %p4052_p0 }
  0x96   :  { %4060 = shalt.err (!%p4057_p2)
}
  0x97   :  { %s4061_s25 = scalar_lea.vmem %s206_s30, 112  ;;  %s4065_s2 = scalar_lea.vmem %s206_s30, 128 }
  0x98   :  { %p4062_p3 = scmp.ne.s32.totalorder %s206_s30, %s4061_s25  ;;  %p4066_p4 = scmp.lt.s32.totalorder %s206_s30, %s206_s30 }
  0x99   :  { %p4067_p5 = scmp.lt.s32.totalorder %s4065_s2, %s4061_s25 }
  0x9b   :  { %p4068_p6 = por %p4067_p5, %p4066_p4 }
  0x9d   :  { %p4069_p7 = pnand %p4068_p6, %p4062_p3 }
  0x9f   :  { %4072 = shalt.err (!%p4069_p7)
}
  0xa0   :  { %208 = dma.hbm_to_vmem [thread:$0]  %s5161_s21, 112, %s206_s30, [#allocation29]  }
  0xa1   :  { %s4348_s7 = smov [#allocation5]   ;;  %s4349_s29 = smov [#allocation9]  }
  0xa2   :  { %s43_s5 = sshll.u32 %s4348_s7, 4  ;;  %s69_s23 = sshll.u32 %s4349_s29, 4  ;;  %s44_s5 = int_to_ptr.vmem [resolvable:$true] %s43_s5  ;;  %s70_s23 = int_to_ptr.vmem [resolvable:$true] %s69_s23 }
  0xa3   :  { %s5186_s27 = sld [smem:[#allocation48_spill]] }
  0xa9   :  { %s4073_s3 = scalar_lea.hbm %s5186_s27, 128 }
  0xaa   :  { %p4074_p8 = scmp.ne.s32.totalorder %s5186_s27, %s4073_s3  ;;  %p4077_p9 = scmp.lt.u32.totalorder %s4073_s3, %s5186_s27 }
  0xac   :  { %p4079_p10 = pnand %p4077_p9, %p4074_p8 }
  0xae   :  { %4082 = shalt.err (!%p4079_p10)
}
  0xaf   :  { %s4083_s21 = scalar_lea.vmem %s44_s5, 128  ;;  %p4088_p12 = scmp.lt.s32.totalorder %s44_s5, %s44_s5 }
  0xb0   :  { %p4084_p11 = scmp.ne.s32.totalorder %s44_s5, %s4083_s21  ;;  %p4089_p13 = scmp.lt.s32.totalorder %s4083_s21, %s4083_s21 }
  0xb2   :  { %p4090_p0 = por %p4089_p13, %p4088_p12 }
  0xb4   :  { %p4091_p1 = pnand %p4090_p0, %p4084_p11 }
  0xb6   :  { %4094 = shalt.err (!%p4091_p1)
}
  0xb7   :  { %46 = dma.hbm_to_vmem [thread:$0]  %s5186_s27, 128, %s44_s5, [#allocation6]  }
  0xb8   :  { %s5187_s4 = sld [smem:[#allocation52_spill]] }
  0xbe   :  { %s4095_s26 = scalar_lea.hbm %s5187_s4, 16 }
  0xbf   :  { %p4096_p2 = scmp.ne.s32.totalorder %s5187_s4, %s4095_s26  ;;  %p4099_p3 = scmp.lt.u32.totalorder %s4095_s26, %s5187_s4 }
  0xc1   :  { %p4101_p4 = pnand %p4099_p3, %p4096_p2 }
  0xc3   :  { %4104 = shalt.err (!%p4101_p4)
}
  0xc4   :  { %s4105_s6 = scalar_lea.vmem %s70_s23, 16  ;;  %s4109_s7 = scalar_lea.vmem %s70_s23, 32 }
  0xc5   :  { %p4106_p5 = scmp.ne.s32.totalorder %s70_s23, %s4105_s6  ;;  %p4110_p6 = scmp.lt.s32.totalorder %s70_s23, %s70_s23 }
  0xc6   :  { %p4111_p7 = scmp.lt.s32.totalorder %s4109_s7, %s4105_s6 }
  0xc8   :  { %p4112_p8 = por %p4111_p7, %p4110_p6 }
  0xca   :  { %p4113_p9 = pnand %p4112_p8, %p4106_p5 }
  0xcc   :  { %4116 = shalt.err (!%p4113_p9)
}
  0xcd   :  { %72 = dma.hbm_to_vmem [thread:$0]  %s5187_s4, 16, %s70_s23, [#allocation8]  }
  0xce   :  { %s4350_s10 = smov [#allocation12]   ;;  %s4351_s27 = smov [#allocation15]  }
  0xcf   :  { %s91_s28 = sshll.u32 %s4350_s10, 4  ;;  %s111_s3 = sshll.u32 %s4351_s27, 4  ;;  %s92_s28 = int_to_ptr.vmem [resolvable:$true] %s91_s28  ;;  %s112_s3 = int_to_ptr.vmem [resolvable:$true] %s111_s3 }
  0xd0   :  { %s5188_s0 = sld [smem:[#allocation55_spill]] }
  0xd6   :  { %s4117_s11 = scalar_lea.hbm %s5188_s0, 32 }
  0xd7   :  { %p4118_p10 = scmp.ne.s32.totalorder %s5188_s0, %s4117_s11  ;;  %p4121_p11 = scmp.lt.u32.totalorder %s4117_s11, %s5188_s0 }
  0xd9   :  { %p4123_p12 = pnand %p4121_p11, %p4118_p10 }
  0xdb   :  { %4126 = shalt.err (!%p4123_p12)
}
  0xdc   :  { %s4127_s23 = scalar_lea.vmem %s92_s28, 32  ;;  %p4132_p0 = scmp.lt.s32.totalorder %s92_s28, %s92_s28 }
  0xdd   :  { %p4128_p13 = scmp.ne.s32.totalorder %s92_s28, %s4127_s23  ;;  %p4133_p1 = scmp.lt.s32.totalorder %s4127_s23, %s4127_s23 }
  0xdf   :  { %p4134_p2 = por %p4133_p1, %p4132_p0 }
  0xe1   :  { %p4135_p3 = pnand %p4134_p2, %p4128_p13 }
  0xe3   :  { %4138 = shalt.err (!%p4135_p3)
}
  0xe4   :  { %94 = dma.hbm_to_vmem [thread:$0]  %s5188_s0, 32, %s92_s28, [#allocation11]  }
  0xe5   :  { %s4139_s25 = scalar_lea.hbm %s5149_s9, 32 }
  0xe6   :  { %p4140_p4 = scmp.ne.s32.totalorder %s5149_s9, %s4139_s25  ;;  %p4143_p5 = scmp.lt.u32.totalorder %s4139_s25, %s5149_s9 }
  0xe8   :  { %p4145_p6 = pnand %p4143_p5, %p4140_p4 }
  0xea   :  { %4148 = shalt.err (!%p4145_p6)
}
  0xeb   :  { %s4149_s5 = scalar_lea.vmem %s112_s3, 32  ;;  %p4154_p8 = scmp.lt.s32.totalorder %s112_s3, %s112_s3 }
  0xec   :  { %p4150_p7 = scmp.ne.s32.totalorder %s112_s3, %s4149_s5  ;;  %p4155_p9 = scmp.lt.s32.totalorder %s4149_s5, %s4149_s5 }
  0xee   :  { %p4156_p10 = por %p4155_p9, %p4154_p8 }
  0xf0   :  { %p4157_p11 = pnand %p4156_p10, %p4150_p7 }
  0xf2   :  { %4160 = shalt.err (!%p4157_p11)
}
  0xf3   :  { %114 = dma.hbm_to_vmem [thread:$0]  %s5149_s9, 32, %s112_s3, [#allocation14]  }
  0xf4   :  { %s4352_s28 = smov [#allocation18]   ;;  %s4353_s16 = smov [#allocation21]  }
  0xf5   :  { %s135_s27 = sshll.u32 %s4352_s28, 4  ;;  %s155_s24 = sshll.u32 %s4353_s16, 4  ;;  %s136_s27 = int_to_ptr.vmem [resolvable:$true] %s135_s27  ;;  %s156_s24 = int_to_ptr.vmem [resolvable:$true] %s155_s24 }
  0xf6   :  { %s4161_s21 = scalar_lea.hbm %s5152_s12, 64 }
  0xf7   :  { %p4162_p12 = scmp.ne.s32.totalorder %s5152_s12, %s4161_s21  ;;  %p4165_p13 = scmp.lt.u32.totalorder %s4161_s21, %s5152_s12 }
  0xf9   :  { %p4167_p0 = pnand %p4165_p13, %p4162_p12 }
  0xfb   :  { %4170 = shalt.err (!%p4167_p0)
}
  0xfc   :  { %s4171_s9 = scalar_lea.vmem %s136_s27, 64  ;;  %p4176_p2 = scmp.lt.s32.totalorder %s136_s27, %s136_s27 }
  0xfd   :  { %p4172_p1 = scmp.ne.s32.totalorder %s136_s27, %s4171_s9  ;;  %p4177_p3 = scmp.lt.s32.totalorder %s4171_s9, %s4171_s9 }
  0xff   :  { %p4178_p4 = por %p4177_p3, %p4176_p2 }
 0x101   :  { %p4179_p5 = pnand %p4178_p4, %p4172_p1 }
 0x103   :  { %4182 = shalt.err (!%p4179_p5)
}
 0x104   :  { %138 = dma.hbm_to_vmem [thread:$0]  %s5152_s12, 64, %s136_s27, [#allocation17]  }
 0x105   :  { %s4183_s13 = scalar_lea.hbm %s5154_s14, 64 }
 0x106   :  { %p4184_p6 = scmp.ne.s32.totalorder %s5154_s14, %s4183_s13  ;;  %p4187_p7 = scmp.lt.u32.totalorder %s4183_s13, %s5154_s14 }
 0x108   :  { %p4189_p8 = pnand %p4187_p7, %p4184_p6 }
 0x10a   :  { %4192 = shalt.err (!%p4189_p8)
}
 0x10b   :  { %s4193_s7 = scalar_lea.vmem %s156_s24, 64  ;;  %p4198_p10 = scmp.lt.s32.totalorder %s156_s24, %s156_s24 }
 0x10c   :  { %p4194_p9 = scmp.ne.s32.totalorder %s156_s24, %s4193_s7  ;;  %p4199_p11 = scmp.lt.s32.totalorder %s4193_s7, %s4193_s7 }
 0x10e   :  { %p4200_p12 = por %p4199_p11, %p4198_p10 }
 0x110   :  { %p4201_p13 = pnand %p4200_p12, %p4194_p9 }
 0x112   :  { %4204 = shalt.err (!%p4201_p13)
}
 0x113   :  { %158 = dma.hbm_to_vmem [thread:$0]  %s5154_s14, 64, %s156_s24, [#allocation20]  }
 0x114   :  { %s4354_s29 = smov [#allocation24]   ;;  %s4355_s28 = smov [#allocation27]  }
 0x115   :  { %s175_s10 = sshll.u32 %s4354_s29, 4  ;;  %s195_s27 = sshll.u32 %s4355_s28, 4  ;;  %s176_s10 = int_to_ptr.vmem [resolvable:$true] %s175_s10  ;;  %s196_s27 = int_to_ptr.vmem [resolvable:$true] %s195_s27 }
 0x116   :  { %s4205_s11 = scalar_lea.hbm %s5157_s17, 128 }
 0x117   :  { %p4206_p0 = scmp.ne.s32.totalorder %s5157_s17, %s4205_s11  ;;  %p4209_p1 = scmp.lt.u32.totalorder %s4205_s11, %s5157_s17 }
 0x119   :  { %p4211_p2 = pnand %p4209_p1, %p4206_p0 }
 0x11b   :  { %4214 = shalt.err (!%p4211_p2)
}
 0x11c   :  { %s4215_s14 = scalar_lea.vmem %s176_s10, 128  ;;  %p4220_p4 = scmp.lt.s32.totalorder %s176_s10, %s176_s10 }
 0x11d   :  { %p4216_p3 = scmp.ne.s32.totalorder %s176_s10, %s4215_s14  ;;  %p4221_p5 = scmp.lt.s32.totalorder %s4215_s14, %s4215_s14 }
 0x11f   :  { %p4222_p6 = por %p4221_p5, %p4220_p4 }
 0x121   :  { %p4223_p7 = pnand %p4222_p6, %p4216_p3 }
 0x123   :  { %4226 = shalt.err (!%p4223_p7)
}
 0x124   :  { %178 = dma.hbm_to_vmem [thread:$0]  %s5157_s17, 128, %s176_s10, [#allocation23]  }
 0x125   :  { %s4227_s20 = scalar_lea.hbm %s5159_s19, 128 }
 0x126   :  { %p4228_p8 = scmp.ne.s32.totalorder %s5159_s19, %s4227_s20  ;;  %p4231_p9 = scmp.lt.u32.totalorder %s4227_s20, %s5159_s19 }
 0x128   :  { %p4233_p10 = pnand %p4231_p9, %p4228_p8 }
 0x12a   :  { %4236 = shalt.err (!%p4233_p10)
}
 0x12b   :  { %s4237_s2 = scalar_lea.vmem %s196_s27, 128  ;;  %p4242_p12 = scmp.lt.s32.totalorder %s196_s27, %s196_s27 }
 0x12c   :  { %p4238_p11 = scmp.ne.s32.totalorder %s196_s27, %s4237_s2  ;;  %p4243_p13 = scmp.lt.s32.totalorder %s4237_s2, %s4237_s2 }
 0x12e   :  { %p4244_p0 = por %p4243_p13, %p4242_p12 }
 0x130   :  { %p4245_p1 = pnand %p4244_p0, %p4238_p11 }
 0x132   :  { %4248 = shalt.err (!%p4245_p1)
}
 0x133   :  { %198 = dma.hbm_to_vmem [thread:$0]  %s5159_s19, 128, %s196_s27, [#allocation26]  }
 0x134   :  { %s4356_s6 = smov [#allocation30]   ;;  %s4249_s29 = scalar_lea.hbm %s5162_s22, 112 }
 0x135   :  { %s215_s7 = sshll.u32 %s4356_s6, 4  ;;  %p4250_p2 = scmp.ne.s32.totalorder %s5162_s22, %s4249_s29  ;;  %s216_s7 = int_to_ptr.vmem [resolvable:$true] %s215_s7 }
 0x136   :  { %p4253_p3 = scmp.lt.u32.totalorder %s4249_s29, %s5162_s22 }
 0x138   :  { %p4255_p4 = pnand %p4253_p3, %p4250_p2 }
 0x13a   :  { %4258 = shalt.err (!%p4255_p4)
}
 0x13b   :  { %s4259_s11 = scalar_lea.vmem %s216_s7, 112  ;;  %s4263_s19 = scalar_lea.vmem %s216_s7, 128 }
 0x13c   :  { %p4260_p5 = scmp.ne.s32.totalorder %s216_s7, %s4259_s11  ;;  %p4264_p6 = scmp.lt.s32.totalorder %s216_s7, %s216_s7 }
 0x13d   :  { %p4265_p7 = scmp.lt.s32.totalorder %s4263_s19, %s4259_s11 }
 0x13f   :  { %p4266_p8 = por %p4265_p7, %p4264_p6 }
 0x141   :  { %p4267_p9 = pnand %p4266_p8, %p4260_p5 }
 0x143   :  { %4270 = shalt.err (!%p4267_p9)
}
 0x144   :  { %218 = dma.hbm_to_vmem [thread:$0]  %s5162_s22, 112, %s216_s7, [#allocation29]  }
 0x145   :  { %4315 = dma.done.wait [#allocation6], 128  }
 0x146   :  { %4316 = vsyncadd [#allocation6], 4294967168 }
 0x147   :  { %4317 = dma.done.wait [#allocation8], 432  }
 0x148   :  { %4318 = vsyncadd [#allocation8], 4294966864 }
 0x149   :  { %4319 = dma.done.wait [#allocation11], 64  }
 0x14a   :  { %4320 = vsyncadd [#allocation11], 4294967232 }
 0x14b   :  { %4321 = dma.done.wait [#allocation14], 64  }
 0x14c   :  { %4322 = vsyncadd [#allocation14], 4294967232 }
 0x14d   :  { %4323 = dma.done.wait [#allocation17], 4160  }
 0x14e   :  { %4324 = vsyncadd [#allocation17], 4294963136 }
 0x14f   :  { %4325 = dma.done.wait [#allocation20], 128  }
 0x150   :  { %4326 = vsyncadd [#allocation20], 4294967168 }
 0x151   :  { %4327 = dma.done.wait [#allocation23], 256  }
 0x152   :  { %4328 = vsyncadd [#allocation23], 4294967040 }
 0x153   :  { %4329 = dma.done.wait [#allocation26], 256  }
 0x154   :  { %4330 = vsyncadd [#allocation26], 4294967040 }
 0x155   :  { %4331 = dma.done.wait [#allocation29], 224  }
 0x156   :  { %4332 = vsyncadd [#allocation29], 4294967072  ;;  %v4357_v0 = vmov 0   ;;  %v4358_v1 = vmov 0.0|0.0   ;;  %vm308_vm0 = vcmask 1041408   ;;  %vm4359_vm1 = vmmov 1  }
 0x157   :  { %3854 = vset.pattern.permute.xlu0 %v4357_v0  ;;  %3771 = vmatprep.subr.bf16.mxu1 %v4358_v1  ;;  %vm3773_vm2 = vmpackc.low %vm308_vm0, %vm4359_vm1  ;;  %s5189_s8 = sld [smem:[#allocation49_spill]]  ;;  %s5190_s24 = sld [smem:[#allocation50_spill]]  ;;  %vm4360_vm3 = vmmov 0   ;;  %v4361_v6 = vmov 0.0   ;;  %v294_v7 = vlaneseq  ;;  %v383_v8 = vld [vmem:[#allocation7] sm:$0x3] }
 0x158   :  { %564 = vmatprep.mubr.bf16.mxu0 %v4357_v0  ;;  %3750 = vmatprep.mubr.msk.f32.mxu1 %vm4360_vm3, %v4361_v6  ;;  %v384_v9 = vld [vmem:[#allocation7 + $0x2] sm:$0x3]  ;;  %v396_v10 = vunpack.c.l.s8.bf16 %v383_v8  ;;  %v385_v13 = vld [vmem:[#allocation7 + $0x4] sm:$0x3]  ;;  %v386_v14 = vld [vmem:[#allocation7 + $0x6] sm:$0x3] }
 0x159   :  { %v397_v11 = vunpack.c.l.s8.bf16 %v384_v9  ;;  %v295_v12 = vand.u32 127, %v294_v7  ;;  %vm304_vm4 = vcmask 80896   ;;  %v398_v17 = vunpack.c.l.s8.bf16 %v385_v13  ;;  %v387_v19 = vld [vmem:[#allocation7 + $0x8] sm:$0x3]  ;;  %v388_v20 = vld [vmem:[#allocation7 + $0xa] sm:$0x3] }
 0x15a   :  { %v399_v18 = vunpack.c.l.s8.bf16 %v386_v14  ;;  %v400_v23 = vunpack.c.l.s8.bf16 %v387_v19  ;;  %v401_v24 = vunpack.c.l.s8.bf16 %v388_v20  ;;  %v389_v25 = vld [vmem:[#allocation7 + $0xc] sm:$0x3]  ;;  %v390_v26 = vld [vmem:[#allocation7 + $0xe] sm:$0x3]  ;;  %v391_v30 = vld [vmem:[#allocation7 + $0x10] sm:$0x3] }
 0x15b   :  { %v3636_v16 = vcombine.low %v396_v10, %v397_v11  ;;  %v402_v28 = vunpack.c.l.s8.bf16 %v389_v25  ;;  %v403_v29 = vunpack.c.l.s8.bf16 %v390_v26  ;;  %v392_v31 = vld [vmem:[#allocation7 + $0x12] sm:$0x3]  ;;  %v404_v33 = vunpack.c.l.s8.bf16 %v391_v30  ;;  %v393_v35 = vld [vmem:[#allocation7 + $0x14] sm:$0x3]  ;;  %v394_v36 = vld [vmem:[#allocation7 + $0x16] sm:$0x3] }
 0x15c   :  { %v3637_v22 = vcombine.low %v398_v17, %v399_v18  ;;  %v3638_v27 = vcombine.low %v400_v23, %v401_v24  ;;  %v405_v34 = vunpack.c.l.s8.bf16 %v392_v31  ;;  %v395_v37 = vld [vmem:[#allocation7 + $0x18] sm:$0x1]  ;;  %v406_v39 = vunpack.c.l.s8.bf16 %v393_v35  ;;  %s5191_s4 = sld [smem:[#allocation53_spill]]  ;;  %v679_v8 = vld [vmem:[#allocation16 + $0x8] sm:$0xff]  ;;  %v678_v20 = vld [vmem:[#allocation16] sm:$0xff]  ;;  %s4362_s0 = smov [#allocation2]  }
 0x15d   :  { %v296_v2 = vld [vmem:[%s5189_s8] sm:$0xff]  ;;  %v303_v4 = vld [vmem:[%s5190_s24 + $0x8] sm:$0x3]  ;;  %v3639_v32 = vcombine.low %v402_v28, %v403_v29  ;;  %v407_v40 = vunpack.c.l.s8.bf16 %v394_v36  ;;  %v408_v41 = vunpack.c.l.s8.bf16 %v395_v37  ;;  %vm449_vm6 = vcmask 818176   ;;  %v683_v25 = vld [vmem:[#allocation16 + $0x28] sm:$0xff]  ;;  %s278_s11 = sshll.u32 %s4362_s0, 4  ;;  %s279_s11 = int_to_ptr.vmem [resolvable:$true] %s278_s11 }
 0x15e   :  { %v302_v3 = vld [vmem:[%s5190_s24] sm:$0xff]  ;;  %298 = vperm.xlu0 %3854, %v296_v2   ;;  %v3640_v38 = vcombine.low %v404_v33, %v405_v34  ;;  %v711_v9 = vunpack.c.l.s8.bf16 %v679_v8  ;;  %v715_v24 = vunpack.c.h.s8.bf16 %v679_v8  ;;  %v714_v26 = vunpack.c.h.s8.bf16 %v678_v20  ;;  %v682_v28 = vld [vmem:[#allocation16 + $0x20] sm:$0xff]  ;;  %s4363_s19 = smov [#allocation3]   ;;  %s4271_s30 = scalar_lea.hbm %s5155_s15, 16384 }
 0x15f   :  { %v3772_v5 = vpack.c.bf16 %v303_v4, %v302_v3  ;;  %v3641_v42 = vcombine.low %v406_v39, %v407_v40  ;;  %v3642_v43 = vcombine.low %v408_v41, %v408_v41  ;;  %v382_v44 = vld [vmem:[#allocation5] sm:$0xff]  ;;  %v718_v29 = vunpack.c.l.s8.bf16 %v682_v28  ;;  %v686_v34 = vld [vmem:[#allocation16 + $0x40] sm:$0xff]  ;;  %s290_s27 = sshll.u32 %s4363_s19, 4  ;;  %p4272_p10 = scmp.ne.s32.totalorder %s5155_s15, %s4271_s30  ;;  %s291_s27 = int_to_ptr.vmem [resolvable:$true] %s290_s27 }
 0x160   :  { %v409_v46 = vpack.c.bf16 %v382_v44, %v382_v44  ;;  %v723_v30 = vunpack.c.h.s8.bf16 %v683_v25  ;;  %v722_v31 = vunpack.c.h.s8.bf16 %v682_v28  ;;  %v726_v35 = vunpack.c.l.s8.bf16 %v686_v34  ;;  %v690_v40 = vld [vmem:[#allocation16 + $0x60] sm:$0xff]  ;;  %v695_v44 = vld [vmem:[#allocation16 + $0x88] sm:$0xff]  ;;  %p4275_p11 = scmp.lt.u32.totalorder %s4271_s30, %s5155_s15 }
 0x161   :  { %3774 = vmatpush3.bf16.msk.msra.mxu1 %vm3773_vm2, %v3772_v5  ;;  %v454_v45 = vsel %vm308_vm0, %v3642_v43, 0  ;;  %v730_v37 = vunpack.c.h.s8.bf16 %v686_v34  ;;  %v734_v41 = vunpack.c.l.s8.bf16 %v690_v40  ;;  %v738_v43 = vunpack.c.h.s8.bf16 %v690_v40 }
 0x162   :  { %3753 = vmatprep.subr.bf16.mxu1 %v4361_v6  ;;  %v508_v47 = vld [vmem:[%s5191_s4 + $0x8] sm:$0xff]  ;;  %v507_v48 = vld [vmem:[%s5191_s4] sm:$0xff]  ;;  %v510_v52 = vld [vmem:[%s5191_s4 + $0x18] sm:$0xff]  ;;  %p4277_p12 = pnand %p4275_p11, %p4272_p10 }
 0x163   :  { %v516_v49 = vunpack.c.l.s8.bf16 %v508_v47  ;;  %v518_v50 = vunpack.c.h.s8.bf16 %v508_v47  ;;  %v515_v51 = vunpack.c.l.s8.bf16 %v507_v48  ;;  %v517_v53 = vunpack.c.h.s8.bf16 %v507_v48  ;;  %v509_v55 = vld [vmem:[%s5191_s4 + $0x10] sm:$0xff]  ;;  %v512_v58 = vld [vmem:[%s5191_s4 + $0x28] sm:$0xff]  ;;  %v511_v61 = vld [vmem:[%s5191_s4 + $0x20] sm:$0xff] }
 0x164   :  { %v520_v54 = vunpack.c.l.s8.bf16 %v510_v52  ;;  %v519_v56 = vunpack.c.l.s8.bf16 %v509_v55  ;;  %v522_v57 = vunpack.c.h.s8.bf16 %v510_v52  ;;  %v521_v59 = vunpack.c.h.s8.bf16 %v509_v55  ;;  %v514_v1 = vld [vmem:[%s5191_s4 + $0x38] sm:$0xff]  ;;  %v513_v3 = vld [vmem:[%s5191_s4 + $0x30] sm:$0xff] }
 0x165   :  { %532 = vmatprep.subr.bf16.mxu0 %v516_v49  ;;  %v524_v60 = vunpack.c.l.s8.bf16 %v512_v58  ;;  %v523_v62 = vunpack.c.l.s8.bf16 %v511_v61  ;;  %v526_v63 = vunpack.c.h.s8.bf16 %v512_v58  ;;  %v525_v0 = vunpack.c.h.s8.bf16 %v511_v61  ;;  %v698_v52 = vld [vmem:[#allocation16 + $0xa0] sm:$0xff] }
 0x166   :  { %533 = vmatpush1.bf16.msra.mxu0 %v515_v51  ;;  %v528_v2 = vunpack.c.l.s8.bf16 %v514_v1  ;;  %v527_v4 = vunpack.c.l.s8.bf16 %v513_v3  ;;  %v530_v5 = vunpack.c.h.s8.bf16 %v514_v1  ;;  %v747_v48 = vunpack.c.h.s8.bf16 %v695_v44  ;;  %v702_v58 = vld [vmem:[#allocation16 + $0xc0] sm:$0xff] }
 0x167   :  { %534 = vmatprep.subr.bf16.mxu0 %v518_v50  ;;  %v699_v50 = vld [vmem:[#allocation16 + $0xa8] sm:$0xff]  ;;  %v754_v55 = vunpack.c.h.s8.bf16 %v698_v52  ;;  %v762_v61 = vunpack.c.h.s8.bf16 %v702_v58 }
 0x168   :  { %v751_v51 = vunpack.c.l.s8.bf16 %v699_v50 }
 0x16a   :  { %535 = vmatpush1.bf16.msra.mxu0 %v517_v53  ;;  %v750_v53 = vunpack.c.l.s8.bf16 %v698_v52 }
 0x16b   :  { %536 = vmatprep.subr.bf16.mxu0 %v520_v54  ;;  %v755_v54 = vunpack.c.h.s8.bf16 %v699_v50 }
 0x16e   :  { %537 = vmatpush1.bf16.msra.mxu0 %v519_v56  ;;  %v703_v56 = vld [vmem:[#allocation16 + $0xc8] sm:$0xff] }
 0x16f   :  { %538 = vmatprep.subr.bf16.mxu0 %v522_v57  ;;  %v759_v57 = vunpack.c.l.s8.bf16 %v703_v56 }
 0x172   :  { %539 = vmatpush1.bf16.msra.mxu0 %v521_v59  ;;  %v758_v59 = vunpack.c.l.s8.bf16 %v702_v58 }
 0x173   :  { %540 = vmatprep.subr.bf16.mxu0 %v524_v60  ;;  %v763_v60 = vunpack.c.h.s8.bf16 %v703_v56 }
 0x176   :  { %541 = vmatpush1.bf16.msra.mxu0 %v523_v62  ;;  %v707_v62 = vld [vmem:[#allocation16 + $0xe8] sm:$0xff] }
 0x177   :  { %542 = vmatprep.subr.bf16.mxu0 %v526_v63  ;;  %v706_v63 = vld [vmem:[#allocation16 + $0xe0] sm:$0xff] }
 0x178   :  { %v766_v1 = vunpack.c.l.s8.bf16 %v706_v63 }
 0x17a   :  { %543 = vmatpush1.bf16.msra.mxu0 %v525_v0  ;;  %v767_v0 = vunpack.c.l.s8.bf16 %v707_v62 }
 0x17b   :  { %544 = vmatprep.subr.bf16.mxu0 %v528_v2  ;;  %v771_v2 = vunpack.c.h.s8.bf16 %v707_v62  ;;  %v602_v62 = vld [vmem:[#allocation15] sm:$0x3] }
 0x17e   :  { %545 = vmatpush1.bf16.msra.mxu0 %v527_v4  ;;  %v4729_v4 = vld [vmem:[#allocation16 + $0x18] sm:$0xff] }
 0x17f   :  { %546 = vmatprep.subr.bf16.mxu0 %v530_v5  ;;  %v713_v5 = vunpack.c.l.s8.bf16 %v4729_v4 }
 0x1dd   :  { %v299_v15 = vpop.permute.xlu0 %298 }
 0x1de   :  { %vm300_vm5 = vcmp.eq.s32.totalorder %v299_v15, %v295_v12  ;;  %v3644_v12 = vld [vmem:[#allocation9] ss:$0 sm:$0xff] }
 0x1df   :  { %v301_v21 = vsel %vm300_vm5, 1.0, %v4361_v6 }
 0x1e0   :  { %3751 = vmatmul.mubr.msk.f32.vlgmr.msra.gmra.mrb[0].mxu1 %vm304_vm4, %v301_v21 }
 0x1e1   :  { %3754 = vmatpush3.bf16.msra.mxu1 %v3636_v16  ;;  %3767 = vmatprep.mubr.msk.bf16.mxu1 %vm4360_vm3, %v4361_v6 }
 0x1e2   :  { %3755 = vmatprep.subr.bf16.mxu1 %v4361_v6 }
 0x1e5   :  { %3756 = vmatpush3.bf16.msra.mxu1 %v3637_v22  ;;  %v710_v22 = vunpack.c.l.s8.bf16 %v678_v20 }
 0x1e6   :  { %3757 = vmatprep.subr.bf16.mxu1 %v4361_v6 }
 0x1e9   :  { %3758 = vmatpush3.bf16.msra.mxu1 %v3638_v27  ;;  %v719_v27 = vunpack.c.l.s8.bf16 %v683_v25 }
 0x1ea   :  { %3759 = vmatprep.subr.bf16.mxu1 %v4361_v6 }
 0x1ed   :  { %3760 = vmatpush3.bf16.msra.mxu1 %v3639_v32  ;;  %v687_v32 = vld [vmem:[#allocation16 + $0x48] sm:$0xff] }
 0x1ee   :  { %3761 = vmatprep.subr.bf16.mxu1 %v4361_v6  ;;  %v727_v33 = vunpack.c.l.s8.bf16 %v687_v32  ;;  %v731_v36 = vunpack.c.h.s8.bf16 %v687_v32 }
 0x1f1   :  { %3762 = vmatpush3.bf16.msra.mxu1 %v3640_v38  ;;  %v691_v38 = vld [vmem:[#allocation16 + $0x68] sm:$0xff] }
 0x1f2   :  { %3763 = vmatprep.subr.bf16.mxu1 %v4361_v6  ;;  %v735_v39 = vunpack.c.l.s8.bf16 %v691_v38 }
 0x1f5   :  { %3764 = vmatpush3.bf16.msra.mxu1 %v3641_v42  ;;  %v739_v42 = vunpack.c.h.s8.bf16 %v691_v38 }
 0x1f6   :  { %3765 = vmatprep.subr.bf16.mxu1 %v4361_v6  ;;  %v529_v6 = vunpack.c.h.s8.bf16 %v513_v3  ;;  %v770_v3 = vunpack.c.h.s8.bf16 %v706_v63 }
 0x1f8   :  { %547 = vmatpush1.bf16.msra.mxu0 %v529_v6  ;;  %v4733_v6 = vshrl.u32 %v294_v7, 7 }
 0x1f9   :  { %3766 = vmatpush3.bf16.msra.mxu1 %v454_v45  ;;  %776 = vmatprep.subr.bf16.mxu0 %v711_v9  ;;  %v743_v45 = vunpack.c.l.s8.bf16 %v695_v44 }
 0x1fa   :  { %v4736_v8 = vsub.s32 0, %v4733_v6  ;;  %v4739_v9 = vsub.s32 1, %v4733_v6 }
 0x1fc   :  { %3768 = vmatmul.mubr.msk.bf16.vlgmr.msra.gmra.mrb[4].mxu1 %vm449_vm6, %v409_v46  ;;  %v694_v46 = vld [vmem:[#allocation16 + $0x80] sm:$0xff] }
 0x1fd   :  { %v742_v47 = vunpack.c.l.s8.bf16 %v694_v46  ;;  %v746_v49 = vunpack.c.h.s8.bf16 %v694_v46 }
 0x2b3   :  { %v378_v10 = vpop.f32.mrb[0].mxu1 }
 0x2b4   :  { %v3752_v11 = vpop.f32.mrb[1].mxu1 }
 0x2b5   :  { %v587_v11 = vld [vmem:[#allocation12] sm:$0x3] }
 0x2cf   :  { %v490_v13 = vpop.f32.mrb[4].mxu1 }
 0x2d0   :  { %v503_v14 = vmul.f32 %v3644_v12, %v490_v13  ;;  %v3769_v15 = vpop.f32.mrb[5].mxu1 }
 0x2d1   :  { %v493_v16 = vpop.f32.mrb[6].mxu1 }
 0x2d2   :  { %v504_v17 = vadd.f32 %v503_v14, %v378_v10  ;;  %v3770_v18 = vpop.f32.mrb[7].mxu1  ;;  %v573_v10 = vld [vmem:[#allocation10] sm:$0x3]  ;;  %v592_v14 = vrot.slane %v587_v11, %v4736_v8  ;;  %v596_v16 = vrot.slane %v587_v11, %v4739_v9  ;;  %v665_v11 = vrot.slane %v602_v62, %v4736_v8 }
 0x2d3   :  { %v578_v12 = vrot.slane %v573_v10, %v4736_v8  ;;  %v582_v13 = vrot.slane %v573_v10, %v4739_v9 }
 0x2d4   :  { %v505_v19 = vmul.f32 0.2, %v504_v17 }
 0x2d6   :  { %v506_v21 = vmax.f32 %v504_v17, %v505_v19 }
 0x2d8   :  { %v531_v23 = vpack.c.bf16 %v506_v21, %v506_v21 }
 0x2da   :  { %565 = vmatmul.mubr.bf16.vlgmr.msra.gmra.mrb[0].mxu0 %v531_v23 }
 0x2db   :  { %777 = vmatpush1.bf16.msra.mxu0 %v710_v22 }
 0x2dc   :  { %778 = vmatprep.subr.bf16.mxu0 %v715_v24 }
 0x2df   :  { %779 = vmatpush1.bf16.msra.mxu0 %v714_v26 }
 0x2e0   :  { %780 = vmatprep.subr.bf16.mxu0 %v719_v27 }
 0x2e3   :  { %781 = vmatpush1.bf16.msra.mxu0 %v718_v29 }
 0x2e4   :  { %782 = vmatprep.subr.bf16.mxu0 %v723_v30 }
 0x2e7   :  { %783 = vmatpush1.bf16.msra.mxu0 %v722_v31 }
 0x2e8   :  { %784 = vmatprep.subr.bf16.mxu0 %v727_v33 }
 0x2eb   :  { %785 = vmatpush1.bf16.msra.mxu0 %v726_v35 }
 0x2ec   :  { %786 = vmatprep.subr.bf16.mxu0 %v731_v36 }
 0x2ef   :  { %787 = vmatpush1.bf16.msra.mxu0 %v730_v37 }
 0x2f0   :  { %788 = vmatprep.subr.bf16.mxu0 %v735_v39 }
 0x2f3   :  { %789 = vmatpush1.bf16.msra.mxu0 %v734_v41 }
 0x2f4   :  { %790 = vmatprep.subr.bf16.mxu0 %v739_v42 }
 0x2f7   :  { %791 = vmatpush1.bf16.msra.mxu0 %v738_v43 }
 0x2f8   :  { %792 = vmatprep.subr.bf16.mxu0 %v743_v45 }
 0x2fb   :  { %793 = vmatpush1.bf16.msra.mxu0 %v742_v47 }
 0x2fc   :  { %794 = vmatprep.subr.bf16.mxu0 %v747_v48 }
 0x2ff   :  { %795 = vmatpush1.bf16.msra.mxu0 %v746_v49 }
 0x300   :  { %796 = vmatprep.subr.bf16.mxu0 %v751_v51 }
 0x303   :  { %797 = vmatpush1.bf16.msra.mxu0 %v750_v53 }
 0x304   :  { %798 = vmatprep.subr.bf16.mxu0 %v755_v54 }
 0x307   :  { %799 = vmatpush1.bf16.msra.mxu0 %v754_v55 }
 0x308   :  { %800 = vmatprep.subr.bf16.mxu0 %v759_v57 }
 0x30b   :  { %801 = vmatpush1.bf16.msra.mxu0 %v758_v59 }
 0x30c   :  { %802 = vmatprep.subr.bf16.mxu0 %v763_v60 }
 0x30f   :  { %803 = vmatpush1.bf16.msra.mxu0 %v762_v61  ;;  %v601_v61 = vld [vmem:[#allocation13] sm:$0x3] }
 0x310   :  { %804 = vmatprep.subr.bf16.mxu0 %v767_v0  ;;  %v652_v0 = vrot.slane %v601_v61, %v4736_v8 }
 0x313   :  { %805 = vmatpush1.bf16.msra.mxu0 %v766_v1 }
 0x314   :  { %806 = vmatprep.subr.bf16.mxu0 %v771_v2 }
 0x317   :  { %807 = vmatpush1.bf16.msra.mxu0 %v770_v3  ;;  %v656_v3 = vrot.slane %v601_v61, %v4739_v9  ;;  %v709_v61 = vld [vmem:[#allocation16 + $0xf8] sm:$0xff] }
 0x318   :  { %817 = vmatprep.subr.bf16.mxu0 %v713_v5 }
 0x3ad   :  { %v566_v15 = vpop.f32.mrb[0].mxu0 }
 0x3ae   :  { %v585_v17 = vmul.f32 %v578_v12, %v566_v15  ;;  %v568_v7 = vpop.f32.mrb[1].mxu0 }
 0x3af   :  { %v586_v18 = vmul.f32 %v582_v13, %v568_v7  ;;  %v570_v19 = vpop.f32.mrb[2].mxu0  ;;  %v669_v13 = vrot.slane %v602_v62, %v4739_v9 }
 0x3b0   :  { %v599_v20 = vadd.f32 %v592_v14, %v585_v17  ;;  %v571_v21 = vpop.f32.mrb[3].mxu0 }
 0x3b1   :  { %v600_v22 = vadd.f32 %v596_v16, %v586_v18 }
 0x3b2   :  { %v603_v23 = vrot.slane %v599_v20, 4  ;;  %v618_v24 = vmul.f32 %v599_v20, %v599_v20 }
 0x3b3   :  { %v609_v25 = vrot.slane %v600_v22, 4  ;;  %v619_v26 = vmul.f32 %v600_v22, %v600_v22 }
 0x3b4   :  { %v604_v27 = vadd.f32 %v603_v23, %v599_v20  ;;  %v620_v28 = vrot.slane %v618_v24, 4 }
 0x3b5   :  { %v610_v29 = vadd.f32 %v609_v25, %v600_v22  ;;  %v626_v30 = vrot.slane %v619_v26, 4  ;;  %v717_v25 = vunpack.c.h.s8.bf16 %v4729_v4  ;;  %v688_v4 = vld [vmem:[#allocation16 + $0x50] sm:$0xff] }
 0x3b6   :  { %v605_v31 = vrot.slane %v604_v27, 2  ;;  %v621_v32 = vadd.f32 %v620_v28, %v618_v24 }
 0x3b7   :  { %v611_v33 = vrot.slane %v610_v29, 2  ;;  %v627_v34 = vadd.f32 %v626_v30, %v619_v26  ;;  %v685_v26 = vld [vmem:[#allocation16 + $0x38] sm:$0xff] }
 0x3b8   :  { %v606_v35 = vadd.f32 %v605_v31, %v604_v27  ;;  %v622_v36 = vrot.slane %v621_v32, 2  ;;  %v721_v28 = vunpack.c.l.s8.bf16 %v685_v26  ;;  %v725_v31 = vunpack.c.h.s8.bf16 %v685_v26 }
 0x3b9   :  { %v612_v37 = vadd.f32 %v611_v33, %v610_v29  ;;  %v628_v38 = vrot.slane %v627_v34, 2  ;;  %v684_v29 = vld [vmem:[#allocation16 + $0x30] sm:$0xff] }
 0x3ba   :  { %v607_v39 = vrot.slane %v606_v35, 1  ;;  %v623_v40 = vadd.f32 %v622_v36, %v621_v32  ;;  %v720_v30 = vunpack.c.l.s8.bf16 %v684_v29  ;;  %v689_v32 = vld [vmem:[#allocation16 + $0x58] sm:$0xff]  ;;  %v724_v33 = vunpack.c.h.s8.bf16 %v684_v29 }
 0x3bb   :  { %v613_v41 = vrot.slane %v612_v37, 1  ;;  %v629_v42 = vadd.f32 %v628_v38, %v627_v34  ;;  %v729_v34 = vunpack.c.l.s8.bf16 %v689_v32  ;;  %v733_v36 = vunpack.c.h.s8.bf16 %v689_v32 }
 0x3bc   :  { %v608_v43 = vadd.f32 %v607_v39, %v606_v35  ;;  %v624_v44 = vrot.slane %v623_v40, 1  ;;  %v728_v35 = vunpack.c.l.s8.bf16 %v688_v4  ;;  %v732_v38 = vunpack.c.h.s8.bf16 %v688_v4 }
 0x3bd   :  { %v614_v45 = vadd.f32 %v613_v41, %v612_v37  ;;  %v630_v46 = vrot.slane %v629_v42, 1  ;;  %v693_v37 = vld [vmem:[#allocation16 + $0x78] sm:$0xff] }
 0x3be   :  { %v616_v47 = vmul.f32 0.125, %v608_v43  ;;  %v625_v48 = vadd.f32 %v624_v44, %v623_v40  ;;  %v737_v39 = vunpack.c.l.s8.bf16 %v693_v37  ;;  %v692_v40 = vld [vmem:[#allocation16 + $0x70] sm:$0xff]  ;;  %v697_v43 = vld [vmem:[#allocation16 + $0x98] sm:$0xff] }
 0x3bf   :  { %v617_v49 = vmul.f32 0.125, %v614_v45  ;;  %v631_v50 = vadd.f32 %v630_v46, %v629_v42  ;;  %v736_v41 = vunpack.c.l.s8.bf16 %v692_v40  ;;  %v741_v42 = vunpack.c.h.s8.bf16 %v693_v37  ;;  %v696_v46 = vld [vmem:[#allocation16 + $0x90] sm:$0xff] }
 0x3c0   :  { %v632_v51 = vmul.f32 0.125, %v625_v48  ;;  %v634_v52 = vmul.f32 %v616_v47, %v616_v47  ;;  %v640_v63 = vsub.f32 %v599_v20, %v616_v47  ;;  %v680_v20 = vld [vmem:[#allocation16 + $0x10] sm:$0xff]  ;;  %v740_v44 = vunpack.c.h.s8.bf16 %v692_v40 }
 0x3c1   :  { %v633_v53 = vmul.f32 0.125, %v631_v50  ;;  %v635_v54 = vmul.f32 %v617_v49, %v617_v49  ;;  %v641_v2 = vsub.f32 %v600_v22, %v617_v49  ;;  %v712_v22 = vunpack.c.l.s8.bf16 %v680_v20  ;;  %v701_v49 = vld [vmem:[#allocation16 + $0xb8] sm:$0xff] }
 0x3c2   :  { %v636_v55 = vsub.f32 %v632_v51, %v634_v52  ;;  %v716_v27 = vunpack.c.h.s8.bf16 %v680_v20  ;;  %v745_v45 = vunpack.c.l.s8.bf16 %v697_v43  ;;  %v744_v47 = vunpack.c.l.s8.bf16 %v696_v46  ;;  %v700_v52 = vld [vmem:[#allocation16 + $0xb0] sm:$0xff] }
 0x3c3   :  { %v637_v56 = vsub.f32 %v633_v53, %v635_v54  ;;  %v749_v48 = vunpack.c.h.s8.bf16 %v697_v43  ;;  %v748_v50 = vunpack.c.h.s8.bf16 %v696_v46  ;;  %v753_v51 = vunpack.c.l.s8.bf16 %v701_v49 }
 0x3c4   :  { %v638_v57 = vmax.f32 %v636_v55, 0.0  ;;  %v752_v53 = vunpack.c.l.s8.bf16 %v700_v52  ;;  %v757_v54 = vunpack.c.h.s8.bf16 %v701_v49  ;;  %v705_v55 = vld [vmem:[#allocation16 + $0xd8] sm:$0xff] }
 0x3c5   :  { %v639_v58 = vmax.f32 %v637_v56, 0.0  ;;  %v756_v56 = vunpack.c.h.s8.bf16 %v700_v52 }
 0x3c6   :  { %v642_v59 = vadd.f32 1e-05, %v638_v57  ;;  %v761_v57 = vunpack.c.l.s8.bf16 %v705_v55 }
 0x3c7   :  { %v643_v60 = vadd.f32 1e-05, %v639_v58  ;;  %v704_v58 = vld [vmem:[#allocation16 + $0xd0] sm:$0xff] }
 0x3c8   :  { %3855 = vrsqrt.f32 %v642_v59  ;;  %v760_v59 = vunpack.c.l.s8.bf16 %v704_v58  ;;  %v764_v62 = vunpack.c.h.s8.bf16 %v704_v58 }
 0x3c9   :  { %3857 = vrsqrt.f32 %v643_v60  ;;  %v765_v60 = vunpack.c.h.s8.bf16 %v705_v55 }
 0x3d2   :  { %v3856_v1 = vpop.eup %3855 }
 0x3d3   :  { %v3858_v5 = vpop.eup %3857  ;;  %v646_v10 = vmul.f32 %v3856_v1, %v640_v63  ;;  %v769_v63 = vunpack.c.l.s8.bf16 %v709_v61 }
 0x3d4   :  { %v647_v12 = vmul.f32 %v3858_v5, %v641_v2  ;;  %v773_v2 = vunpack.c.h.s8.bf16 %v709_v61 }
 0x3d5   :  { %v659_v14 = vmul.f32 %v652_v0, %v646_v10  ;;  %v708_v0 = vld [vmem:[#allocation16 + $0xf0] sm:$0xff] }
 0x3d6   :  { %v660_v15 = vmul.f32 %v656_v3, %v647_v12  ;;  %v768_v1 = vunpack.c.l.s8.bf16 %v708_v0  ;;  %v772_v3 = vunpack.c.h.s8.bf16 %v708_v0 }
 0x3d7   :  { %v672_v16 = vadd.f32 %v665_v11, %v659_v14 }
 0x3d8   :  { %v673_v17 = vadd.f32 %v669_v13, %v660_v15 }
 0x3d9   :  { %v674_v7 = vmul.f32 0.2, %v672_v16 }
 0x3da   :  { %v675_v18 = vmul.f32 0.2, %v673_v17 }
 0x3db   :  { %v676_v19 = vmax.f32 %v672_v16, %v674_v7 }
 0x3dc   :  { %v677_v21 = vmax.f32 %v673_v17, %v675_v18 }
 0x3dd   :  { %v4749_v24 = vpack.c.bf16 %v676_v19, %v676_v19 }
 0x3de   :  { %v775_v23 = vpack.c.bf16 %v677_v21, %v677_v21 }
 0x3e0   :  { %808 = vmatprep.mubr.bf16.mxu0 %v775_v23 }
 0x3e1   :  { %809 = vmatmul.mubr.bf16.vlgmr.msra.gmra.mrb[4].mxu0 %v4749_v24 }
 0x3e2   :  { %818 = vmatpush1.bf16.msra.mxu0 %v712_v22  ;;  %849 = vmatprep.mubr.bf16.mxu0 %v775_v23 }
 0x3e3   :  { %819 = vmatprep.subr.bf16.mxu0 %v717_v25 }
 0x3e6   :  { %820 = vmatpush1.bf16.msra.mxu0 %v716_v27 }
 0x3e7   :  { %821 = vmatprep.subr.bf16.mxu0 %v721_v28 }
 0x3ea   :  { %822 = vmatpush1.bf16.msra.mxu0 %v720_v30 }
 0x3eb   :  { %823 = vmatprep.subr.bf16.mxu0 %v725_v31 }
 0x3ee   :  { %824 = vmatpush1.bf16.msra.mxu0 %v724_v33 }
 0x3ef   :  { %825 = vmatprep.subr.bf16.mxu0 %v729_v34 }
 0x3f2   :  { %826 = vmatpush1.bf16.msra.mxu0 %v728_v35 }
 0x3f3   :  { %827 = vmatprep.subr.bf16.mxu0 %v733_v36 }
 0x3f6   :  { %828 = vmatpush1.bf16.msra.mxu0 %v732_v38 }
 0x3f7   :  { %829 = vmatprep.subr.bf16.mxu0 %v737_v39 }
 0x3fa   :  { %830 = vmatpush1.bf16.msra.mxu0 %v736_v41 }
 0x3fb   :  { %831 = vmatprep.subr.bf16.mxu0 %v741_v42 }
 0x3fe   :  { %832 = vmatpush1.bf16.msra.mxu0 %v740_v44 }
 0x3ff   :  { %833 = vmatprep.subr.bf16.mxu0 %v745_v45 }
 0x402   :  { %834 = vmatpush1.bf16.msra.mxu0 %v744_v47 }
 0x403   :  { %835 = vmatprep.subr.bf16.mxu0 %v749_v48 }
 0x406   :  { %836 = vmatpush1.bf16.msra.mxu0 %v748_v50 }
 0x407   :  { %837 = vmatprep.subr.bf16.mxu0 %v753_v51 }
 0x40a   :  { %838 = vmatpush1.bf16.msra.mxu0 %v752_v53 }
 0x40b   :  { %839 = vmatprep.subr.bf16.mxu0 %v757_v54 }
 0x40e   :  { %840 = vmatpush1.bf16.msra.mxu0 %v756_v56 }
 0x40f   :  { %841 = vmatprep.subr.bf16.mxu0 %v761_v57 }
 0x412   :  { %842 = vmatpush1.bf16.msra.mxu0 %v760_v59 }
 0x413   :  { %843 = vmatprep.subr.bf16.mxu0 %v765_v60 }
 0x416   :  { %844 = vmatpush1.bf16.msra.mxu0 %v764_v62 }
 0x417   :  { %845 = vmatprep.subr.bf16.mxu0 %v769_v63 }
 0x41a   :  { %846 = vmatpush1.bf16.msra.mxu0 %v768_v1 }
 0x41b   :  { %847 = vmatprep.subr.bf16.mxu0 %v773_v2 }
 0x41e   :  { %848 = vmatpush1.bf16.msra.mxu0 %v772_v3 }
 0x421   :  { %850 = vmatmul.mubr.bf16.vlgmr.msra.gmra.mrb[8].mxu0 %v4749_v24 }
 0x422   :  { %4280 = shalt.err (!%p4277_p12)  }
 0x423   :  { %s4281_s23 = scalar_lea.vmem %s279_s11, 16384  ;;  %p4286_p0 = scmp.lt.s32.totalorder %s279_s11, %s279_s11 }
 0x424   :  { %p4282_p13 = scmp.ne.s32.totalorder %s279_s11, %s4281_s23  ;;  %p4287_p1 = scmp.lt.s32.totalorder %s4281_s23, %s4281_s23 }
 0x426   :  { %p4288_p2 = por %p4287_p1, %p4286_p0 }
 0x428   :  { %p4289_p3 = pnand %p4288_p2, %p4282_p13 }
 0x42a   :  { %4292 = shalt.err (!%p4289_p3)  }
 0x42b   :  { %281 = dma.hbm_to_vmem [thread:$0]  %s5155_s15, 16384, %s279_s11, [#allocation4] }
 0x42c   :  { %s5192_s26 = sld [smem:[#allocation57_spill]] }
 0x432   :  { %s4293_s13 = scalar_lea.hbm %s5192_s26, 28672 }
 0x433   :  { %p4294_p4 = scmp.ne.s32.totalorder %s5192_s26, %s4293_s13  ;;  %p4297_p5 = scmp.lt.u32.totalorder %s4293_s13, %s5192_s26 }
 0x435   :  { %p4299_p6 = pnand %p4297_p5, %p4294_p4 }
 0x437   :  { %4302 = shalt.err (!%p4299_p6)  }
 0x438   :  { %s4303_s6 = scalar_lea.vmem %s291_s27, 28672  ;;  %p4308_p8 = scmp.lt.s32.totalorder %s291_s27, %s291_s27 }
 0x439   :  { %p4304_p7 = scmp.ne.s32.totalorder %s291_s27, %s4303_s6  ;;  %p4309_p9 = scmp.lt.s32.totalorder %s4303_s6, %s4303_s6 }
 0x43b   :  { %p4310_p10 = por %p4309_p9, %p4308_p8 }
 0x43d   :  { %p4311_p11 = pnand %p4310_p10, %p4304_p7 }
 0x43f   :  { %4314 = shalt.err (!%p4311_p11)  }
 0x440   :  { %293 = dma.hbm_to_vmem [thread:$0]  %s5192_s26, 28672, %s291_s27, [#allocation4 + $0x1]  ;;  %v4783_v10 = vld [vmem:[#allocation18] sm:$0xf]  ;;  %v4793_v59 = vld [vmem:[#allocation19] sm:$0xf] }
 0x441   :  { %s5193_s29 = sld [smem:[#allocation56_spill]]  ;;  %v889_v13 = vrot.slane %v4783_v10, %v4736_v8  ;;  %v893_v15 = vrot.slane %v4783_v10, %v4739_v9  ;;  %v4795_v60 = vld [vmem:[#allocation21] sm:$0xf]  ;;  %v1004_v62 = vrot.slane %v4793_v59, %v4736_v8  ;;  %v1008_v1 = vrot.slane %v4793_v59, %v4739_v9 }
 0x447   :  { %v4781_v5 = vld [vmem:[%s5193_s29] sm:$0xf] }
 0x448   :  { %v863_v11 = vrot.slane %v4781_v5, %v4736_v8  ;;  %v867_v12 = vrot.slane %v4781_v5, %v4739_v9 }
 0x4b4   :  { %v810_v14 = vpop.f32.mrb[4].mxu0 }
 0x4b5   :  { %v880_v16 = vmul.f32 %v863_v11, %v810_v14  ;;  %v812_v17 = vpop.f32.mrb[5].mxu0  ;;  %v1029_v11 = vrot.slane %v4795_v60, %v4736_v8 }
 0x4b6   :  { %v881_v7 = vmul.f32 %v867_v12, %v812_v17  ;;  %v814_v18 = vpop.f32.mrb[6].mxu0 }
 0x4b7   :  { %v906_v19 = vadd.f32 %v889_v13, %v880_v16  ;;  %v815_v20 = vpop.f32.mrb[7].mxu0  ;;  %v1033_v13 = vrot.slane %v4795_v60, %v4739_v9 }
 0x4b8   :  { %v907_v21 = vadd.f32 %v893_v15, %v881_v7 }
 0x4b9   :  { %v912_v23 = vrot.slane %v906_v19, 4  ;;  %v940_v22 = vmul.f32 %v906_v19, %v906_v19 }
 0x4ba   :  { %v918_v24 = vrot.slane %v907_v21, 4  ;;  %v941_v25 = vmul.f32 %v907_v21, %v907_v21 }
 0x4bb   :  { %v913_v26 = vadd.f32 %v912_v23, %v906_v19  ;;  %v944_v27 = vrot.slane %v940_v22, 4  ;;  %v4813_v23 = vsub.s32 3, %v4733_v6 }
 0x4bc   :  { %v919_v28 = vadd.f32 %v918_v24, %v907_v21  ;;  %v950_v29 = vrot.slane %v941_v25, 4 }
 0x4bd   :  { %v914_v30 = vrot.slane %v913_v26, 2  ;;  %v945_v31 = vadd.f32 %v944_v27, %v940_v22  ;;  %v875_v24 = vrot.slane %v4781_v5, %v4813_v23  ;;  %v901_v27 = vrot.slane %v4783_v10, %v4813_v23 }
 0x4be   :  { %v920_v32 = vrot.slane %v919_v28, 2  ;;  %v951_v33 = vadd.f32 %v950_v29, %v941_v25 }
 0x4bf   :  { %v915_v34 = vadd.f32 %v914_v30, %v913_v26  ;;  %v946_v4 = vrot.slane %v945_v31, 2 }
 0x4c0   :  { %v921_v35 = vadd.f32 %v920_v32, %v919_v28  ;;  %v952_v36 = vrot.slane %v951_v33, 2 }
 0x4c1   :  { %v916_v37 = vrot.slane %v915_v34, 1  ;;  %v947_v38 = vadd.f32 %v946_v4, %v945_v31 }
 0x4c2   :  { %v922_v39 = vrot.slane %v921_v35, 1  ;;  %v953_v40 = vadd.f32 %v952_v36, %v951_v33 }
 0x4c3   :  { %v917_v41 = vadd.f32 %v916_v37, %v915_v34  ;;  %v948_v42 = vrot.slane %v947_v38, 1 }
 0x4c4   :  { %v923_v43 = vadd.f32 %v922_v39, %v921_v35  ;;  %v954_v44 = vrot.slane %v953_v40, 1 }
 0x4c5   :  { %v936_v45 = vmul.f32 0.125, %v917_v41  ;;  %v949_v46 = vadd.f32 %v948_v42, %v947_v38 }
 0x4c6   :  { %v937_v47 = vmul.f32 0.125, %v923_v43  ;;  %v955_v48 = vadd.f32 %v954_v44, %v953_v40 }
 0x4c7   :  { %v968_v49 = vmul.f32 0.125, %v949_v46  ;;  %v972_v50 = vmul.f32 %v936_v45, %v936_v45  ;;  %v984_v61 = vsub.f32 %v906_v19, %v936_v45 }
 0x4c8   :  { %v969_v51 = vmul.f32 0.125, %v955_v48  ;;  %v973_v52 = vmul.f32 %v937_v47, %v937_v47  ;;  %v985_v0 = vsub.f32 %v907_v21, %v937_v47  ;;  %v4810_v21 = vsub.s32 2, %v4733_v6 }
 0x4c9   :  { %v976_v53 = vsub.f32 %v968_v49, %v972_v50 }
 0x4ca   :  { %v977_v54 = vsub.f32 %v969_v51, %v973_v52  ;;  %v871_v22 = vrot.slane %v4781_v5, %v4810_v21  ;;  %v897_v25 = vrot.slane %v4783_v10, %v4810_v21 }
 0x4cb   :  { %v980_v55 = vmax.f32 %v976_v53, 0.0 }
 0x4cc   :  { %v981_v56 = vmax.f32 %v977_v54, 0.0 }
 0x4cd   :  { %v988_v57 = vadd.f32 1e-05, %v980_v55 }
 0x4ce   :  { %v989_v58 = vadd.f32 1e-05, %v981_v56 }
 0x4cf   :  { %3859 = vrsqrt.f32 %v988_v57 }
 0x4d0   :  { %3861 = vrsqrt.f32 %v989_v58 }
 0x4d9   :  { %v3860_v63 = vpop.eup %3859 }
 0x4da   :  { %v3862_v2 = vpop.eup %3861  ;;  %v996_v3 = vmul.f32 %v3860_v63, %v984_v61 }
 0x4db   :  { %v997_v12 = vmul.f32 %v3862_v2, %v985_v0 }
 0x4dc   :  { %v1021_v14 = vmul.f32 %v1004_v62, %v996_v3 }
 0x4dd   :  { %v1022_v15 = vmul.f32 %v1008_v1, %v997_v12 }
 0x4de   :  { %v1046_v16 = vadd.f32 %v1029_v11, %v1021_v14 }
 0x4df   :  { %v1047_v17 = vadd.f32 %v1033_v13, %v1022_v15 }
 0x4e0   :  { %v1050_v7 = vmul.f32 0.2, %v1046_v16 }
 0x4e1   :  { %v1051_v18 = vmul.f32 0.2, %v1047_v17 }
 0x4e2   :  { %v4805_v19 = vmax.f32 %v1046_v16, %v1050_v7  ;;  %v1012_v16 = vrot.slane %v4793_v59, %v4810_v21 }
 0x4e3   :  { %v4807_v20 = vmax.f32 %v1047_v17, %v1051_v18  ;;  %v1016_v18 = vrot.slane %v4793_v59, %v4813_v23 }
 0x4f4   :  { %v851_v26 = vpop.f32.mrb[8].mxu0 }
 0x4f5   :  { %v882_v28 = vmul.f32 %v871_v22, %v851_v26  ;;  %v853_v29 = vpop.f32.mrb[9].mxu0 }
 0x4f6   :  { %v883_v30 = vmul.f32 %v875_v24, %v853_v29  ;;  %v855_v31 = vpop.f32.mrb[10].mxu0 }
 0x4f7   :  { %v908_v32 = vadd.f32 %v897_v25, %v882_v28  ;;  %v856_v33 = vpop.f32.mrb[11].mxu0  ;;  %v1037_v25 = vrot.slane %v4795_v60, %v4810_v21 }
 0x4f8   :  { %v909_v34 = vadd.f32 %v901_v27, %v883_v30  ;;  %v1041_v27 = vrot.slane %v4795_v60, %v4813_v23 }
 0x4f9   :  { %v924_v4 = vrot.slane %v908_v32, 4  ;;  %v942_v35 = vmul.f32 %v908_v32, %v908_v32 }
 0x4fa   :  { %v930_v36 = vrot.slane %v909_v34, 4  ;;  %v943_v37 = vmul.f32 %v909_v34, %v909_v34 }
 0x4fb   :  { %v925_v38 = vadd.f32 %v924_v4, %v908_v32  ;;  %v956_v5 = vrot.slane %v942_v35, 4 }
 0x4fc   :  { %v931_v39 = vadd.f32 %v930_v36, %v909_v34  ;;  %v962_v40 = vrot.slane %v943_v37, 4 }
 0x4fd   :  { %v926_v41 = vrot.slane %v925_v38, 2  ;;  %v957_v42 = vadd.f32 %v956_v5, %v942_v35 }
 0x4fe   :  { %v932_v43 = vrot.slane %v931_v39, 2  ;;  %v963_v44 = vadd.f32 %v962_v40, %v943_v37 }
 0x4ff   :  { %v927_v10 = vadd.f32 %v926_v41, %v925_v38  ;;  %v958_v45 = vrot.slane %v957_v42, 2 }
 0x500   :  { %v933_v46 = vadd.f32 %v932_v43, %v931_v39  ;;  %v964_v47 = vrot.slane %v963_v44, 2 }
 0x501   :  { %v928_v48 = vrot.slane %v927_v10, 1  ;;  %v959_v49 = vadd.f32 %v958_v45, %v957_v42 }
 0x502   :  { %v934_v50 = vrot.slane %v933_v46, 1  ;;  %v965_v51 = vadd.f32 %v964_v47, %v963_v44 }
 0x503   :  { %v929_v52 = vadd.f32 %v928_v48, %v927_v10  ;;  %v960_v53 = vrot.slane %v959_v49, 1 }
 0x504   :  { %v935_v54 = vadd.f32 %v934_v50, %v933_v46  ;;  %v966_v55 = vrot.slane %v965_v51, 1 }
 0x505   :  { %v938_v56 = vmul.f32 0.125, %v929_v52  ;;  %v961_v57 = vadd.f32 %v960_v53, %v959_v49 }
 0x506   :  { %v939_v58 = vmul.f32 0.125, %v935_v54  ;;  %v967_v61 = vadd.f32 %v966_v55, %v965_v51 }
 0x507   :  { %v970_v62 = vmul.f32 0.125, %v961_v57  ;;  %v974_v63 = vmul.f32 %v938_v56, %v938_v56  ;;  %v986_v15 = vsub.f32 %v908_v32, %v938_v56 }
 0x508   :  { %v971_v0 = vmul.f32 0.125, %v967_v61  ;;  %v975_v1 = vmul.f32 %v939_v58, %v939_v58  ;;  %v987_v7 = vsub.f32 %v909_v34, %v939_v58 }
 0x509   :  { %v978_v2 = vsub.f32 %v970_v62, %v974_v63 }
 0x50a   :  { %v979_v3 = vsub.f32 %v971_v0, %v975_v1 }
 0x50b   :  { %v982_v11 = vmax.f32 %v978_v2, 0.0 }
 0x50c   :  { %v983_v12 = vmax.f32 %v979_v3, 0.0 }
 0x50d   :  { %v990_v13 = vadd.f32 1e-05, %v982_v11 }
 0x50e   :  { %v991_v14 = vadd.f32 1e-05, %v983_v12 }
 0x50f   :  { %3863 = vrsqrt.f32 %v990_v13 }
 0x510   :  { %3865 = vrsqrt.f32 %v991_v14 }
 0x519   :  { %v3864_v17 = vpop.eup %3863 }
 0x51a   :  { %v3866_v22 = vpop.eup %3865  ;;  %v998_v24 = vmul.f32 %v3864_v17, %v986_v15 }
 0x51b   :  { %v999_v26 = vmul.f32 %v3866_v22, %v987_v7 }
 0x51c   :  { %v1023_v28 = vmul.f32 %v1012_v16, %v998_v24 }
 0x51d   :  { %v1024_v29 = vmul.f32 %v1016_v18, %v999_v26 }
 0x51e   :  { %v1048_v30 = vadd.f32 %v1037_v25, %v1023_v28 }
 0x51f   :  { %v1049_v31 = vadd.f32 %v1041_v27, %v1024_v29 }
 0x520   :  { %v1052_v32 = vmul.f32 0.2, %v1048_v30 }
 0x521   :  { %v1053_v33 = vmul.f32 0.2, %v1049_v31 }
 0x522   :  { %v4831_v4 = vmax.f32 %v1048_v30, %v1052_v32 }
 0x523   :  { %v4833_v34 = vmax.f32 %v1049_v31, %v1053_v33 }
 0x524   :  { %4333 = dma.done.wait [#allocation4], 16384 }
 0x525   :  { %4334 = vsyncadd [#allocation4], 4294950912  ;;  %v4837_v59 = vpack.c.bf16 %v4807_v20, %v4807_v20  ;;  %v1063_v60 = vld [vmem:[#allocation2 + $0x8] sm:$0xff]  ;;  %v1065_v35 = vld [vmem:[#allocation2 + $0x18] sm:$0xff] }
 0x526   :  { %v1062_v36 = vld [vmem:[#allocation2] sm:$0xff]  ;;  %v1191_v37 = vunpack.c.l.s8.bf16 %v1063_v60  ;;  %v1199_v38 = vunpack.c.h.s8.bf16 %v1063_v60  ;;  %v1193_v5 = vunpack.c.l.s8.bf16 %v1065_v35  ;;  %v1201_v39 = vunpack.c.h.s8.bf16 %v1065_v35  ;;  %v1064_v40 = vld [vmem:[#allocation2 + $0x10] sm:$0xff]  ;;  %v1071_v43 = vld [vmem:[#allocation2 + $0x48] sm:$0xff] }
 0x527   :  { %1482 = vmatprep.mubr.bf16.mxu1 %v4837_v59  ;;  %1564 = vmatprep.mubr.bf16.mxu0 %v4837_v59  ;;  %v1190_v41 = vunpack.c.l.s8.bf16 %v1062_v36  ;;  %v1192_v42 = vunpack.c.l.s8.bf16 %v1064_v40  ;;  %v1073_v44 = vld [vmem:[#allocation2 + $0x58] sm:$0xff]  ;;  %v1198_v20 = vunpack.c.h.s8.bf16 %v1062_v36  ;;  %v1200_v10 = vunpack.c.h.s8.bf16 %v1064_v40  ;;  %v1070_v47 = vld [vmem:[#allocation2 + $0x40] sm:$0xff]  ;;  %v1072_v48 = vld [vmem:[#allocation2 + $0x50] sm:$0xff] }
 0x528   :  { %1450 = vmatprep.subr.bf16.mxu1 %v1191_v37  ;;  %1532 = vmatprep.subr.bf16.mxu0 %v1193_v5  ;;  %v1207_v45 = vunpack.c.l.s8.bf16 %v1071_v43  ;;  %v1209_v46 = vunpack.c.l.s8.bf16 %v1073_v44  ;;  %v1206_v49 = vunpack.c.l.s8.bf16 %v1070_v47  ;;  %v1208_v50 = vunpack.c.l.s8.bf16 %v1072_v48  ;;  %v1079_v53 = vld [vmem:[#allocation2 + $0x88] sm:$0xff]  ;;  %v1081_v54 = vld [vmem:[#allocation2 + $0x98] sm:$0xff]  ;;  %v1078_v61 = vld [vmem:[#allocation2 + $0x80] sm:$0xff] }
 0x529   :  { %1451 = vmatpush1.bf16.msra.mxu1 %v1190_v41  ;;  %1533 = vmatpush1.bf16.msra.mxu0 %v1192_v42  ;;  %v1215_v51 = vunpack.c.h.s8.bf16 %v1071_v43  ;;  %v1217_v52 = vunpack.c.h.s8.bf16 %v1073_v44  ;;  %v1214_v55 = vunpack.c.h.s8.bf16 %v1070_v47  ;;  %v1216_v56 = vunpack.c.h.s8.bf16 %v1072_v48  ;;  %v1080_v62 = vld [vmem:[#allocation2 + $0x90] sm:$0xff]  ;;  %v1087_v3 = vld [vmem:[#allocation2 + $0xc8] sm:$0xff]  ;;  %v1089_v11 = vld [vmem:[#allocation2 + $0xd8] sm:$0xff] }
 0x52a   :  { %1452 = vmatprep.subr.bf16.mxu1 %v1199_v38  ;;  %1534 = vmatprep.subr.bf16.mxu0 %v1201_v39  ;;  %v1223_v57 = vunpack.c.l.s8.bf16 %v1079_v53  ;;  %v1225_v58 = vunpack.c.l.s8.bf16 %v1081_v54  ;;  %v1222_v63 = vunpack.c.l.s8.bf16 %v1078_v61  ;;  %v1224_v0 = vunpack.c.l.s8.bf16 %v1080_v62  ;;  %v1086_v16 = vld [vmem:[#allocation2 + $0xc0] sm:$0xff]  ;;  %v1088_v17 = vld [vmem:[#allocation2 + $0xd0] sm:$0xff]  ;;  %v1095_v25 = vld [vmem:[#allocation2 + $0x108] sm:$0xff] }
 0x52b   :  { %v1231_v1 = vunpack.c.h.s8.bf16 %v1079_v53  ;;  %v1233_v2 = vunpack.c.h.s8.bf16 %v1081_v54  ;;  %v1230_v12 = vunpack.c.h.s8.bf16 %v1078_v61  ;;  %v1232_v13 = vunpack.c.h.s8.bf16 %v1080_v62  ;;  %v1097_v26 = vld [vmem:[#allocation2 + $0x118] sm:$0xff]  ;;  %v1094_v31 = vld [vmem:[#allocation2 + $0x100] sm:$0xff]  ;;  %v1096_v32 = vld [vmem:[#allocation2 + $0x110] sm:$0xff] }
 0x52c   :  { %v1239_v14 = vunpack.c.l.s8.bf16 %v1087_v3  ;;  %v1241_v15 = vunpack.c.l.s8.bf16 %v1089_v11  ;;  %v1238_v7 = vunpack.c.l.s8.bf16 %v1086_v16  ;;  %v1240_v18 = vunpack.c.l.s8.bf16 %v1088_v17  ;;  %v1103_v37 = vld [vmem:[#allocation2 + $0x148] sm:$0xff]  ;;  %v1105_v38 = vld [vmem:[#allocation2 + $0x158] sm:$0xff]  ;;  %v1102_v42 = vld [vmem:[#allocation2 + $0x140] sm:$0xff] }
 0x52d   :  { %1453 = vmatpush1.bf16.msra.mxu1 %v1198_v20  ;;  %1535 = vmatpush1.bf16.msra.mxu0 %v1200_v10  ;;  %v1247_v22 = vunpack.c.h.s8.bf16 %v1087_v3  ;;  %v1249_v24 = vunpack.c.h.s8.bf16 %v1089_v11  ;;  %v1246_v27 = vunpack.c.h.s8.bf16 %v1086_v16  ;;  %v1248_v28 = vunpack.c.h.s8.bf16 %v1088_v17  ;;  %v1104_v43 = vld [vmem:[#allocation2 + $0x150] sm:$0xff]  ;;  %v1113_v47 = vld [vmem:[#allocation2 + $0x198] sm:$0xff] }
 0x52e   :  { %1454 = vmatprep.subr.bf16.mxu1 %v1207_v45  ;;  %1536 = vmatprep.subr.bf16.mxu0 %v1209_v46  ;;  %v1255_v29 = vunpack.c.l.s8.bf16 %v1095_v25  ;;  %v1257_v30 = vunpack.c.l.s8.bf16 %v1097_v26  ;;  %v1254_v33 = vunpack.c.l.s8.bf16 %v1094_v31  ;;  %v1256_v60 = vunpack.c.l.s8.bf16 %v1096_v32  ;;  %v1111_v46 = vld [vmem:[#allocation2 + $0x188] sm:$0xff]  ;;  %v1112_v53 = vld [vmem:[#allocation2 + $0x190] sm:$0xff]  ;;  %v1121_v61 = vld [vmem:[#allocation2 + $0x1d8] sm:$0xff] }
 0x52f   :  { %v1263_v35 = vunpack.c.h.s8.bf16 %v1095_v25  ;;  %v1265_v36 = vunpack.c.h.s8.bf16 %v1097_v26  ;;  %v1262_v5 = vunpack.c.h.s8.bf16 %v1094_v31  ;;  %v1264_v39 = vunpack.c.h.s8.bf16 %v1096_v32  ;;  %v1120_v3 = vld [vmem:[#allocation2 + $0x1d0] sm:$0xff]  ;;  %v1129_v16 = vld [vmem:[#allocation2 + $0x218] sm:$0xff]  ;;  %v1135_v31 = vld [vmem:[#allocation2 + $0x248] sm:$0xff] }
 0x530   :  { %v1271_v40 = vunpack.c.l.s8.bf16 %v1103_v37  ;;  %v1273_v41 = vunpack.c.l.s8.bf16 %v1105_v38  ;;  %v1270_v44 = vunpack.c.l.s8.bf16 %v1102_v42  ;;  %v1272_v20 = vunpack.c.l.s8.bf16 %v1104_v43  ;;  %v1128_v25 = vld [vmem:[#allocation2 + $0x210] sm:$0xff]  ;;  %v1137_v32 = vld [vmem:[#allocation2 + $0x258] sm:$0xff] }
 0x531   :  { %1455 = vmatpush1.bf16.msra.mxu1 %v1206_v49  ;;  %1537 = vmatpush1.bf16.msra.mxu0 %v1208_v50  ;;  %v1279_v10 = vunpack.c.h.s8.bf16 %v1103_v37  ;;  %v1281_v45 = vunpack.c.h.s8.bf16 %v1105_v38  ;;  %v1278_v48 = vunpack.c.h.s8.bf16 %v1102_v42  ;;  %v1280_v49 = vunpack.c.h.s8.bf16 %v1104_v43  ;;  %v1134_v37 = vld [vmem:[#allocation2 + $0x240] sm:$0xff]  ;;  %v1136_v38 = vld [vmem:[#allocation2 + $0x250] sm:$0xff]  ;;  %v1145_v42 = vld [vmem:[#allocation2 + $0x298] sm:$0xff] }
 0x532   :  { %1456 = vmatprep.subr.bf16.mxu1 %v1215_v51  ;;  %1538 = vmatprep.subr.bf16.mxu0 %v1217_v52  ;;  %v1287_v50 = vunpack.c.l.s8.bf16 %v1111_v46  ;;  %v1289_v51 = vunpack.c.l.s8.bf16 %v1113_v47  ;;  %v1110_v52 = vld [vmem:[#allocation2 + $0x180] sm:$0xff]  ;;  %v4843_v26 = vpack.c.bf16 %v4805_v19, %v4805_v19  ;;  %v1342_v43 = vunpack.c.h.s8.bf16 %v1134_v37 }
 0x533   :  { %v1286_v54 = vunpack.c.l.s8.bf16 %v1110_v52  ;;  %v1294_v62 = vunpack.c.h.s8.bf16 %v1110_v52  ;;  %v1153_v52 = vld [vmem:[#allocation2 + $0x2d8] sm:$0xff] }
 0x535   :  { %1457 = vmatpush1.bf16.msra.mxu1 %v1214_v55  ;;  %1539 = vmatpush1.bf16.msra.mxu0 %v1216_v56  ;;  %v1288_v55 = vunpack.c.l.s8.bf16 %v1112_v53  ;;  %v1295_v56 = vunpack.c.h.s8.bf16 %v1111_v46  ;;  %v1144_v46 = vld [vmem:[#allocation2 + $0x290] sm:$0xff] }
 0x536   :  { %1458 = vmatprep.subr.bf16.mxu1 %v1223_v57  ;;  %1540 = vmatprep.subr.bf16.mxu0 %v1225_v58  ;;  %v1297_v57 = vunpack.c.h.s8.bf16 %v1113_v47  ;;  %v1119_v58 = vld [vmem:[#allocation2 + $0x1c8] sm:$0xff] }
 0x539   :  { %1459 = vmatpush1.bf16.msra.mxu1 %v1222_v63  ;;  %1541 = vmatpush1.bf16.msra.mxu0 %v1224_v0  ;;  %v1296_v63 = vunpack.c.h.s8.bf16 %v1112_v53  ;;  %v1303_v0 = vunpack.c.l.s8.bf16 %v1119_v58 }
 0x53a   :  { %1460 = vmatprep.subr.bf16.mxu1 %v1231_v1  ;;  %1542 = vmatprep.subr.bf16.mxu0 %v1233_v2  ;;  %v1305_v1 = vunpack.c.l.s8.bf16 %v1121_v61  ;;  %v1118_v2 = vld [vmem:[#allocation2 + $0x1c0] sm:$0xff] }
 0x53b   :  { %v1302_v11 = vunpack.c.l.s8.bf16 %v1118_v2  ;;  %v1310_v17 = vunpack.c.h.s8.bf16 %v1118_v2  ;;  %v1161_v2 = vld [vmem:[#allocation2 + $0x318] sm:$0xff] }
 0x53d   :  { %1461 = vmatpush1.bf16.msra.mxu1 %v1230_v12  ;;  %1543 = vmatpush1.bf16.msra.mxu0 %v1232_v13  ;;  %v1304_v12 = vunpack.c.l.s8.bf16 %v1120_v3  ;;  %v1311_v13 = vunpack.c.h.s8.bf16 %v1119_v58  ;;  %v1152_v58 = vld [vmem:[#allocation2 + $0x2d0] sm:$0xff] }
 0x53e   :  { %1462 = vmatprep.subr.bf16.mxu1 %v1239_v14  ;;  %1544 = vmatprep.subr.bf16.mxu0 %v1241_v15  ;;  %v1313_v14 = vunpack.c.h.s8.bf16 %v1121_v61  ;;  %v1127_v15 = vld [vmem:[#allocation2 + $0x208] sm:$0xff] }
 0x541   :  { %1463 = vmatpush1.bf16.msra.mxu1 %v1238_v7  ;;  %1545 = vmatpush1.bf16.msra.mxu0 %v1240_v18  ;;  %v1312_v7 = vunpack.c.h.s8.bf16 %v1120_v3  ;;  %v1319_v18 = vunpack.c.l.s8.bf16 %v1127_v15 }
 0x542   :  { %1464 = vmatprep.subr.bf16.mxu1 %v1247_v22  ;;  %1546 = vmatprep.subr.bf16.mxu0 %v1249_v24  ;;  %v1321_v22 = vunpack.c.l.s8.bf16 %v1129_v16  ;;  %v1126_v24 = vld [vmem:[#allocation2 + $0x200] sm:$0xff] }
 0x543   :  { %v1326_v19 = vunpack.c.h.s8.bf16 %v1126_v24 }
 0x545   :  { %1465 = vmatpush1.bf16.msra.mxu1 %v1246_v27  ;;  %1547 = vmatpush1.bf16.msra.mxu0 %v1248_v28  ;;  %v1318_v27 = vunpack.c.l.s8.bf16 %v1126_v24  ;;  %v1320_v28 = vunpack.c.l.s8.bf16 %v1128_v25  ;;  %v1169_v24 = vld [vmem:[#allocation2 + $0x358] sm:$0xff] }
 0x546   :  { %1466 = vmatprep.subr.bf16.mxu1 %v1255_v29  ;;  %1548 = vmatprep.subr.bf16.mxu0 %v1257_v30  ;;  %v1327_v29 = vunpack.c.h.s8.bf16 %v1127_v15  ;;  %v1329_v30 = vunpack.c.h.s8.bf16 %v1129_v16  ;;  %v1160_v15 = vld [vmem:[#allocation2 + $0x310] sm:$0xff] }
 0x549   :  { %1467 = vmatpush1.bf16.msra.mxu1 %v1254_v33  ;;  %1549 = vmatpush1.bf16.msra.mxu0 %v1256_v60  ;;  %v4847_v33 = vpack.c.bf16 %v4833_v34, %v4833_v34  ;;  %v1328_v60 = vunpack.c.h.s8.bf16 %v1128_v25  ;;  %v1334_v34 = vunpack.c.l.s8.bf16 %v1134_v37  ;;  %v1177_v37 = vld [vmem:[#allocation2 + $0x398] sm:$0xff] }
 0x54a   :  { %1468 = vmatprep.subr.bf16.mxu1 %v1263_v35  ;;  %1550 = vmatprep.subr.bf16.mxu0 %v1265_v36  ;;  %v1335_v35 = vunpack.c.l.s8.bf16 %v1135_v31  ;;  %v1337_v36 = vunpack.c.l.s8.bf16 %v1137_v32 }
 0x54d   :  { %1469 = vmatpush1.bf16.msra.mxu1 %v1262_v5  ;;  %1551 = vmatpush1.bf16.msra.mxu0 %v1264_v39  ;;  %v1336_v5 = vunpack.c.l.s8.bf16 %v1136_v38  ;;  %v1343_v39 = vunpack.c.h.s8.bf16 %v1135_v31  ;;  %v1168_v31 = vld [vmem:[#allocation2 + $0x350] sm:$0xff] }
 0x54e   :  { %1470 = vmatprep.subr.bf16.mxu1 %v1271_v40  ;;  %1552 = vmatprep.subr.bf16.mxu0 %v1273_v41  ;;  %v1345_v40 = vunpack.c.h.s8.bf16 %v1137_v32  ;;  %v1143_v41 = vld [vmem:[#allocation2 + $0x288] sm:$0xff] }
 0x551   :  { %1471 = vmatpush1.bf16.msra.mxu1 %v1270_v44  ;;  %1553 = vmatpush1.bf16.msra.mxu0 %v1272_v20  ;;  %v1344_v44 = vunpack.c.h.s8.bf16 %v1136_v38  ;;  %v1351_v20 = vunpack.c.l.s8.bf16 %v1143_v41 }
 0x552   :  { %1472 = vmatprep.subr.bf16.mxu1 %v1279_v10  ;;  %1554 = vmatprep.subr.bf16.mxu0 %v1281_v45  ;;  %v1353_v10 = vunpack.c.l.s8.bf16 %v1145_v42  ;;  %v1142_v45 = vld [vmem:[#allocation2 + $0x280] sm:$0xff] }
 0x553   :  { %v1350_v47 = vunpack.c.l.s8.bf16 %v1142_v45  ;;  %v1358_v53 = vunpack.c.h.s8.bf16 %v1142_v45  ;;  %v1185_v45 = vld [vmem:[#allocation2 + $0x3d8] sm:$0xff] }
 0x555   :  { %1473 = vmatpush1.bf16.msra.mxu1 %v1278_v48  ;;  %1555 = vmatpush1.bf16.msra.mxu0 %v1280_v49  ;;  %v1352_v48 = vunpack.c.l.s8.bf16 %v1144_v46  ;;  %v1359_v49 = vunpack.c.h.s8.bf16 %v1143_v41  ;;  %v1176_v41 = vld [vmem:[#allocation2 + $0x390] sm:$0xff] }
 0x556   :  { %1474 = vmatprep.subr.bf16.mxu1 %v1287_v50  ;;  %1556 = vmatprep.subr.bf16.mxu0 %v1289_v51  ;;  %v1361_v50 = vunpack.c.h.s8.bf16 %v1145_v42  ;;  %v1151_v51 = vld [vmem:[#allocation2 + $0x2c8] sm:$0xff] }
 0x559   :  { %1475 = vmatpush1.bf16.msra.mxu1 %v1286_v54  ;;  %1557 = vmatpush1.bf16.msra.mxu0 %v1288_v55  ;;  %v1360_v54 = vunpack.c.h.s8.bf16 %v1144_v46  ;;  %v1367_v55 = vunpack.c.l.s8.bf16 %v1151_v51 }
 0x55a   :  { %1476 = vmatprep.subr.bf16.mxu1 %v1295_v56  ;;  %1558 = vmatprep.subr.bf16.mxu0 %v1297_v57  ;;  %v1369_v56 = vunpack.c.l.s8.bf16 %v1153_v52  ;;  %v1150_v57 = vld [vmem:[#allocation2 + $0x2c0] sm:$0xff] }
 0x55b   :  { %v1366_v61 = vunpack.c.l.s8.bf16 %v1150_v57  ;;  %v1374_v3 = vunpack.c.h.s8.bf16 %v1150_v57  ;;  %v1069_v57 = vld [vmem:[#allocation2 + $0x38] sm:$0xff] }
 0x55d   :  { %1477 = vmatpush1.bf16.msra.mxu1 %v1294_v62  ;;  %1559 = vmatpush1.bf16.msra.mxu0 %v1296_v63  ;;  %v1368_v62 = vunpack.c.l.s8.bf16 %v1152_v58  ;;  %v1375_v63 = vunpack.c.h.s8.bf16 %v1151_v51  ;;  %v1184_v51 = vld [vmem:[#allocation2 + $0x3d0] sm:$0xff] }
 0x55e   :  { %1478 = vmatprep.subr.bf16.mxu1 %v1303_v0  ;;  %1560 = vmatprep.subr.bf16.mxu0 %v1305_v1  ;;  %v1377_v0 = vunpack.c.h.s8.bf16 %v1153_v52  ;;  %v1159_v1 = vld [vmem:[#allocation2 + $0x308] sm:$0xff] }
 0x561   :  { %1479 = vmatpush1.bf16.msra.mxu1 %v1302_v11  ;;  %1561 = vmatpush1.bf16.msra.mxu0 %v1304_v12  ;;  %v1376_v11 = vunpack.c.h.s8.bf16 %v1152_v58  ;;  %v1383_v12 = vunpack.c.l.s8.bf16 %v1159_v1 }
 0x562   :  { %1480 = vmatprep.subr.bf16.mxu1 %v1311_v13  ;;  %1562 = vmatprep.subr.bf16.mxu0 %v1313_v14  ;;  %v1385_v13 = vunpack.c.l.s8.bf16 %v1161_v2  ;;  %v1158_v14 = vld [vmem:[#allocation2 + $0x300] sm:$0xff] }
 0x563   :  { %v1382_v16 = vunpack.c.l.s8.bf16 %v1158_v14  ;;  %v1390_v25 = vunpack.c.h.s8.bf16 %v1158_v14  ;;  %v1075_v14 = vld [vmem:[#allocation2 + $0x68] sm:$0xff] }
 0x565   :  { %1481 = vmatpush1.bf16.msra.mxu1 %v1310_v17  ;;  %1563 = vmatpush1.bf16.msra.mxu0 %v1312_v7  ;;  %v1384_v17 = vunpack.c.l.s8.bf16 %v1160_v15  ;;  %v1391_v7 = vunpack.c.h.s8.bf16 %v1159_v1  ;;  %v1068_v1 = vld [vmem:[#allocation2 + $0x30] sm:$0xff] }
 0x566   :  { %1491 = vmatprep.subr.bf16.mxu1 %v1319_v18  ;;  %1573 = vmatprep.subr.bf16.mxu0 %v1321_v22  ;;  %v1393_v18 = vunpack.c.h.s8.bf16 %v1161_v2  ;;  %v1167_v22 = vld [vmem:[#allocation2 + $0x348] sm:$0xff]  ;;  %v4855_v2 = vpack.c.bf16 %v4831_v4, %v4831_v4  ;;  %v1211_v4 = vunpack.c.l.s8.bf16 %v1075_v14 }
 0x568   :  { %1483 = vmatmul.mubr.bf16.vlgmr.msra.gmra.mrb[8].mxu1 %v4843_v26  ;;  %1565 = vmatmul.mubr.bf16.vlgmr.msra.gmra.mrb[12].mxu0 %v4843_v26 }
 0x569   :  { %1492 = vmatpush1.bf16.msra.mxu1 %v1318_v27  ;;  %1574 = vmatpush1.bf16.msra.mxu0 %v1320_v28  ;;  %v1392_v27 = vunpack.c.h.s8.bf16 %v1160_v15  ;;  %v1399_v28 = vunpack.c.l.s8.bf16 %v1167_v22  ;;  %v1077_v15 = vld [vmem:[#allocation2 + $0x78] sm:$0xff] }
 0x56a   :  { %1493 = vmatprep.subr.bf16.mxu1 %v1327_v29  ;;  %1575 = vmatprep.subr.bf16.mxu0 %v1329_v30  ;;  %v1401_v29 = vunpack.c.l.s8.bf16 %v1169_v24  ;;  %v1166_v30 = vld [vmem:[#allocation2 + $0x340] sm:$0xff] }
 0x56b   :  { %1523 = vmatprep.mubr.bf16.mxu1 %v4847_v33  ;;  %1605 = vmatprep.mubr.bf16.mxu0 %v4847_v33  ;;  %v1398_v32 = vunpack.c.l.s8.bf16 %v1166_v30  ;;  %v1406_v38 = vunpack.c.h.s8.bf16 %v1166_v30  ;;  %v1085_v30 = vld [vmem:[#allocation2 + $0xb8] sm:$0xff] }
 0x56d   :  { %1494 = vmatpush1.bf16.msra.mxu1 %v1326_v19  ;;  %1576 = vmatpush1.bf16.msra.mxu0 %v1328_v60  ;;  %v1400_v19 = vunpack.c.l.s8.bf16 %v1168_v31  ;;  %v1407_v60 = vunpack.c.h.s8.bf16 %v1167_v22  ;;  %v1076_v22 = vld [vmem:[#allocation2 + $0x70] sm:$0xff] }
 0x56e   :  { %1495 = vmatprep.subr.bf16.mxu1 %v1335_v35  ;;  %1577 = vmatprep.subr.bf16.mxu0 %v1337_v36  ;;  %v1409_v35 = vunpack.c.h.s8.bf16 %v1169_v24  ;;  %v1175_v36 = vld [vmem:[#allocation2 + $0x388] sm:$0xff] }
 0x571   :  { %1496 = vmatpush1.bf16.msra.mxu1 %v1334_v34  ;;  %1578 = vmatpush1.bf16.msra.mxu0 %v1336_v5  ;;  %v1408_v34 = vunpack.c.h.s8.bf16 %v1168_v31  ;;  %v1415_v5 = vunpack.c.l.s8.bf16 %v1175_v36 }
 0x572   :  { %1497 = vmatprep.subr.bf16.mxu1 %v1343_v39  ;;  %1579 = vmatprep.subr.bf16.mxu0 %v1345_v40  ;;  %v1417_v39 = vunpack.c.l.s8.bf16 %v1177_v37  ;;  %v1174_v40 = vld [vmem:[#allocation2 + $0x380] sm:$0xff] }
 0x573   :  { %v1414_v42 = vunpack.c.l.s8.bf16 %v1174_v40  ;;  %v1422_v46 = vunpack.c.h.s8.bf16 %v1174_v40 }
 0x575   :  { %1498 = vmatpush1.bf16.msra.mxu1 %v1342_v43  ;;  %1580 = vmatpush1.bf16.msra.mxu0 %v1344_v44  ;;  %v1416_v43 = vunpack.c.l.s8.bf16 %v1176_v41  ;;  %v1423_v44 = vunpack.c.h.s8.bf16 %v1175_v36 }
 0x576   :  { %1499 = vmatprep.subr.bf16.mxu1 %v1351_v20  ;;  %1581 = vmatprep.subr.bf16.mxu0 %v1353_v10  ;;  %v1425_v20 = vunpack.c.h.s8.bf16 %v1177_v37  ;;  %v1183_v10 = vld [vmem:[#allocation2 + $0x3c8] sm:$0xff] }
 0x579   :  { %1500 = vmatpush1.bf16.msra.mxu1 %v1350_v47  ;;  %1582 = vmatpush1.bf16.msra.mxu0 %v1352_v48  ;;  %v1424_v47 = vunpack.c.h.s8.bf16 %v1176_v41  ;;  %v1431_v48 = vunpack.c.l.s8.bf16 %v1183_v10 }
 0x57a   :  { %1501 = vmatprep.subr.bf16.mxu1 %v1359_v49  ;;  %1583 = vmatprep.subr.bf16.mxu0 %v1361_v50  ;;  %v1433_v49 = vunpack.c.l.s8.bf16 %v1185_v45  ;;  %v1182_v50 = vld [vmem:[#allocation2 + $0x3c0] sm:$0xff] }
 0x57b   :  { %v1430_v52 = vunpack.c.l.s8.bf16 %v1182_v50  ;;  %v1438_v58 = vunpack.c.h.s8.bf16 %v1182_v50 }
 0x57d   :  { %1502 = vmatpush1.bf16.msra.mxu1 %v1358_v53  ;;  %1584 = vmatpush1.bf16.msra.mxu0 %v1360_v54  ;;  %v1432_v53 = vunpack.c.l.s8.bf16 %v1184_v51  ;;  %v1439_v54 = vunpack.c.h.s8.bf16 %v1183_v10 }
 0x57e   :  { %1503 = vmatprep.subr.bf16.mxu1 %v1367_v55  ;;  %1585 = vmatprep.subr.bf16.mxu0 %v1369_v56  ;;  %v1441_v55 = vunpack.c.h.s8.bf16 %v1185_v45  ;;  %v1067_v56 = vld [vmem:[#allocation2 + $0x28] sm:$0xff] }
 0x581   :  { %1504 = vmatpush1.bf16.msra.mxu1 %v1366_v61  ;;  %1586 = vmatpush1.bf16.msra.mxu0 %v1368_v62  ;;  %v1440_v61 = vunpack.c.h.s8.bf16 %v1184_v51  ;;  %v1195_v62 = vunpack.c.l.s8.bf16 %v1067_v56 }
 0x582   :  { %1505 = vmatprep.subr.bf16.mxu1 %v1375_v63  ;;  %1587 = vmatprep.subr.bf16.mxu0 %v1377_v0  ;;  %v1197_v63 = vunpack.c.l.s8.bf16 %v1069_v57  ;;  %v1066_v0 = vld [vmem:[#allocation2 + $0x20] sm:$0xff] }
 0x585   :  { %1506 = vmatpush1.bf16.msra.mxu1 %v1374_v3  ;;  %1588 = vmatpush1.bf16.msra.mxu0 %v1376_v11  ;;  %v1194_v3 = vunpack.c.l.s8.bf16 %v1066_v0  ;;  %v1196_v11 = vunpack.c.l.s8.bf16 %v1068_v1 }
 0x586   :  { %1507 = vmatprep.subr.bf16.mxu1 %v1383_v12  ;;  %1589 = vmatprep.subr.bf16.mxu0 %v1385_v13  ;;  %v1203_v12 = vunpack.c.h.s8.bf16 %v1067_v56  ;;  %v1205_v13 = vunpack.c.h.s8.bf16 %v1069_v57 }
 0x589   :  { %1508 = vmatpush1.bf16.msra.mxu1 %v1382_v16  ;;  %1590 = vmatpush1.bf16.msra.mxu0 %v1384_v17  ;;  %v1202_v16 = vunpack.c.h.s8.bf16 %v1066_v0  ;;  %v1204_v17 = vunpack.c.h.s8.bf16 %v1068_v1 }
 0x58a   :  { %1509 = vmatprep.subr.bf16.mxu1 %v1391_v7  ;;  %1591 = vmatprep.subr.bf16.mxu0 %v1393_v18  ;;  %v1213_v7 = vunpack.c.l.s8.bf16 %v1077_v15  ;;  %v1074_v18 = vld [vmem:[#allocation2 + $0x60] sm:$0xff] }
 0x58b   :  { %v1210_v24 = vunpack.c.l.s8.bf16 %v1074_v18  ;;  %v1218_v31 = vunpack.c.h.s8.bf16 %v1074_v18 }
 0x58d   :  { %1510 = vmatpush1.bf16.msra.mxu1 %v1390_v25  ;;  %1592 = vmatpush1.bf16.msra.mxu0 %v1392_v27  ;;  %v1212_v25 = vunpack.c.l.s8.bf16 %v1076_v22  ;;  %v1219_v27 = vunpack.c.h.s8.bf16 %v1075_v14 }
 0x58e   :  { %1511 = vmatprep.subr.bf16.mxu1 %v1399_v28  ;;  %1593 = vmatprep.subr.bf16.mxu0 %v1401_v29  ;;  %v1221_v28 = vunpack.c.h.s8.bf16 %v1077_v15  ;;  %v1083_v29 = vld [vmem:[#allocation2 + $0xa8] sm:$0xff] }
 0x591   :  { %1512 = vmatpush1.bf16.msra.mxu1 %v1398_v32  ;;  %1594 = vmatpush1.bf16.msra.mxu0 %v1400_v19  ;;  %v1220_v32 = vunpack.c.h.s8.bf16 %v1076_v22  ;;  %v1227_v19 = vunpack.c.l.s8.bf16 %v1083_v29 }
 0x592   :  { %1513 = vmatprep.subr.bf16.mxu1 %v1407_v60  ;;  %1595 = vmatprep.subr.bf16.mxu0 %v1409_v35  ;;  %v1229_v60 = vunpack.c.l.s8.bf16 %v1085_v30  ;;  %v1082_v35 = vld [vmem:[#allocation2 + $0xa0] sm:$0xff] }
 0x593   :  { %v1226_v36 = vunpack.c.l.s8.bf16 %v1082_v35  ;;  %v1234_v40 = vunpack.c.h.s8.bf16 %v1082_v35 }
 0x595   :  { %1514 = vmatpush1.bf16.msra.mxu1 %v1406_v38  ;;  %1596 = vmatpush1.bf16.msra.mxu0 %v1408_v34  ;;  %v1235_v38 = vunpack.c.h.s8.bf16 %v1083_v29  ;;  %v1237_v34 = vunpack.c.h.s8.bf16 %v1085_v30 }
 0x596   :  { %1515 = vmatprep.subr.bf16.mxu1 %v1415_v5  ;;  %1597 = vmatprep.subr.bf16.mxu0 %v1417_v39  ;;  %v1091_v5 = vld [vmem:[#allocation2 + $0xe8] sm:$0xff]  ;;  %v1093_v39 = vld [vmem:[#allocation2 + $0xf8] sm:$0xff] }
 0x599   :  { %1516 = vmatpush1.bf16.msra.mxu1 %v1414_v42  ;;  %1598 = vmatpush1.bf16.msra.mxu0 %v1416_v43  ;;  %v1243_v42 = vunpack.c.l.s8.bf16 %v1091_v5  ;;  %v1245_v43 = vunpack.c.l.s8.bf16 %v1093_v39 }
 0x59a   :  { %1517 = vmatprep.subr.bf16.mxu1 %v1423_v44  ;;  %1599 = vmatprep.subr.bf16.mxu0 %v1425_v20  ;;  %v1090_v44 = vld [vmem:[#allocation2 + $0xe0] sm:$0xff]  ;;  %v1092_v20 = vld [vmem:[#allocation2 + $0xf0] sm:$0xff] }
 0x59b   :  { %v1242_v10 = vunpack.c.l.s8.bf16 %v1090_v44  ;;  %v1244_v45 = vunpack.c.l.s8.bf16 %v1092_v20  ;;  %v1250_v50 = vunpack.c.h.s8.bf16 %v1090_v44  ;;  %v1252_v51 = vunpack.c.h.s8.bf16 %v1092_v20 }
 0x59d   :  { %1518 = vmatpush1.bf16.msra.mxu1 %v1422_v46  ;;  %1600 = vmatpush1.bf16.msra.mxu0 %v1424_v47  ;;  %v1251_v46 = vunpack.c.h.s8.bf16 %v1091_v5  ;;  %v1253_v47 = vunpack.c.h.s8.bf16 %v1093_v39 }
 0x59e   :  { %1519 = vmatprep.subr.bf16.mxu1 %v1431_v48  ;;  %1601 = vmatprep.subr.bf16.mxu0 %v1433_v49  ;;  %v1099_v48 = vld [vmem:[#allocation2 + $0x128] sm:$0xff]  ;;  %v1101_v49 = vld [vmem:[#allocation2 + $0x138] sm:$0xff] }
 0x5a1   :  { %1520 = vmatpush1.bf16.msra.mxu1 %v1430_v52  ;;  %1602 = vmatpush1.bf16.msra.mxu0 %v1432_v53  ;;  %v1259_v52 = vunpack.c.l.s8.bf16 %v1099_v48  ;;  %v1261_v53 = vunpack.c.l.s8.bf16 %v1101_v49 }
 0x5a2   :  { %1521 = vmatprep.subr.bf16.mxu1 %v1439_v54  ;;  %1603 = vmatprep.subr.bf16.mxu0 %v1441_v55  ;;  %v1098_v54 = vld [vmem:[#allocation2 + $0x120] sm:$0xff]  ;;  %v1100_v55 = vld [vmem:[#allocation2 + $0x130] sm:$0xff] }
 0x5a3   :  { %v1258_v56 = vunpack.c.l.s8.bf16 %v1098_v54  ;;  %v1260_v57 = vunpack.c.l.s8.bf16 %v1100_v55  ;;  %v1266_v0 = vunpack.c.h.s8.bf16 %v1098_v54  ;;  %v1268_v1 = vunpack.c.h.s8.bf16 %v1100_v55 }
 0x5a5   :  { %1522 = vmatpush1.bf16.msra.mxu1 %v1438_v58  ;;  %1604 = vmatpush1.bf16.msra.mxu0 %v1440_v61  ;;  %v1267_v58 = vunpack.c.h.s8.bf16 %v1099_v48  ;;  %v1269_v61 = vunpack.c.h.s8.bf16 %v1101_v49 }
 0x5a6   :  { %1614 = vmatprep.subr.bf16.mxu1 %v1195_v62  ;;  %1696 = vmatprep.subr.bf16.mxu0 %v1197_v63  ;;  %v1107_v62 = vld [vmem:[#allocation2 + $0x168] sm:$0xff]  ;;  %v1109_v63 = vld [vmem:[#allocation2 + $0x178] sm:$0xff] }
 0x5a8   :  { %1524 = vmatmul.mubr.bf16.vlgmr.msra.gmra.mrb[8].mxu1 %v4855_v2  ;;  %1606 = vmatmul.mubr.bf16.vlgmr.msra.gmra.mrb[12].mxu0 %v4855_v2 }
 0x5a9   :  { %1615 = vmatpush1.bf16.msra.mxu1 %v1194_v3  ;;  %1697 = vmatpush1.bf16.msra.mxu0 %v1196_v11  ;;  %v1275_v3 = vunpack.c.l.s8.bf16 %v1107_v62  ;;  %v1277_v11 = vunpack.c.l.s8.bf16 %v1109_v63 }
 0x5aa   :  { %1616 = vmatprep.subr.bf16.mxu1 %v1203_v12  ;;  %1698 = vmatprep.subr.bf16.mxu0 %v1205_v13  ;;  %v1106_v12 = vld [vmem:[#allocation2 + $0x160] sm:$0xff]  ;;  %v1108_v13 = vld [vmem:[#allocation2 + $0x170] sm:$0xff] }
 0x5ab   :  { %1646 = vmatprep.mubr.bf16.mxu1 %v4837_v59  ;;  %1728 = vmatprep.mubr.bf16.mxu0 %v4837_v59  ;;  %v1084_v59 = vld [vmem:[#allocation2 + $0xb0] sm:$0xff]  ;;  %v1274_v14 = vunpack.c.l.s8.bf16 %v1106_v12  ;;  %v1276_v15 = vunpack.c.l.s8.bf16 %v1108_v13  ;;  %v1282_v18 = vunpack.c.h.s8.bf16 %v1106_v12  ;;  %v1284_v22 = vunpack.c.h.s8.bf16 %v1108_v13 }
 0x5ac   :  { %v1228_v37 = vunpack.c.l.s8.bf16 %v1084_v59  ;;  %v1236_v41 = vunpack.c.h.s8.bf16 %v1084_v59 }
 0x5ad   :  { %1617 = vmatpush1.bf16.msra.mxu1 %v1202_v16  ;;  %1699 = vmatpush1.bf16.msra.mxu0 %v1204_v17  ;;  %v1283_v16 = vunpack.c.h.s8.bf16 %v1107_v62  ;;  %v1285_v17 = vunpack.c.h.s8.bf16 %v1109_v63 }
 0x5ae   :  { %1618 = vmatprep.subr.bf16.mxu1 %v1211_v4  ;;  %1700 = vmatprep.subr.bf16.mxu0 %v1213_v7  ;;  %v1115_v4 = vld [vmem:[#allocation2 + $0x1a8] sm:$0xff]  ;;  %v1117_v7 = vld [vmem:[#allocation2 + $0x1b8] sm:$0xff] }
 0x5b1   :  { %1619 = vmatpush1.bf16.msra.mxu1 %v1210_v24  ;;  %1701 = vmatpush1.bf16.msra.mxu0 %v1212_v25  ;;  %v1291_v24 = vunpack.c.l.s8.bf16 %v1115_v4  ;;  %v1293_v25 = vunpack.c.l.s8.bf16 %v1117_v7 }
 0x5b2   :  { %1620 = vmatprep.subr.bf16.mxu1 %v1219_v27  ;;  %1702 = vmatprep.subr.bf16.mxu0 %v1221_v28  ;;  %v1114_v27 = vld [vmem:[#allocation2 + $0x1a0] sm:$0xff]  ;;  %v1116_v28 = vld [vmem:[#allocation2 + $0x1b0] sm:$0xff] }
 0x5b3   :  { %v1290_v29 = vunpack.c.l.s8.bf16 %v1114_v27  ;;  %v1292_v30 = vunpack.c.l.s8.bf16 %v1116_v28  ;;  %v1298_v35 = vunpack.c.h.s8.bf16 %v1114_v27  ;;  %v1300_v59 = vunpack.c.h.s8.bf16 %v1116_v28 }
 0x5b5   :  { %1621 = vmatpush1.bf16.msra.mxu1 %v1218_v31  ;;  %1703 = vmatpush1.bf16.msra.mxu0 %v1220_v32  ;;  %v1299_v31 = vunpack.c.h.s8.bf16 %v1115_v4  ;;  %v1301_v32 = vunpack.c.h.s8.bf16 %v1117_v7 }
 0x5b6   :  { %1622 = vmatprep.subr.bf16.mxu1 %v1227_v19  ;;  %1704 = vmatprep.subr.bf16.mxu0 %v1229_v60  ;;  %v1123_v19 = vld [vmem:[#allocation2 + $0x1e8] sm:$0xff]  ;;  %v1125_v60 = vld [vmem:[#allocation2 + $0x1f8] sm:$0xff] }
 0x5b9   :  { %1623 = vmatpush1.bf16.msra.mxu1 %v1226_v36  ;;  %1705 = vmatpush1.bf16.msra.mxu0 %v1228_v37  ;;  %v1307_v36 = vunpack.c.l.s8.bf16 %v1123_v19  ;;  %v1309_v37 = vunpack.c.l.s8.bf16 %v1125_v60 }
 0x5ba   :  { %1624 = vmatprep.subr.bf16.mxu1 %v1235_v38  ;;  %1706 = vmatprep.subr.bf16.mxu0 %v1237_v34  ;;  %v1122_v38 = vld [vmem:[#allocation2 + $0x1e0] sm:$0xff]  ;;  %v1124_v34 = vld [vmem:[#allocation2 + $0x1f0] sm:$0xff] }
 0x5bb   :  { %v1306_v5 = vunpack.c.l.s8.bf16 %v1122_v38  ;;  %v1308_v39 = vunpack.c.l.s8.bf16 %v1124_v34  ;;  %v1314_v44 = vunpack.c.h.s8.bf16 %v1122_v38  ;;  %v1316_v20 = vunpack.c.h.s8.bf16 %v1124_v34 }
 0x5bd   :  { %1625 = vmatpush1.bf16.msra.mxu1 %v1234_v40  ;;  %1707 = vmatpush1.bf16.msra.mxu0 %v1236_v41  ;;  %v1315_v40 = vunpack.c.h.s8.bf16 %v1123_v19  ;;  %v1317_v41 = vunpack.c.h.s8.bf16 %v1125_v60 }
 0x5be   :  { %1626 = vmatprep.subr.bf16.mxu1 %v1243_v42  ;;  %1708 = vmatprep.subr.bf16.mxu0 %v1245_v43  ;;  %v1131_v42 = vld [vmem:[#allocation2 + $0x228] sm:$0xff]  ;;  %v1133_v43 = vld [vmem:[#allocation2 + $0x238] sm:$0xff] }
 0x5c1   :  { %1627 = vmatpush1.bf16.msra.mxu1 %v1242_v10  ;;  %1709 = vmatpush1.bf16.msra.mxu0 %v1244_v45  ;;  %v1323_v10 = vunpack.c.l.s8.bf16 %v1131_v42  ;;  %v1325_v45 = vunpack.c.l.s8.bf16 %v1133_v43 }
 0x5c2   :  { %1628 = vmatprep.subr.bf16.mxu1 %v1251_v46  ;;  %1710 = vmatprep.subr.bf16.mxu0 %v1253_v47  ;;  %v1130_v46 = vld [vmem:[#allocation2 + $0x220] sm:$0xff]  ;;  %v1132_v47 = vld [vmem:[#allocation2 + $0x230] sm:$0xff] }
 0x5c3   :  { %v1322_v48 = vunpack.c.l.s8.bf16 %v1130_v46  ;;  %v1324_v49 = vunpack.c.l.s8.bf16 %v1132_v47  ;;  %v1330_v54 = vunpack.c.h.s8.bf16 %v1130_v46  ;;  %v1332_v55 = vunpack.c.h.s8.bf16 %v1132_v47 }
 0x5c5   :  { %1629 = vmatpush1.bf16.msra.mxu1 %v1250_v50  ;;  %1711 = vmatpush1.bf16.msra.mxu0 %v1252_v51  ;;  %v1331_v50 = vunpack.c.h.s8.bf16 %v1131_v42  ;;  %v1333_v51 = vunpack.c.h.s8.bf16 %v1133_v43 }
 0x5c6   :  { %1630 = vmatprep.subr.bf16.mxu1 %v1259_v52  ;;  %1712 = vmatprep.subr.bf16.mxu0 %v1261_v53  ;;  %v1139_v52 = vld [vmem:[#allocation2 + $0x268] sm:$0xff]  ;;  %v1141_v53 = vld [vmem:[#allocation2 + $0x278] sm:$0xff] }
 0x5c9   :  { %1631 = vmatpush1.bf16.msra.mxu1 %v1258_v56  ;;  %1713 = vmatpush1.bf16.msra.mxu0 %v1260_v57  ;;  %v1339_v56 = vunpack.c.l.s8.bf16 %v1139_v52  ;;  %v1341_v57 = vunpack.c.l.s8.bf16 %v1141_v53 }
 0x5ca   :  { %1632 = vmatprep.subr.bf16.mxu1 %v1267_v58  ;;  %1714 = vmatprep.subr.bf16.mxu0 %v1269_v61  ;;  %v1138_v58 = vld [vmem:[#allocation2 + $0x260] sm:$0xff]  ;;  %v1140_v61 = vld [vmem:[#allocation2 + $0x270] sm:$0xff] }
 0x5cb   :  { %v1338_v62 = vunpack.c.l.s8.bf16 %v1138_v58  ;;  %v1340_v63 = vunpack.c.l.s8.bf16 %v1140_v61  ;;  %v1348_v12 = vunpack.c.h.s8.bf16 %v1140_v61 }
 0x5cd   :  { %1633 = vmatpush1.bf16.msra.mxu1 %v1266_v0  ;;  %1715 = vmatpush1.bf16.msra.mxu0 %v1268_v1  ;;  %v1349_v0 = vunpack.c.h.s8.bf16 %v1141_v53  ;;  %v1147_v1 = vld [vmem:[#allocation2 + $0x2a8] sm:$0xff] }
 0x5ce   :  { %1634 = vmatprep.subr.bf16.mxu1 %v1275_v3  ;;  %1716 = vmatprep.subr.bf16.mxu0 %v1277_v11  ;;  %v1149_v3 = vld [vmem:[#allocation2 + $0x2b8] sm:$0xff]  ;;  %v1346_v11 = vunpack.c.h.s8.bf16 %v1138_v58  ;;  %v1355_v13 = vunpack.c.l.s8.bf16 %v1147_v1  ;;  %v1363_v4 = vunpack.c.h.s8.bf16 %v1147_v1 }
 0x5cf   :  { %v1365_v7 = vunpack.c.h.s8.bf16 %v1149_v3 }
 0x5d1   :  { %1635 = vmatpush1.bf16.msra.mxu1 %v1274_v14  ;;  %1717 = vmatpush1.bf16.msra.mxu0 %v1276_v15  ;;  %v1357_v14 = vunpack.c.l.s8.bf16 %v1149_v3  ;;  %v1146_v15 = vld [vmem:[#allocation2 + $0x2a0] sm:$0xff] }
 0x5d2   :  { %1636 = vmatprep.subr.bf16.mxu1 %v1283_v16  ;;  %1718 = vmatprep.subr.bf16.mxu0 %v1285_v17  ;;  %v1354_v16 = vunpack.c.l.s8.bf16 %v1146_v15 }
 0x5d5   :  { %1637 = vmatpush1.bf16.msra.mxu1 %v1282_v18  ;;  %1719 = vmatpush1.bf16.msra.mxu0 %v1284_v22  ;;  %v1155_v18 = vld [vmem:[#allocation2 + $0x2e8] sm:$0xff]  ;;  %v1157_v22 = vld [vmem:[#allocation2 + $0x2f8] sm:$0xff] }
 0x5d6   :  { %1638 = vmatprep.subr.bf16.mxu1 %v1291_v24  ;;  %1720 = vmatprep.subr.bf16.mxu0 %v1293_v25  ;;  %v1362_v24 = vunpack.c.h.s8.bf16 %v1146_v15  ;;  %v1371_v27 = vunpack.c.l.s8.bf16 %v1155_v18  ;;  %v1373_v28 = vunpack.c.l.s8.bf16 %v1157_v22  ;;  %v1379_v19 = vunpack.c.h.s8.bf16 %v1155_v18 }
 0x5d7   :  { %v1381_v60 = vunpack.c.h.s8.bf16 %v1157_v22 }
 0x5d9   :  { %1639 = vmatpush1.bf16.msra.mxu1 %v1290_v29  ;;  %1721 = vmatpush1.bf16.msra.mxu0 %v1292_v30  ;;  %v1154_v29 = vld [vmem:[#allocation2 + $0x2e0] sm:$0xff]  ;;  %v1156_v30 = vld [vmem:[#allocation2 + $0x2f0] sm:$0xff] }
 0x5da   :  { %1640 = vmatprep.subr.bf16.mxu1 %v1299_v31  ;;  %1722 = vmatprep.subr.bf16.mxu0 %v1301_v32  ;;  %v1370_v31 = vunpack.c.l.s8.bf16 %v1154_v29  ;;  %v1372_v32 = vunpack.c.l.s8.bf16 %v1156_v30 }
 0x5dd   :  { %1641 = vmatpush1.bf16.msra.mxu1 %v1298_v35  ;;  %1723 = vmatpush1.bf16.msra.mxu0 %v1300_v59  ;;  %v1163_v35 = vld [vmem:[#allocation2 + $0x328] sm:$0xff]  ;;  %v1165_v59 = vld [vmem:[#allocation2 + $0x338] sm:$0xff] }
 0x5de   :  { %1642 = vmatprep.subr.bf16.mxu1 %v1307_v36  ;;  %1724 = vmatprep.subr.bf16.mxu0 %v1309_v37  ;;  %v1378_v36 = vunpack.c.h.s8.bf16 %v1154_v29  ;;  %v1380_v37 = vunpack.c.h.s8.bf16 %v1156_v30  ;;  %v1387_v38 = vunpack.c.l.s8.bf16 %v1163_v35  ;;  %v1389_v34 = vunpack.c.l.s8.bf16 %v1165_v59 }
 0x5df   :  { %v1395_v42 = vunpack.c.h.s8.bf16 %v1163_v35  ;;  %v1397_v43 = vunpack.c.h.s8.bf16 %v1165_v59 }
 0x5e1   :  { %1643 = vmatpush1.bf16.msra.mxu1 %v1306_v5  ;;  %1725 = vmatpush1.bf16.msra.mxu0 %v1308_v39  ;;  %v1162_v5 = vld [vmem:[#allocation2 + $0x320] sm:$0xff]  ;;  %v1164_v39 = vld [vmem:[#allocation2 + $0x330] sm:$0xff] }
 0x5e2   :  { %1644 = vmatprep.subr.bf16.mxu1 %v1315_v40  ;;  %1726 = vmatprep.subr.bf16.mxu0 %v1317_v41  ;;  %v1386_v40 = vunpack.c.l.s8.bf16 %v1162_v5  ;;  %v1388_v41 = vunpack.c.l.s8.bf16 %v1164_v39 }
 0x5e5   :  { %1645 = vmatpush1.bf16.msra.mxu1 %v1314_v44  ;;  %1727 = vmatpush1.bf16.msra.mxu0 %v1316_v20  ;;  %v1171_v44 = vld [vmem:[#allocation2 + $0x368] sm:$0xff]  ;;  %v1173_v20 = vld [vmem:[#allocation2 + $0x378] sm:$0xff] }
 0x5e6   :  { %1655 = vmatprep.subr.bf16.mxu1 %v1323_v10  ;;  %1737 = vmatprep.subr.bf16.mxu0 %v1325_v45  ;;  %v1394_v10 = vunpack.c.h.s8.bf16 %v1162_v5  ;;  %v1396_v45 = vunpack.c.h.s8.bf16 %v1164_v39  ;;  %v1403_v46 = vunpack.c.l.s8.bf16 %v1171_v44  ;;  %v1405_v47 = vunpack.c.l.s8.bf16 %v1173_v20 }
 0x5e7   :  { %v1413_v53 = vunpack.c.h.s8.bf16 %v1173_v20 }
 0x5e8   :  { %1647 = vmatmul.mubr.bf16.vlgmr.msra.gmra.mrb[12].mxu1 %v4843_v26  ;;  %1729 = vmatmul.mubr.bf16.vlgmr.msra.gmra.mrb[16].mxu0 %v4843_v26  ;;  %v1347_v26 = vunpack.c.h.s8.bf16 %v1139_v52  ;;  %v1411_v52 = vunpack.c.h.s8.bf16 %v1171_v44 }
 0x5e9   :  { %1656 = vmatpush1.bf16.msra.mxu1 %v1322_v48  ;;  %1738 = vmatpush1.bf16.msra.mxu0 %v1324_v49  ;;  %v1170_v48 = vld [vmem:[#allocation2 + $0x360] sm:$0xff]  ;;  %v1172_v49 = vld [vmem:[#allocation2 + $0x370] sm:$0xff] }
 0x5ea   :  { %1657 = vmatprep.subr.bf16.mxu1 %v1331_v50  ;;  %1739 = vmatprep.subr.bf16.mxu0 %v1333_v51  ;;  %v1402_v50 = vunpack.c.l.s8.bf16 %v1170_v48  ;;  %v1404_v51 = vunpack.c.l.s8.bf16 %v1172_v49 }
 0x5eb   :  { %1687 = vmatprep.mubr.bf16.mxu1 %v4847_v33  ;;  %1769 = vmatprep.mubr.bf16.mxu0 %v4847_v33  ;;  %v1148_v33 = vld [vmem:[#allocation2 + $0x2b0] sm:$0xff] }
 0x5ec   :  { %v1356_v17 = vunpack.c.l.s8.bf16 %v1148_v33  ;;  %v1364_v25 = vunpack.c.h.s8.bf16 %v1148_v33 }
 0x5ed   :  { %1658 = vmatpush1.bf16.msra.mxu1 %v1330_v54  ;;  %1740 = vmatpush1.bf16.msra.mxu0 %v1332_v55  ;;  %v1179_v54 = vld [vmem:[#allocation2 + $0x3a8] sm:$0xff]  ;;  %v1181_v55 = vld [vmem:[#allocation2 + $0x3b8] sm:$0xff] }
 0x5ee   :  { %1659 = vmatprep.subr.bf16.mxu1 %v1339_v56  ;;  %1741 = vmatprep.subr.bf16.mxu0 %v1341_v57  ;;  %v1410_v56 = vunpack.c.h.s8.bf16 %v1170_v48  ;;  %v1412_v57 = vunpack.c.h.s8.bf16 %v1172_v49  ;;  %v1419_v58 = vunpack.c.l.s8.bf16 %v1179_v54  ;;  %v1421_v61 = vunpack.c.l.s8.bf16 %v1181_v55 }
 0x5ef   :  { %v1427_v1 = vunpack.c.h.s8.bf16 %v1179_v54  ;;  %v1429_v3 = vunpack.c.h.s8.bf16 %v1181_v55 }
 0x5f1   :  { %1660 = vmatpush1.bf16.msra.mxu1 %v1338_v62  ;;  %1742 = vmatpush1.bf16.msra.mxu0 %v1340_v63  ;;  %v1178_v62 = vld [vmem:[#allocation2 + $0x3a0] sm:$0xff]  ;;  %v1180_v63 = vld [vmem:[#allocation2 + $0x3b0] sm:$0xff] }
 0x5f2   :  { %1661 = vmatprep.subr.bf16.mxu1 %v1347_v26  ;;  %1743 = vmatprep.subr.bf16.mxu0 %v1349_v0  ;;  %v1418_v26 = vunpack.c.l.s8.bf16 %v1178_v62  ;;  %v1420_v0 = vunpack.c.l.s8.bf16 %v1180_v63 }
 0x5f5   :  { %1662 = vmatpush1.bf16.msra.mxu1 %v1346_v11  ;;  %1744 = vmatpush1.bf16.msra.mxu0 %v1348_v12  ;;  %v1187_v11 = vld [vmem:[#allocation2 + $0x3e8] sm:$0xff]  ;;  %v1189_v12 = vld [vmem:[#allocation2 + $0x3f8] sm:$0xff] }
 0x5f6   :  { %1663 = vmatprep.subr.bf16.mxu1 %v1355_v13  ;;  %1745 = vmatprep.subr.bf16.mxu0 %v1357_v14  ;;  %v1426_v13 = vunpack.c.h.s8.bf16 %v1178_v62  ;;  %v1428_v14 = vunpack.c.h.s8.bf16 %v1180_v63  ;;  %v1435_v15 = vunpack.c.l.s8.bf16 %v1187_v11  ;;  %v1437_v33 = vunpack.c.l.s8.bf16 %v1189_v12 }
 0x5f7   :  { %v1443_v18 = vunpack.c.h.s8.bf16 %v1187_v11  ;;  %v1445_v22 = vunpack.c.h.s8.bf16 %v1189_v12 }
 0x5f9   :  { %1664 = vmatpush1.bf16.msra.mxu1 %v1354_v16  ;;  %1746 = vmatpush1.bf16.msra.mxu0 %v1356_v17  ;;  %v1186_v16 = vld [vmem:[#allocation2 + $0x3e0] sm:$0xff]  ;;  %v1188_v17 = vld [vmem:[#allocation2 + $0x3f0] sm:$0xff] }
 0x5fa   :  { %1665 = vmatprep.subr.bf16.mxu1 %v1363_v4  ;;  %1747 = vmatprep.subr.bf16.mxu0 %v1365_v7  ;;  %v1434_v4 = vunpack.c.l.s8.bf16 %v1186_v16  ;;  %v1436_v7 = vunpack.c.l.s8.bf16 %v1188_v17 }
 0x5fd   :  { %1666 = vmatpush1.bf16.msra.mxu1 %v1362_v24  ;;  %1748 = vmatpush1.bf16.msra.mxu0 %v1364_v25  ;;  %v1442_v24 = vunpack.c.h.s8.bf16 %v1186_v16  ;;  %v1444_v25 = vunpack.c.h.s8.bf16 %v1188_v17 }
 0x5fe   :  { %1667 = vmatprep.subr.bf16.mxu1 %v1371_v27  ;;  %1749 = vmatprep.subr.bf16.mxu0 %v1373_v28  ;;  %v4867_v27 = vld [vmem:[#allocation22] sm:$0xff]  ;;  %v4869_v28 = vld [vmem:[#allocation24] sm:$0xff] }
 0x5ff   :  { %v1783_v29 = vrot.slane %v4867_v27, %v4736_v8  ;;  %v1791_v30 = vrot.slane %v4867_v27, %v4810_v21  ;;  %v1837_v59 = vrot.slane %v4869_v28, %v4739_v9 }
 0x601   :  { %1668 = vmatpush1.bf16.msra.mxu1 %v1370_v31  ;;  %1750 = vmatpush1.bf16.msra.mxu0 %v1372_v32  ;;  %v1787_v31 = vrot.slane %v4867_v27, %v4739_v9  ;;  %v1795_v32 = vrot.slane %v4867_v27, %v4813_v23 }
 0x602   :  { %1669 = vmatprep.subr.bf16.mxu1 %v1379_v19  ;;  %1751 = vmatprep.subr.bf16.mxu0 %v1381_v60  ;;  %v1833_v19 = vrot.slane %v4869_v28, %v4736_v8 }
 0x605   :  { %1670 = vmatpush1.bf16.msra.mxu1 %v1378_v36  ;;  %1752 = vmatpush1.bf16.msra.mxu0 %v1380_v37  ;;  %v1845_v36 = vrot.slane %v4869_v28, %v4813_v23 }
 0x606   :  { %1671 = vmatprep.subr.bf16.mxu1 %v1387_v38  ;;  %1753 = vmatprep.subr.bf16.mxu0 %v1389_v34 }
 0x609   :  { %1672 = vmatpush1.bf16.msra.mxu1 %v1386_v40  ;;  %1754 = vmatpush1.bf16.msra.mxu0 %v1388_v41 }
 0x60a   :  { %1673 = vmatprep.subr.bf16.mxu1 %v1395_v42  ;;  %1755 = vmatprep.subr.bf16.mxu0 %v1397_v43 }
 0x60d   :  { %1674 = vmatpush1.bf16.msra.mxu1 %v1394_v10  ;;  %1756 = vmatpush1.bf16.msra.mxu0 %v1396_v45 }
 0x60e   :  { %1675 = vmatprep.subr.bf16.mxu1 %v1403_v46  ;;  %1757 = vmatprep.subr.bf16.mxu0 %v1405_v47 }
 0x611   :  { %1676 = vmatpush1.bf16.msra.mxu1 %v1402_v50  ;;  %1758 = vmatpush1.bf16.msra.mxu0 %v1404_v51 }
 0x612   :  { %1677 = vmatprep.subr.bf16.mxu1 %v1411_v52  ;;  %1759 = vmatprep.subr.bf16.mxu0 %v1413_v53 }
 0x615   :  { %1678 = vmatpush1.bf16.msra.mxu1 %v1410_v56  ;;  %1760 = vmatpush1.bf16.msra.mxu0 %v1412_v57 }
 0x616   :  { %1679 = vmatprep.subr.bf16.mxu1 %v1419_v58  ;;  %1761 = vmatprep.subr.bf16.mxu0 %v1421_v61 }
 0x619   :  { %1680 = vmatpush1.bf16.msra.mxu1 %v1418_v26  ;;  %1762 = vmatpush1.bf16.msra.mxu0 %v1420_v0 }
 0x61a   :  { %1681 = vmatprep.subr.bf16.mxu1 %v1427_v1  ;;  %1763 = vmatprep.subr.bf16.mxu0 %v1429_v3 }
 0x61d   :  { %1682 = vmatpush1.bf16.msra.mxu1 %v1426_v13  ;;  %1764 = vmatpush1.bf16.msra.mxu0 %v1428_v14 }
 0x61e   :  { %1683 = vmatprep.subr.bf16.mxu1 %v1435_v15  ;;  %1765 = vmatprep.subr.bf16.mxu0 %v1437_v33 }
 0x621   :  { %1684 = vmatpush1.bf16.msra.mxu1 %v1434_v4  ;;  %1766 = vmatpush1.bf16.msra.mxu0 %v1436_v7 }
 0x622   :  { %1685 = vmatprep.subr.bf16.mxu1 %v1443_v18  ;;  %1767 = vmatprep.subr.bf16.mxu0 %v1445_v22 }
 0x625   :  { %1686 = vmatpush1.bf16.msra.mxu1 %v1442_v24  ;;  %1768 = vmatpush1.bf16.msra.mxu0 %v1444_v25 }
 0x628   :  { %1688 = vmatmul.mubr.bf16.vlgmr.msra.gmra.mrb[12].mxu1 %v4855_v2  ;;  %1770 = vmatmul.mubr.bf16.vlgmr.msra.gmra.mrb[16].mxu0 %v4855_v2  ;;  %v1841_v2 = vrot.slane %v4869_v28, %v4810_v21 }
 0x67b   :  { %v1525_v60 = vpop.f32.mrb[8].mxu1  ;;  %v1607_v35 = vpop.f32.mrb[12].mxu0 }
 0x67c   :  { %v1820_v37 = vmul.f32 %v1783_v29, %v1525_v60  ;;  %v1822_v38 = vmul.f32 %v1791_v30, %v1607_v35  ;;  %v1527_v34 = vpop.f32.mrb[9].mxu1  ;;  %v1609_v5 = vpop.f32.mrb[13].mxu0 }
 0x67d   :  { %v1821_v39 = vmul.f32 %v1787_v31, %v1527_v34  ;;  %v1823_v40 = vmul.f32 %v1795_v32, %v1609_v5  ;;  %v1529_v41 = vpop.f32.mrb[10].mxu1  ;;  %v1611_v42 = vpop.f32.mrb[14].mxu0 }
 0x67e   :  { %v4887_v43 = vadd.f32 %v1833_v19, %v1820_v37  ;;  %v4889_v44 = vadd.f32 %v1841_v2, %v1822_v38  ;;  %v1530_v20 = vpop.f32.mrb[11].mxu1  ;;  %v1612_v10 = vpop.f32.mrb[15].mxu0 }
 0x67f   :  { %v4891_v45 = vadd.f32 %v1837_v59, %v1821_v39  ;;  %v4893_v46 = vadd.f32 %v1845_v36, %v1823_v40 }
 0x680   :  { %v1880_v47 = vrot.slane %v4887_v43, 4  ;;  %v1936_v48 = vmul.f32 %v4887_v43, %v4887_v43  ;;  %v1892_v49 = vrot.slane %v4889_v44, 4  ;;  %v1938_v50 = vmul.f32 %v4889_v44, %v4889_v44 }
 0x681   :  { %v1886_v51 = vrot.slane %v4891_v45, 4  ;;  %v1937_v52 = vmul.f32 %v4891_v45, %v4891_v45  ;;  %v1898_v53 = vrot.slane %v4893_v46, 4  ;;  %v1939_v54 = vmul.f32 %v4893_v46, %v4893_v46 }
 0x682   :  { %v1881_v55 = vadd.f32 %v1880_v47, %v4887_v43  ;;  %v1944_v56 = vrot.slane %v1936_v48, 4  ;;  %v1893_v57 = vadd.f32 %v1892_v49, %v4889_v44  ;;  %v1956_v58 = vrot.slane %v1938_v50, 4 }
 0x683   :  { %v1887_v61 = vadd.f32 %v1886_v51, %v4891_v45  ;;  %v1950_v62 = vrot.slane %v1937_v52, 4  ;;  %v1899_v63 = vadd.f32 %v1898_v53, %v4893_v46  ;;  %v1962_v26 = vrot.slane %v1939_v54, 4 }
 0x684   :  { %v1882_v0 = vrot.slane %v1881_v55, 2  ;;  %v1945_v1 = vadd.f32 %v1944_v56, %v1936_v48  ;;  %v1894_v3 = vrot.slane %v1893_v57, 2  ;;  %v1957_v11 = vadd.f32 %v1956_v58, %v1938_v50 }
 0x685   :  { %v1888_v12 = vrot.slane %v1887_v61, 2  ;;  %v1951_v13 = vadd.f32 %v1950_v62, %v1937_v52  ;;  %v1900_v14 = vrot.slane %v1899_v63, 2  ;;  %v1963_v15 = vadd.f32 %v1962_v26, %v1939_v54 }
 0x686   :  { %v1883_v33 = vadd.f32 %v1882_v0, %v1881_v55  ;;  %v1946_v16 = vrot.slane %v1945_v1, 2  ;;  %v1895_v17 = vadd.f32 %v1894_v3, %v1893_v57  ;;  %v1958_v4 = vrot.slane %v1957_v11, 2 }
 0x687   :  { %v1889_v7 = vadd.f32 %v1888_v12, %v1887_v61  ;;  %v1952_v18 = vrot.slane %v1951_v13, 2  ;;  %v1901_v22 = vadd.f32 %v1900_v14, %v1899_v63  ;;  %v1964_v24 = vrot.slane %v1963_v15, 2 }
 0x688   :  { %v1884_v25 = vrot.slane %v1883_v33, 1  ;;  %v1947_v29 = vadd.f32 %v1946_v16, %v1945_v1  ;;  %v1896_v30 = vrot.slane %v1895_v17, 1  ;;  %v1959_v31 = vadd.f32 %v1958_v4, %v1957_v11 }
 0x689   :  { %v1890_v32 = vrot.slane %v1889_v7, 1  ;;  %v1953_v19 = vadd.f32 %v1952_v18, %v1951_v13  ;;  %v1902_v2 = vrot.slane %v1901_v22, 1  ;;  %v1965_v60 = vadd.f32 %v1964_v24, %v1963_v15  ;;  %v4911_v15 = vld [vmem:[#allocation25] sm:$0xff] }
 0x68a   :  { %v1885_v35 = vadd.f32 %v1884_v25, %v1883_v33  ;;  %v1948_v59 = vrot.slane %v1947_v29, 1  ;;  %v1897_v36 = vadd.f32 %v1896_v30, %v1895_v17  ;;  %v1960_v37 = vrot.slane %v1959_v31, 1  ;;  %v4913_v33 = vld [vmem:[#allocation27] sm:$0xff] }
 0x68b   :  { %v1891_v38 = vadd.f32 %v1890_v32, %v1889_v7  ;;  %v1954_v34 = vrot.slane %v1953_v19, 1  ;;  %v1903_v5 = vadd.f32 %v1902_v2, %v1901_v22  ;;  %v1966_v39 = vrot.slane %v1965_v60, 1 }
 0x68c   :  { %v1928_v40 = vmul.f32 0.125, %v1885_v35  ;;  %v1949_v41 = vadd.f32 %v1948_v59, %v1947_v29  ;;  %v1930_v42 = vmul.f32 0.125, %v1897_v36  ;;  %v1961_v20 = vadd.f32 %v1960_v37, %v1959_v31 }
 0x68d   :  { %v1929_v10 = vmul.f32 0.125, %v1891_v38  ;;  %v1955_v47 = vadd.f32 %v1954_v34, %v1953_v19  ;;  %v1931_v48 = vmul.f32 0.125, %v1903_v5  ;;  %v1967_v49 = vadd.f32 %v1966_v39, %v1965_v60 }
 0x68e   :  { %v1992_v50 = vmul.f32 0.125, %v1949_v41  ;;  %v2000_v51 = vmul.f32 %v1928_v40, %v1928_v40  ;;  %v1994_v52 = vmul.f32 0.125, %v1961_v20  ;;  %v2002_v53 = vmul.f32 %v1930_v42, %v1930_v42 }
 0x68f   :  { %v1993_v54 = vmul.f32 0.125, %v1955_v47  ;;  %v2001_v55 = vmul.f32 %v1929_v10, %v1929_v10  ;;  %v1995_v57 = vmul.f32 0.125, %v1967_v49  ;;  %v2003_v58 = vmul.f32 %v1931_v48, %v1931_v48 }
 0x690   :  { %v2008_v56 = vsub.f32 %v1992_v50, %v2000_v51  ;;  %v2010_v61 = vsub.f32 %v1994_v52, %v2002_v53  ;;  %v2024_v16 = vsub.f32 %v4887_v43, %v1928_v40  ;;  %v2060_v17 = vrot.slane %v4911_v15, %v4736_v8 }
 0x691   :  { %v2009_v62 = vsub.f32 %v1993_v54, %v2001_v55  ;;  %v2011_v26 = vsub.f32 %v1995_v57, %v2003_v58  ;;  %v2026_v7 = vsub.f32 %v4889_v44, %v1930_v42  ;;  %v2068_v18 = vrot.slane %v4911_v15, %v4810_v21 }
 0x692   :  { %v2016_v63 = vmax.f32 %v2008_v56, 0.0  ;;  %v2018_v0 = vmax.f32 %v2010_v61, 0.0  ;;  %v2109_v25 = vrot.slane %v4913_v33, %v4736_v8  ;;  %v2025_v29 = vsub.f32 %v4891_v45, %v1929_v10 }
 0x693   :  { %v2017_v1 = vmax.f32 %v2009_v62, 0.0  ;;  %v2019_v11 = vmax.f32 %v2011_v26, 0.0  ;;  %v2064_v30 = vrot.slane %v4911_v15, %v4739_v9  ;;  %v2117_v32 = vrot.slane %v4913_v33, %v4810_v21 }
 0x694   :  { %v2032_v3 = vadd.f32 1e-05, %v2016_v63  ;;  %v2034_v12 = vadd.f32 1e-05, %v2018_v0  ;;  %v2027_v44 = vsub.f32 %v4893_v46, %v1931_v48  ;;  %v2072_v19 = vrot.slane %v4911_v15, %v4813_v23 }
 0x695   :  { %v2033_v13 = vadd.f32 1e-05, %v2017_v1  ;;  %v2035_v14 = vadd.f32 1e-05, %v2019_v11  ;;  %v2113_v59 = vrot.slane %v4913_v33, %v4739_v9  ;;  %v2121_v37 = vrot.slane %v4913_v33, %v4813_v23 }
 0x696   :  { %3867 = vrsqrt.f32 %v2032_v3  ;;  %v4944_v51 = vsub.s32 4, %v4733_v6  ;;  %v4947_v52 = vsub.s32 6, %v4733_v6  ;;  %v4950_v53 = vsub.s32 5, %v4733_v6 }
 0x697   :  { %3869 = vrsqrt.f32 %v2034_v12  ;;  %v4953_v54 = vsub.s32 7, %v4733_v6 }
 0x698   :  { %3871 = vrsqrt.f32 %v2033_v13  ;;  %v1799_v55 = vrot.slane %v4867_v27, %v4944_v51  ;;  %v1807_v56 = vrot.slane %v4867_v27, %v4947_v52  ;;  %v1803_v57 = vrot.slane %v4867_v27, %v4950_v53 }
 0x699   :  { %3873 = vrsqrt.f32 %v2035_v14  ;;  %v1811_v58 = vrot.slane %v4867_v27, %v4953_v54  ;;  %v1849_v61 = vrot.slane %v4869_v28, %v4944_v51  ;;  %v1857_v62 = vrot.slane %v4869_v28, %v4947_v52 }
 0x69a   :  { %v1853_v26 = vrot.slane %v4869_v28, %v4950_v53  ;;  %v1861_v0 = vrot.slane %v4869_v28, %v4953_v54 }
 0x6a0   :  { %v3868_v4 = vpop.eup %3867 }
 0x6a1   :  { %v3870_v22 = vpop.eup %3869  ;;  %v2048_v24 = vmul.f32 %v3868_v4, %v2024_v16 }
 0x6a2   :  { %v3872_v43 = vpop.eup %3871  ;;  %v2050_v31 = vmul.f32 %v3870_v22, %v2026_v7 }
 0x6a3   :  { %v3874_v2 = vpop.eup %3873  ;;  %v2097_v60 = vmul.f32 %v2060_v17, %v2048_v24  ;;  %v2049_v35 = vmul.f32 %v3872_v43, %v2025_v29 }
 0x6a4   :  { %v2099_v45 = vmul.f32 %v2068_v18, %v2050_v31  ;;  %v2051_v36 = vmul.f32 %v3874_v2, %v2027_v44 }
 0x6a5   :  { %v2146_v38 = vadd.f32 %v2109_v25, %v2097_v60  ;;  %v2098_v34 = vmul.f32 %v2064_v30, %v2049_v35 }
 0x6a6   :  { %v2148_v5 = vadd.f32 %v2117_v32, %v2099_v45  ;;  %v2100_v39 = vmul.f32 %v2072_v19, %v2051_v36 }
 0x6a7   :  { %v2154_v40 = vmul.f32 0.2, %v2146_v38  ;;  %v2147_v46 = vadd.f32 %v2113_v59, %v2098_v34 }
 0x6a8   :  { %v2156_v41 = vmul.f32 0.2, %v2148_v5  ;;  %v2149_v42 = vadd.f32 %v2121_v37, %v2100_v39 }
 0x6a9   :  { %v4935_v20 = vmax.f32 %v2146_v38, %v2154_v40  ;;  %v2155_v10 = vmul.f32 0.2, %v2147_v46 }
 0x6aa   :  { %v4937_v47 = vmax.f32 %v2148_v5, %v2156_v41  ;;  %v2157_v48 = vmul.f32 0.2, %v2149_v42 }
 0x6ab   :  { %v4939_v49 = vmax.f32 %v2147_v46, %v2155_v10 }
 0x6ac   :  { %v4941_v50 = vmax.f32 %v2149_v42, %v2157_v48 }
 0x6fb   :  { %v1689_v6 = vpop.f32.mrb[12].mxu1  ;;  %v1771_v63 = vpop.f32.mrb[16].mxu0 }
 0x6fc   :  { %v1824_v1 = vmul.f32 %v1799_v55, %v1689_v6  ;;  %v1826_v3 = vmul.f32 %v1807_v56, %v1771_v63  ;;  %v1691_v11 = vpop.f32.mrb[13].mxu1  ;;  %v1773_v12 = vpop.f32.mrb[17].mxu0 }
 0x6fd   :  { %v1825_v13 = vmul.f32 %v1803_v57, %v1691_v11  ;;  %v1827_v27 = vmul.f32 %v1811_v58, %v1773_v12  ;;  %v1693_v14 = vpop.f32.mrb[14].mxu1  ;;  %v1775_v16 = vpop.f32.mrb[18].mxu0 }
 0x6fe   :  { %v4971_v17 = vadd.f32 %v1849_v61, %v1824_v1  ;;  %v4973_v4 = vadd.f32 %v1857_v62, %v1826_v3  ;;  %v1694_v7 = vpop.f32.mrb[15].mxu1  ;;  %v1776_v18 = vpop.f32.mrb[19].mxu0 }
 0x6ff   :  { %v4975_v22 = vadd.f32 %v1853_v26, %v1825_v13  ;;  %v4977_v24 = vadd.f32 %v1861_v0, %v1827_v27 }
 0x700   :  { %v1904_v28 = vrot.slane %v4971_v17, 4  ;;  %v1940_v25 = vmul.f32 %v4971_v17, %v4971_v17  ;;  %v1916_v29 = vrot.slane %v4973_v4, 4  ;;  %v1942_v30 = vmul.f32 %v4973_v4, %v4973_v4 }
 0x701   :  { %v1910_v43 = vrot.slane %v4975_v22, 4  ;;  %v1941_v31 = vmul.f32 %v4975_v22, %v4975_v22  ;;  %v1922_v32 = vrot.slane %v4977_v24, 4  ;;  %v1943_v44 = vmul.f32 %v4977_v24, %v4977_v24 }
 0x702   :  { %v1905_v19 = vadd.f32 %v1904_v28, %v4971_v17  ;;  %v1968_v2 = vrot.slane %v1940_v25, 4  ;;  %v1917_v60 = vadd.f32 %v1916_v29, %v4973_v4  ;;  %v1980_v35 = vrot.slane %v1942_v30, 4 }
 0x703   :  { %v1911_v59 = vadd.f32 %v1910_v43, %v4975_v22  ;;  %v1974_v45 = vrot.slane %v1941_v31, 4  ;;  %v1923_v36 = vadd.f32 %v1922_v32, %v4977_v24  ;;  %v1986_v37 = vrot.slane %v1943_v44, 4 }
 0x704   :  { %v1906_v38 = vrot.slane %v1905_v19, 2  ;;  %v1969_v34 = vadd.f32 %v1968_v2, %v1940_v25  ;;  %v1918_v5 = vrot.slane %v1917_v60, 2  ;;  %v1981_v39 = vadd.f32 %v1980_v35, %v1942_v30 }
 0x705   :  { %v1912_v40 = vrot.slane %v1911_v59, 2  ;;  %v1975_v46 = vadd.f32 %v1974_v45, %v1941_v31  ;;  %v1924_v41 = vrot.slane %v1923_v36, 2  ;;  %v1987_v42 = vadd.f32 %v1986_v37, %v1943_v44 }
 0x706   :  { %v1907_v10 = vadd.f32 %v1906_v38, %v1905_v19  ;;  %v1970_v48 = vrot.slane %v1969_v34, 2  ;;  %v1919_v55 = vadd.f32 %v1918_v5, %v1917_v60  ;;  %v1982_v56 = vrot.slane %v1981_v39, 2 }
 0x707   :  { %v1913_v57 = vadd.f32 %v1912_v40, %v1911_v59  ;;  %v1976_v58 = vrot.slane %v1975_v46, 2  ;;  %v1925_v61 = vadd.f32 %v1924_v41, %v1923_v36  ;;  %v1988_v62 = vrot.slane %v1987_v42, 2 }
 0x708   :  { %v1908_v6 = vrot.slane %v1907_v10, 1  ;;  %v1971_v63 = vadd.f32 %v1970_v48, %v1969_v34  ;;  %v1920_v26 = vrot.slane %v1919_v55, 1  ;;  %v1983_v0 = vadd.f32 %v1982_v56, %v1981_v39 }
 0x709   :  { %v1914_v1 = vrot.slane %v1913_v57, 1  ;;  %v1977_v3 = vadd.f32 %v1976_v58, %v1975_v46  ;;  %v1926_v11 = vrot.slane %v1925_v61, 1  ;;  %v1989_v12 = vadd.f32 %v1988_v62, %v1987_v42 }
 0x70a   :  { %v1909_v13 = vadd.f32 %v1908_v6, %v1907_v10  ;;  %v1972_v27 = vrot.slane %v1971_v63, 1  ;;  %v1921_v14 = vadd.f32 %v1920_v26, %v1919_v55  ;;  %v1984_v16 = vrot.slane %v1983_v0, 1 }
 0x70b   :  { %v1915_v7 = vadd.f32 %v1914_v1, %v1913_v57  ;;  %v1978_v18 = vrot.slane %v1977_v3, 1  ;;  %v1927_v28 = vadd.f32 %v1926_v11, %v1925_v61  ;;  %v1990_v25 = vrot.slane %v1989_v12, 1 }
 0x70c   :  { %v1932_v29 = vmul.f32 0.125, %v1909_v13  ;;  %v1973_v30 = vadd.f32 %v1972_v27, %v1971_v63  ;;  %v1934_v43 = vmul.f32 0.125, %v1921_v14  ;;  %v1985_v31 = vadd.f32 %v1984_v16, %v1983_v0 }
 0x70d   :  { %v1933_v32 = vmul.f32 0.125, %v1915_v7  ;;  %v1979_v44 = vadd.f32 %v1978_v18, %v1977_v3  ;;  %v1935_v19 = vmul.f32 0.125, %v1927_v28  ;;  %v1991_v2 = vadd.f32 %v1990_v25, %v1989_v12 }
 0x70e   :  { %v1996_v60 = vmul.f32 0.125, %v1973_v30  ;;  %v2004_v35 = vmul.f32 %v1932_v29, %v1932_v29  ;;  %v1998_v59 = vmul.f32 0.125, %v1985_v31  ;;  %v2006_v45 = vmul.f32 %v1934_v43, %v1934_v43 }
 0x70f   :  { %v1997_v36 = vmul.f32 0.125, %v1979_v44  ;;  %v2005_v37 = vmul.f32 %v1933_v32, %v1933_v32  ;;  %v1999_v34 = vmul.f32 0.125, %v1991_v2  ;;  %v2007_v5 = vmul.f32 %v1935_v19, %v1935_v19 }
 0x710   :  { %v2012_v38 = vsub.f32 %v1996_v60, %v2004_v35  ;;  %v2014_v39 = vsub.f32 %v1998_v59, %v2006_v45  ;;  %v2028_v61 = vsub.f32 %v4971_v17, %v1932_v29  ;;  %v2076_v62 = vrot.slane %v4911_v15, %v4944_v51 }
 0x711   :  { %v2013_v40 = vsub.f32 %v1997_v36, %v2005_v37  ;;  %v2015_v41 = vsub.f32 %v1999_v34, %v2007_v5  ;;  %v2030_v63 = vsub.f32 %v4973_v4, %v1934_v43  ;;  %v2084_v26 = vrot.slane %v4911_v15, %v4947_v52 }
 0x712   :  { %v2020_v46 = vmax.f32 %v2012_v38, 0.0  ;;  %v2022_v42 = vmax.f32 %v2014_v39, 0.0  ;;  %v2125_v3 = vrot.slane %v4913_v33, %v4944_v51  ;;  %v2029_v11 = vsub.f32 %v4975_v22, %v1933_v32 }
 0x713   :  { %v2021_v10 = vmax.f32 %v2013_v40, 0.0  ;;  %v2023_v55 = vmax.f32 %v2015_v41, 0.0  ;;  %v2080_v12 = vrot.slane %v4911_v15, %v4950_v53  ;;  %v2133_v27 = vrot.slane %v4913_v33, %v4947_v52 }
 0x714   :  { %v2036_v48 = vadd.f32 1e-05, %v2020_v46  ;;  %v2038_v56 = vadd.f32 1e-05, %v2022_v42  ;;  %v2031_v4 = vsub.f32 %v4977_v24, %v1935_v19  ;;  %v2088_v14 = vrot.slane %v4911_v15, %v4953_v54 }
 0x715   :  { %v2037_v57 = vadd.f32 1e-05, %v2021_v10  ;;  %v2039_v58 = vadd.f32 1e-05, %v2023_v55  ;;  %v2129_v28 = vrot.slane %v4913_v33, %v4950_v53  ;;  %v2137_v29 = vrot.slane %v4913_v33, %v4953_v54 }
 0x716   :  { %3875 = vrsqrt.f32 %v2036_v48 }
 0x717   :  { %3877 = vrsqrt.f32 %v2038_v56 }
 0x718   :  { %3879 = vrsqrt.f32 %v2037_v57 }
 0x719   :  { %3881 = vrsqrt.f32 %v2039_v58 }
 0x720   :  { %v3876_v6 = vpop.eup %3875 }
 0x721   :  { %v3878_v0 = vpop.eup %3877  ;;  %v2052_v1 = vmul.f32 %v3876_v6, %v2028_v61 }
 0x722   :  { %v3880_v17 = vpop.eup %3879  ;;  %v2054_v13 = vmul.f32 %v3878_v0, %v2030_v63 }
 0x723   :  { %v3882_v16 = vpop.eup %3881  ;;  %v2101_v7 = vmul.f32 %v2076_v62, %v2052_v1  ;;  %v2053_v18 = vmul.f32 %v3880_v17, %v2029_v11 }
 0x724   :  { %v2103_v22 = vmul.f32 %v2084_v26, %v2054_v13  ;;  %v2055_v25 = vmul.f32 %v3882_v16, %v2031_v4 }
 0x725   :  { %v2150_v30 = vadd.f32 %v2125_v3, %v2101_v7  ;;  %v2102_v43 = vmul.f32 %v2080_v12, %v2053_v18 }
 0x726   :  { %v2152_v31 = vadd.f32 %v2133_v27, %v2103_v22  ;;  %v2104_v32 = vmul.f32 %v2088_v14, %v2055_v25 }
 0x727   :  { %v2158_v44 = vmul.f32 0.2, %v2150_v30  ;;  %v2151_v24 = vadd.f32 %v2129_v28, %v2102_v43 }
 0x728   :  { %v2160_v19 = vmul.f32 0.2, %v2152_v31  ;;  %v2153_v2 = vadd.f32 %v2137_v29, %v2104_v32 }
 0x729   :  { %v5015_v15 = vmax.f32 %v2150_v30, %v2158_v44  ;;  %v2159_v60 = vmul.f32 0.2, %v2151_v24 }
 0x72a   :  { %v5017_v35 = vmax.f32 %v2152_v31, %v2160_v19  ;;  %v2161_v59 = vmul.f32 0.2, %v2153_v2 }
 0x72b   :  { %v5019_v45 = vmax.f32 %v2151_v24, %v2159_v60 }
 0x72c   :  { %v5021_v36 = vmax.f32 %v2153_v2, %v2161_v59 }
 0x72d   :  { %4335 = dma.done.wait [#allocation4 + $0x1], 28672 }
 0x72e   :  { %4336 = vsyncadd [#allocation4 + $0x1], 4294938624  ;;  %v5025_v33 = vpack.c.bf16 %v4939_v49, %v4939_v49  ;;  %v2175_v54 = vld [vmem:[#allocation3 + $0x8] sm:$0xff]  ;;  %v2177_v37 = vld [vmem:[#allocation3 + $0x18] sm:$0xff]  ;;  %s5194_s16 = sld [smem:[#allocation58_spill]] }
 0x72f   :  { %v2174_v38 = vld [vmem:[#allocation3] sm:$0xff]  ;;  %v2399_v34 = vunpack.c.l.s8.bf16 %v2175_v54  ;;  %v2406_v5 = vunpack.c.h.s8.bf16 %v2175_v54  ;;  %v2401_v39 = vunpack.c.l.s8.bf16 %v2177_v37  ;;  %v2408_v40 = vunpack.c.h.s8.bf16 %v2177_v37  ;;  %v2176_v46 = vld [vmem:[#allocation3 + $0x10] sm:$0xff]  ;;  %v2181_v58 = vld [vmem:[#allocation3 + $0x38] sm:$0xff] }
 0x730   :  { %2886 = vmatprep.mubr.bf16.mxu1 %v5025_v33  ;;  %3050 = vmatprep.mubr.bf16.mxu0 %v5025_v33  ;;  %v2398_v41 = vunpack.c.l.s8.bf16 %v2174_v38  ;;  %v2400_v42 = vunpack.c.l.s8.bf16 %v2176_v46  ;;  %v2182_v10 = vld [vmem:[#allocation3 + $0x40] sm:$0xff]  ;;  %v2184_v48 = vld [vmem:[#allocation3 + $0x50] sm:$0xff]  ;;  %v2405_v49 = vunpack.c.h.s8.bf16 %v2174_v38  ;;  %v2407_v55 = vunpack.c.h.s8.bf16 %v2176_v46  ;;  %v2183_v61 = vld [vmem:[#allocation3 + $0x48] sm:$0xff] }
 0x731   :  { %2854 = vmatprep.subr.bf16.mxu1 %v2399_v34  ;;  %3018 = vmatprep.subr.bf16.mxu0 %v2401_v39  ;;  %v2413_v56 = vunpack.c.l.s8.bf16 %v2182_v10  ;;  %v2415_v57 = vunpack.c.l.s8.bf16 %v2184_v48  ;;  %v2412_v62 = vunpack.c.l.s8.bf16 %v2181_v58  ;;  %v2414_v6 = vunpack.c.l.s8.bf16 %v2183_v61  ;;  %v2189_v0 = vld [vmem:[#allocation3 + $0x78] sm:$0xff]  ;;  %v2191_v1 = vld [vmem:[#allocation3 + $0x88] sm:$0xff]  ;;  %v2188_v13 = vld [vmem:[#allocation3 + $0x70] sm:$0xff] }
 0x732   :  { %2855 = vmatpush1.bf16.msra.mxu1 %v2398_v41  ;;  %3019 = vmatpush1.bf16.msra.mxu0 %v2400_v42  ;;  %v2420_v63 = vunpack.c.h.s8.bf16 %v2182_v10  ;;  %v2422_v26 = vunpack.c.h.s8.bf16 %v2184_v48  ;;  %v2419_v3 = vunpack.c.h.s8.bf16 %v2181_v58  ;;  %v2421_v11 = vunpack.c.h.s8.bf16 %v2183_v61  ;;  %v2190_v27 = vld [vmem:[#allocation3 + $0x80] sm:$0xff]  ;;  %v2196_v18 = vld [vmem:[#allocation3 + $0xb0] sm:$0xff]  ;;  %v2195_v43 = vld [vmem:[#allocation3 + $0xa8] sm:$0xff] }
 0x733   :  { %2856 = vmatprep.subr.bf16.mxu1 %v2406_v5  ;;  %3020 = vmatprep.subr.bf16.mxu0 %v2408_v40  ;;  %v2427_v12 = vunpack.c.l.s8.bf16 %v2189_v0  ;;  %v2429_v17 = vunpack.c.l.s8.bf16 %v2191_v1  ;;  %v2426_v4 = vunpack.c.l.s8.bf16 %v2188_v13  ;;  %v2428_v14 = vunpack.c.l.s8.bf16 %v2190_v27  ;;  %v2198_v28 = vld [vmem:[#allocation3 + $0xc0] sm:$0xff]  ;;  %v2197_v31 = vld [vmem:[#allocation3 + $0xb8] sm:$0xff]  ;;  %v2203_v2 = vld [vmem:[#allocation3 + $0xe8] sm:$0xff] }
 0x734   :  { %v2434_v16 = vunpack.c.h.s8.bf16 %v2189_v0  ;;  %v2436_v7 = vunpack.c.h.s8.bf16 %v2191_v1  ;;  %v2433_v22 = vunpack.c.h.s8.bf16 %v2188_v13  ;;  %v2435_v25 = vunpack.c.h.s8.bf16 %v2190_v27  ;;  %v2205_v60 = vld [vmem:[#allocation3 + $0xf8] sm:$0xff]  ;;  %v2202_v34 = vld [vmem:[#allocation3 + $0xe0] sm:$0xff]  ;;  %v2204_v5 = vld [vmem:[#allocation3 + $0xf0] sm:$0xff] }
 0x735   :  { %v2441_v29 = vunpack.c.l.s8.bf16 %v2196_v18  ;;  %v2443_v30 = vunpack.c.l.s8.bf16 %v2198_v28  ;;  %v2440_v32 = vunpack.c.l.s8.bf16 %v2195_v43  ;;  %v2442_v44 = vunpack.c.l.s8.bf16 %v2197_v31  ;;  %v2210_v42 = vld [vmem:[#allocation3 + $0x120] sm:$0xff]  ;;  %v2212_v10 = vld [vmem:[#allocation3 + $0x130] sm:$0xff]  ;;  %v2211_v58 = vld [vmem:[#allocation3 + $0x128] sm:$0xff] }
 0x736   :  { %2857 = vmatpush1.bf16.msra.mxu1 %v2405_v49  ;;  %3021 = vmatpush1.bf16.msra.mxu0 %v2407_v55  ;;  %v2448_v24 = vunpack.c.h.s8.bf16 %v2196_v18  ;;  %v2450_v19 = vunpack.c.h.s8.bf16 %v2198_v28  ;;  %v2447_v59 = vunpack.c.h.s8.bf16 %v2195_v43  ;;  %v2449_v54 = vunpack.c.h.s8.bf16 %v2197_v31  ;;  %v2219_v0 = vld [vmem:[#allocation3 + $0x168] sm:$0xff]  ;;  %v2218_v13 = vld [vmem:[#allocation3 + $0x160] sm:$0xff]  ;;  %v2225_v43 = vld [vmem:[#allocation3 + $0x198] sm:$0xff] }
 0x737   :  { %2858 = vmatprep.subr.bf16.mxu1 %v2413_v56  ;;  %3022 = vmatprep.subr.bf16.mxu0 %v2415_v57  ;;  %v2455_v37 = vunpack.c.l.s8.bf16 %v2203_v2  ;;  %v2457_v38 = vunpack.c.l.s8.bf16 %v2205_v60  ;;  %v2454_v39 = vunpack.c.l.s8.bf16 %v2202_v34  ;;  %v2456_v40 = vunpack.c.l.s8.bf16 %v2204_v5  ;;  %v2209_v57 = vld [vmem:[#allocation3 + $0x118] sm:$0xff]  ;;  %v2226_v18 = vld [vmem:[#allocation3 + $0x1a0] sm:$0xff] }
 0x738   :  { %v2462_v46 = vunpack.c.h.s8.bf16 %v2203_v2  ;;  %v2464_v41 = vunpack.c.h.s8.bf16 %v2205_v60  ;;  %v2461_v48 = vunpack.c.h.s8.bf16 %v2202_v34  ;;  %v2463_v49 = vunpack.c.h.s8.bf16 %v2204_v5  ;;  %v2233_v2 = vld [vmem:[#allocation3 + $0x1d8] sm:$0xff]  ;;  %v2232_v34 = vld [vmem:[#allocation3 + $0x1d0] sm:$0xff] }
 0x739   :  { %v2469_v55 = vunpack.c.l.s8.bf16 %v2210_v42  ;;  %v2471_v56 = vunpack.c.l.s8.bf16 %v2212_v10  ;;  %v2468_v61 = vunpack.c.l.s8.bf16 %v2209_v57  ;;  %v2475_v1 = vunpack.c.h.s8.bf16 %v2209_v57  ;;  %v2237_v57 = vld [vmem:[#allocation3 + $0x1f8] sm:$0xff] }
 0x73a   :  { %2859 = vmatpush1.bf16.msra.mxu1 %v2412_v62  ;;  %3023 = vmatpush1.bf16.msra.mxu0 %v2414_v6  ;;  %v2470_v62 = vunpack.c.l.s8.bf16 %v2211_v58  ;;  %v2476_v6 = vunpack.c.h.s8.bf16 %v2210_v42  ;;  %v5031_v5 = vpack.c.bf16 %v4935_v20, %v4935_v20  ;;  %v2238_v42 = vld [vmem:[#allocation3 + $0x200] sm:$0xff] }
 0x73b   :  { %2860 = vmatprep.subr.bf16.mxu1 %v2420_v63  ;;  %3024 = vmatprep.subr.bf16.mxu0 %v2422_v26  ;;  %v2478_v63 = vunpack.c.h.s8.bf16 %v2212_v10  ;;  %v2217_v26 = vld [vmem:[#allocation3 + $0x158] sm:$0xff]  ;;  %v2240_v10 = vld [vmem:[#allocation3 + $0x210] sm:$0xff] }
 0x73e   :  { %2861 = vmatpush1.bf16.msra.mxu1 %v2419_v3  ;;  %3025 = vmatpush1.bf16.msra.mxu0 %v2421_v11  ;;  %v2477_v3 = vunpack.c.h.s8.bf16 %v2211_v58  ;;  %v2483_v11 = vunpack.c.l.s8.bf16 %v2217_v26  ;;  %v2239_v58 = vld [vmem:[#allocation3 + $0x208] sm:$0xff] }
 0x73f   :  { %2862 = vmatprep.subr.bf16.mxu1 %v2427_v12  ;;  %3026 = vmatprep.subr.bf16.mxu0 %v2429_v17  ;;  %v2485_v12 = vunpack.c.l.s8.bf16 %v2219_v0  ;;  %v2216_v17 = vld [vmem:[#allocation3 + $0x150] sm:$0xff] }
 0x740   :  { %v2482_v27 = vunpack.c.l.s8.bf16 %v2216_v17  ;;  %v2489_v28 = vunpack.c.h.s8.bf16 %v2216_v17  ;;  %v2246_v17 = vld [vmem:[#allocation3 + $0x240] sm:$0xff] }
 0x742   :  { %2863 = vmatpush1.bf16.msra.mxu1 %v2426_v4  ;;  %3027 = vmatpush1.bf16.msra.mxu0 %v2428_v14  ;;  %v2484_v4 = vunpack.c.l.s8.bf16 %v2218_v13  ;;  %v2490_v14 = vunpack.c.h.s8.bf16 %v2217_v26  ;;  %v2247_v26 = vld [vmem:[#allocation3 + $0x248] sm:$0xff] }
 0x743   :  { %2864 = vmatprep.subr.bf16.mxu1 %v2434_v16  ;;  %3028 = vmatprep.subr.bf16.mxu0 %v2436_v7  ;;  %v2492_v16 = vunpack.c.h.s8.bf16 %v2219_v0  ;;  %v2224_v7 = vld [vmem:[#allocation3 + $0x190] sm:$0xff]  ;;  %v2531_v0 = vunpack.c.h.s8.bf16 %v2237_v57 }
 0x746   :  { %2865 = vmatpush1.bf16.msra.mxu1 %v2433_v22  ;;  %3029 = vmatpush1.bf16.msra.mxu0 %v2435_v25  ;;  %v2491_v22 = vunpack.c.h.s8.bf16 %v2218_v13  ;;  %v2497_v25 = vunpack.c.l.s8.bf16 %v2224_v7 }
 0x747   :  { %2866 = vmatprep.subr.bf16.mxu1 %v2441_v29  ;;  %3030 = vmatprep.subr.bf16.mxu0 %v2443_v30  ;;  %v2499_v29 = vunpack.c.l.s8.bf16 %v2226_v18  ;;  %v2223_v30 = vld [vmem:[#allocation3 + $0x188] sm:$0xff] }
 0x748   :  { %v2496_v31 = vunpack.c.l.s8.bf16 %v2223_v30  ;;  %v2503_v60 = vunpack.c.h.s8.bf16 %v2223_v30  ;;  %v2253_v30 = vld [vmem:[#allocation3 + $0x278] sm:$0xff] }
 0x74a   :  { %2867 = vmatpush1.bf16.msra.mxu1 %v2440_v32  ;;  %3031 = vmatpush1.bf16.msra.mxu0 %v2442_v44  ;;  %v2498_v32 = vunpack.c.l.s8.bf16 %v2225_v43  ;;  %v2504_v44 = vunpack.c.h.s8.bf16 %v2224_v7  ;;  %v2254_v7 = vld [vmem:[#allocation3 + $0x280] sm:$0xff] }
 0x74b   :  { %2868 = vmatprep.subr.bf16.mxu1 %v2448_v24  ;;  %3032 = vmatprep.subr.bf16.mxu0 %v2450_v19  ;;  %v2506_v24 = vunpack.c.h.s8.bf16 %v2226_v18  ;;  %v2231_v19 = vld [vmem:[#allocation3 + $0x1c8] sm:$0xff] }
 0x74e   :  { %2869 = vmatpush1.bf16.msra.mxu1 %v2447_v59  ;;  %3033 = vmatpush1.bf16.msra.mxu0 %v2449_v54  ;;  %v2505_v59 = vunpack.c.h.s8.bf16 %v2225_v43  ;;  %v2511_v54 = vunpack.c.l.s8.bf16 %v2231_v19 }
 0x74f   :  { %2870 = vmatprep.subr.bf16.mxu1 %v2455_v37  ;;  %3034 = vmatprep.subr.bf16.mxu0 %v2457_v38  ;;  %v2513_v37 = vunpack.c.l.s8.bf16 %v2233_v2  ;;  %v2230_v38 = vld [vmem:[#allocation3 + $0x1c0] sm:$0xff] }
 0x750   :  { %v2517_v20 = vunpack.c.h.s8.bf16 %v2230_v38 }
 0x752   :  { %2871 = vmatpush1.bf16.msra.mxu1 %v2454_v39  ;;  %3035 = vmatpush1.bf16.msra.mxu0 %v2456_v40  ;;  %v2510_v39 = vunpack.c.l.s8.bf16 %v2230_v38  ;;  %v2512_v40 = vunpack.c.l.s8.bf16 %v2232_v34  ;;  %v2260_v38 = vld [vmem:[#allocation3 + $0x2b0] sm:$0xff] }
 0x753   :  { %2872 = vmatprep.subr.bf16.mxu1 %v2462_v46  ;;  %3036 = vmatprep.subr.bf16.mxu0 %v2464_v41  ;;  %v2518_v46 = vunpack.c.h.s8.bf16 %v2231_v19  ;;  %v2520_v41 = vunpack.c.h.s8.bf16 %v2233_v2  ;;  %v2261_v19 = vld [vmem:[#allocation3 + $0x2b8] sm:$0xff] }
 0x756   :  { %2873 = vmatpush1.bf16.msra.mxu1 %v2461_v48  ;;  %3037 = vmatpush1.bf16.msra.mxu0 %v2463_v49  ;;  %v5035_v48 = vpack.c.bf16 %v4941_v50, %v4941_v50  ;;  %v2519_v49 = vunpack.c.h.s8.bf16 %v2232_v34  ;;  %v2524_v50 = vunpack.c.l.s8.bf16 %v2237_v57  ;;  %v2267_v57 = vld [vmem:[#allocation3 + $0x2e8] sm:$0xff] }
 0x757   :  { %2874 = vmatprep.subr.bf16.mxu1 %v2469_v55  ;;  %3038 = vmatprep.subr.bf16.mxu0 %v2471_v56  ;;  %v2525_v55 = vunpack.c.l.s8.bf16 %v2238_v42  ;;  %v2527_v56 = vunpack.c.l.s8.bf16 %v2240_v10 }
 0x75a   :  { %2875 = vmatpush1.bf16.msra.mxu1 %v2468_v61  ;;  %3039 = vmatpush1.bf16.msra.mxu0 %v2470_v62  ;;  %v2526_v61 = vunpack.c.l.s8.bf16 %v2239_v58  ;;  %v2532_v62 = vunpack.c.h.s8.bf16 %v2238_v42  ;;  %v2268_v42 = vld [vmem:[#allocation3 + $0x2f0] sm:$0xff] }
 0x75b   :  { %2876 = vmatprep.subr.bf16.mxu1 %v2476_v6  ;;  %3040 = vmatprep.subr.bf16.mxu0 %v2478_v63  ;;  %v2534_v6 = vunpack.c.h.s8.bf16 %v2240_v10  ;;  %v2245_v63 = vld [vmem:[#allocation3 + $0x238] sm:$0xff] }
 0x75e   :  { %2877 = vmatpush1.bf16.msra.mxu1 %v2475_v1  ;;  %3041 = vmatpush1.bf16.msra.mxu0 %v2477_v3  ;;  %v2533_v1 = vunpack.c.h.s8.bf16 %v2239_v58  ;;  %v2539_v3 = vunpack.c.l.s8.bf16 %v2245_v63 }
 0x75f   :  { %2878 = vmatprep.subr.bf16.mxu1 %v2483_v11  ;;  %3042 = vmatprep.subr.bf16.mxu0 %v2485_v12  ;;  %v2541_v11 = vunpack.c.l.s8.bf16 %v2247_v26  ;;  %v2244_v12 = vld [vmem:[#allocation3 + $0x230] sm:$0xff] }
 0x760   :  { %v2538_v13 = vunpack.c.l.s8.bf16 %v2244_v12  ;;  %v2545_v18 = vunpack.c.h.s8.bf16 %v2244_v12  ;;  %v2274_v12 = vld [vmem:[#allocation3 + $0x320] sm:$0xff] }
 0x762   :  { %2879 = vmatpush1.bf16.msra.mxu1 %v2482_v27  ;;  %3043 = vmatpush1.bf16.msra.mxu0 %v2484_v4  ;;  %v2540_v27 = vunpack.c.l.s8.bf16 %v2246_v17  ;;  %v2546_v4 = vunpack.c.h.s8.bf16 %v2245_v63  ;;  %v2275_v63 = vld [vmem:[#allocation3 + $0x328] sm:$0xff] }
 0x763   :  { %2880 = vmatprep.subr.bf16.mxu1 %v2490_v14  ;;  %3044 = vmatprep.subr.bf16.mxu0 %v2492_v16  ;;  %v2548_v14 = vunpack.c.h.s8.bf16 %v2247_v26  ;;  %v2252_v16 = vld [vmem:[#allocation3 + $0x270] sm:$0xff] }
 0x766   :  { %2881 = vmatpush1.bf16.msra.mxu1 %v2489_v28  ;;  %3045 = vmatpush1.bf16.msra.mxu0 %v2491_v22  ;;  %v2547_v28 = vunpack.c.h.s8.bf16 %v2246_v17  ;;  %v2553_v22 = vunpack.c.l.s8.bf16 %v2252_v16 }
 0x767   :  { %2882 = vmatprep.subr.bf16.mxu1 %v2497_v25  ;;  %3046 = vmatprep.subr.bf16.mxu0 %v2499_v29  ;;  %v2555_v25 = vunpack.c.l.s8.bf16 %v2254_v7  ;;  %v2251_v29 = vld [vmem:[#allocation3 + $0x268] sm:$0xff] }
 0x768   :  { %v2552_v43 = vunpack.c.l.s8.bf16 %v2251_v29  ;;  %v2559_v2 = vunpack.c.h.s8.bf16 %v2251_v29  ;;  %v2281_v29 = vld [vmem:[#allocation3 + $0x358] sm:$0xff] }
 0x76a   :  { %2883 = vmatpush1.bf16.msra.mxu1 %v2496_v31  ;;  %3047 = vmatpush1.bf16.msra.mxu0 %v2498_v32  ;;  %v2554_v31 = vunpack.c.l.s8.bf16 %v2253_v30  ;;  %v2560_v32 = vunpack.c.h.s8.bf16 %v2252_v16  ;;  %v2282_v16 = vld [vmem:[#allocation3 + $0x360] sm:$0xff] }
 0x76b   :  { %2884 = vmatprep.subr.bf16.mxu1 %v2504_v44  ;;  %3048 = vmatprep.subr.bf16.mxu0 %v2506_v24  ;;  %v2562_v44 = vunpack.c.h.s8.bf16 %v2254_v7  ;;  %v2259_v24 = vld [vmem:[#allocation3 + $0x2a8] sm:$0xff] }
 0x76e   :  { %2885 = vmatpush1.bf16.msra.mxu1 %v2503_v60  ;;  %3049 = vmatpush1.bf16.msra.mxu0 %v2505_v59  ;;  %v2561_v60 = vunpack.c.h.s8.bf16 %v2253_v30  ;;  %v2567_v59 = vunpack.c.l.s8.bf16 %v2259_v24 }
 0x76f   :  { %2895 = vmatprep.subr.bf16.mxu1 %v2511_v54  ;;  %3059 = vmatprep.subr.bf16.mxu0 %v2513_v37  ;;  %v2569_v54 = vunpack.c.l.s8.bf16 %v2261_v19  ;;  %v2258_v37 = vld [vmem:[#allocation3 + $0x2a0] sm:$0xff] }
 0x770   :  { %v2566_v34 = vunpack.c.l.s8.bf16 %v2258_v37  ;;  %v2573_v10 = vunpack.c.h.s8.bf16 %v2258_v37  ;;  %v2288_v37 = vld [vmem:[#allocation3 + $0x390] sm:$0xff] }
 0x771   :  { %2887 = vmatmul.mubr.bf16.vlgmr.msra.gmra.mrb[16].mxu1 %v5031_v5  ;;  %3051 = vmatmul.mubr.bf16.vlgmr.msra.gmra.mrb[20].mxu0 %v5031_v5 }
 0x772   :  { %2896 = vmatpush1.bf16.msra.mxu1 %v2510_v39  ;;  %3060 = vmatpush1.bf16.msra.mxu0 %v2512_v40  ;;  %v2568_v39 = vunpack.c.l.s8.bf16 %v2260_v38  ;;  %v2574_v40 = vunpack.c.h.s8.bf16 %v2259_v24  ;;  %v2289_v24 = vld [vmem:[#allocation3 + $0x398] sm:$0xff] }
 0x773   :  { %2897 = vmatprep.subr.bf16.mxu1 %v2518_v46  ;;  %3061 = vmatprep.subr.bf16.mxu0 %v2520_v41  ;;  %v2576_v46 = vunpack.c.h.s8.bf16 %v2261_v19  ;;  %v2266_v41 = vld [vmem:[#allocation3 + $0x2e0] sm:$0xff] }
 0x774   :  { %2927 = vmatprep.mubr.bf16.mxu1 %v5035_v48  ;;  %3091 = vmatprep.mubr.bf16.mxu0 %v5035_v48 }
 0x776   :  { %2898 = vmatpush1.bf16.msra.mxu1 %v2517_v20  ;;  %3062 = vmatpush1.bf16.msra.mxu0 %v2519_v49  ;;  %v2575_v20 = vunpack.c.h.s8.bf16 %v2260_v38  ;;  %v2581_v49 = vunpack.c.l.s8.bf16 %v2266_v41  ;;  %v5043_v38 = vpack.c.bf16 %v4937_v47, %v4937_v47 }
 0x777   :  { %2899 = vmatprep.subr.bf16.mxu1 %v2525_v55  ;;  %3063 = vmatprep.subr.bf16.mxu0 %v2527_v56  ;;  %v2583_v55 = vunpack.c.l.s8.bf16 %v2268_v42  ;;  %v2265_v56 = vld [vmem:[#allocation3 + $0x2d8] sm:$0xff] }
 0x778   :  { %v2580_v58 = vunpack.c.l.s8.bf16 %v2265_v56  ;;  %v2587_v26 = vunpack.c.h.s8.bf16 %v2265_v56  ;;  %v2293_v56 = vld [vmem:[#allocation3 + $0x3b8] sm:$0xff] }
 0x77a   :  { %2900 = vmatpush1.bf16.msra.mxu1 %v2524_v50  ;;  %3064 = vmatpush1.bf16.msra.mxu0 %v2526_v61  ;;  %v2582_v50 = vunpack.c.l.s8.bf16 %v2267_v57  ;;  %v2588_v61 = vunpack.c.h.s8.bf16 %v2266_v41  ;;  %v2294_v41 = vld [vmem:[#allocation3 + $0x3c0] sm:$0xff] }
 0x77b   :  { %2901 = vmatprep.subr.bf16.mxu1 %v2532_v62  ;;  %3065 = vmatprep.subr.bf16.mxu0 %v2534_v6  ;;  %v2590_v62 = vunpack.c.h.s8.bf16 %v2268_v42  ;;  %v2273_v6 = vld [vmem:[#allocation3 + $0x318] sm:$0xff]  ;;  %v2296_v42 = vld [vmem:[#allocation3 + $0x3d0] sm:$0xff] }
 0x77e   :  { %2902 = vmatpush1.bf16.msra.mxu1 %v2531_v0  ;;  %3066 = vmatpush1.bf16.msra.mxu0 %v2533_v1  ;;  %v2589_v0 = vunpack.c.h.s8.bf16 %v2267_v57  ;;  %v2595_v1 = vunpack.c.l.s8.bf16 %v2273_v6  ;;  %v2295_v57 = vld [vmem:[#allocation3 + $0x3c8] sm:$0xff] }
 0x77f   :  { %2903 = vmatprep.subr.bf16.mxu1 %v2539_v3  ;;  %3067 = vmatprep.subr.bf16.mxu0 %v2541_v11  ;;  %v2597_v3 = vunpack.c.l.s8.bf16 %v2275_v63  ;;  %v2272_v11 = vld [vmem:[#allocation3 + $0x310] sm:$0xff] }
 0x780   :  { %v2594_v17 = vunpack.c.l.s8.bf16 %v2272_v11  ;;  %v2601_v7 = vunpack.c.h.s8.bf16 %v2272_v11  ;;  %v2302_v11 = vld [vmem:[#allocation3 + $0x400] sm:$0xff] }
 0x782   :  { %2904 = vmatpush1.bf16.msra.mxu1 %v2538_v13  ;;  %3068 = vmatpush1.bf16.msra.mxu0 %v2540_v27  ;;  %v2596_v13 = vunpack.c.l.s8.bf16 %v2274_v12  ;;  %v2602_v27 = vunpack.c.h.s8.bf16 %v2273_v6  ;;  %v2303_v6 = vld [vmem:[#allocation3 + $0x408] sm:$0xff] }
 0x783   :  { %2905 = vmatprep.subr.bf16.mxu1 %v2546_v4  ;;  %3069 = vmatprep.subr.bf16.mxu0 %v2548_v14  ;;  %v2604_v4 = vunpack.c.h.s8.bf16 %v2275_v63  ;;  %v2280_v14 = vld [vmem:[#allocation3 + $0x350] sm:$0xff]  ;;  %v2643_v63 = vunpack.c.h.s8.bf16 %v2293_v56 }
 0x786   :  { %2906 = vmatpush1.bf16.msra.mxu1 %v2545_v18  ;;  %3070 = vmatpush1.bf16.msra.mxu0 %v2547_v28  ;;  %v2603_v18 = vunpack.c.h.s8.bf16 %v2274_v12  ;;  %v2609_v28 = vunpack.c.l.s8.bf16 %v2280_v14 }
 0x787   :  { %2907 = vmatprep.subr.bf16.mxu1 %v2553_v22  ;;  %3071 = vmatprep.subr.bf16.mxu0 %v2555_v25  ;;  %v2611_v22 = vunpack.c.l.s8.bf16 %v2282_v16  ;;  %v2279_v25 = vld [vmem:[#allocation3 + $0x348] sm:$0xff] }
 0x788   :  { %v2608_v30 = vunpack.c.l.s8.bf16 %v2279_v25  ;;  %v2615_v19 = vunpack.c.h.s8.bf16 %v2279_v25  ;;  %v2309_v25 = vld [vmem:[#allocation3 + $0x438] sm:$0xff] }
 0x78a   :  { %2908 = vmatpush1.bf16.msra.mxu1 %v2552_v43  ;;  %3072 = vmatpush1.bf16.msra.mxu0 %v2554_v31  ;;  %v2610_v43 = vunpack.c.l.s8.bf16 %v2281_v29  ;;  %v2616_v31 = vunpack.c.h.s8.bf16 %v2280_v14  ;;  %v2310_v14 = vld [vmem:[#allocation3 + $0x440] sm:$0xff] }
 0x78b   :  { %2909 = vmatprep.subr.bf16.mxu1 %v2560_v32  ;;  %3073 = vmatprep.subr.bf16.mxu0 %v2562_v44  ;;  %v2618_v32 = vunpack.c.h.s8.bf16 %v2282_v16  ;;  %v2287_v44 = vld [vmem:[#allocation3 + $0x388] sm:$0xff] }
 0x78e   :  { %2910 = vmatpush1.bf16.msra.mxu1 %v2559_v2  ;;  %3074 = vmatpush1.bf16.msra.mxu0 %v2561_v60  ;;  %v2617_v2 = vunpack.c.h.s8.bf16 %v2281_v29  ;;  %v2623_v60 = vunpack.c.l.s8.bf16 %v2287_v44 }
 0x78f   :  { %2911 = vmatprep.subr.bf16.mxu1 %v2567_v59  ;;  %3075 = vmatprep.subr.bf16.mxu0 %v2569_v54  ;;  %v2625_v59 = vunpack.c.l.s8.bf16 %v2289_v24  ;;  %v2286_v54 = vld [vmem:[#allocation3 + $0x380] sm:$0xff] }
 0x790   :  { %v2629_v47 = vunpack.c.h.s8.bf16 %v2286_v54 }
 0x792   :  { %2912 = vmatpush1.bf16.msra.mxu1 %v2566_v34  ;;  %3076 = vmatpush1.bf16.msra.mxu0 %v2568_v39  ;;  %v2622_v34 = vunpack.c.l.s8.bf16 %v2286_v54  ;;  %v2624_v39 = vunpack.c.l.s8.bf16 %v2288_v37  ;;  %v2316_v54 = vld [vmem:[#allocation3 + $0x470] sm:$0xff] }
 0x793   :  { %2913 = vmatprep.subr.bf16.mxu1 %v2574_v40  ;;  %3077 = vmatprep.subr.bf16.mxu0 %v2576_v46  ;;  %v2630_v40 = vunpack.c.h.s8.bf16 %v2287_v44  ;;  %v2632_v46 = vunpack.c.h.s8.bf16 %v2289_v24  ;;  %v2317_v44 = vld [vmem:[#allocation3 + $0x478] sm:$0xff] }
 0x796   :  { %2914 = vmatpush1.bf16.msra.mxu1 %v2573_v10  ;;  %3078 = vmatpush1.bf16.msra.mxu0 %v2575_v20  ;;  %v5047_v10 = vpack.c.bf16 %v5019_v45, %v5019_v45  ;;  %v2631_v20 = vunpack.c.h.s8.bf16 %v2288_v37  ;;  %v2636_v45 = vunpack.c.l.s8.bf16 %v2293_v56  ;;  %v2323_v56 = vld [vmem:[#allocation3 + $0x4a8] sm:$0xff] }
 0x797   :  { %2915 = vmatprep.subr.bf16.mxu1 %v2581_v49  ;;  %3079 = vmatprep.subr.bf16.mxu0 %v2583_v55  ;;  %v2637_v49 = vunpack.c.l.s8.bf16 %v2294_v41  ;;  %v2639_v55 = vunpack.c.l.s8.bf16 %v2296_v42 }
 0x79a   :  { %2916 = vmatpush1.bf16.msra.mxu1 %v2580_v58  ;;  %3080 = vmatpush1.bf16.msra.mxu0 %v2582_v50  ;;  %v2638_v58 = vunpack.c.l.s8.bf16 %v2295_v57  ;;  %v2644_v50 = vunpack.c.h.s8.bf16 %v2294_v41  ;;  %v2324_v41 = vld [vmem:[#allocation3 + $0x4b0] sm:$0xff] }
 0x79b   :  { %2917 = vmatprep.subr.bf16.mxu1 %v2588_v61  ;;  %3081 = vmatprep.subr.bf16.mxu0 %v2590_v62  ;;  %v2646_v61 = vunpack.c.h.s8.bf16 %v2296_v42  ;;  %v2301_v62 = vld [vmem:[#allocation3 + $0x3f8] sm:$0xff] }
 0x79e   :  { %2918 = vmatpush1.bf16.msra.mxu1 %v2587_v26  ;;  %3082 = vmatpush1.bf16.msra.mxu0 %v2589_v0  ;;  %v2645_v26 = vunpack.c.h.s8.bf16 %v2295_v57  ;;  %v2651_v0 = vunpack.c.l.s8.bf16 %v2301_v62 }
 0x79f   :  { %2919 = vmatprep.subr.bf16.mxu1 %v2595_v1  ;;  %3083 = vmatprep.subr.bf16.mxu0 %v2597_v3  ;;  %v2653_v1 = vunpack.c.l.s8.bf16 %v2303_v6  ;;  %v2300_v3 = vld [vmem:[#allocation3 + $0x3f0] sm:$0xff] }
 0x7a0   :  { %v2650_v12 = vunpack.c.l.s8.bf16 %v2300_v3  ;;  %v2657_v16 = vunpack.c.h.s8.bf16 %v2300_v3  ;;  %v2330_v3 = vld [vmem:[#allocation3 + $0x4e0] sm:$0xff] }
 0x7a2   :  { %2920 = vmatpush1.bf16.msra.mxu1 %v2594_v17  ;;  %3084 = vmatpush1.bf16.msra.mxu0 %v2596_v13  ;;  %v2652_v17 = vunpack.c.l.s8.bf16 %v2302_v11  ;;  %v2658_v13 = vunpack.c.h.s8.bf16 %v2301_v62  ;;  %v2331_v62 = vld [vmem:[#allocation3 + $0x4e8] sm:$0xff] }
 0x7a3   :  { %2921 = vmatprep.subr.bf16.mxu1 %v2602_v27  ;;  %3085 = vmatprep.subr.bf16.mxu0 %v2604_v4  ;;  %v2660_v27 = vunpack.c.h.s8.bf16 %v2303_v6  ;;  %v2308_v4 = vld [vmem:[#allocation3 + $0x430] sm:$0xff] }
 0x7a6   :  { %2922 = vmatpush1.bf16.msra.mxu1 %v2601_v7  ;;  %3086 = vmatpush1.bf16.msra.mxu0 %v2603_v18  ;;  %v2659_v7 = vunpack.c.h.s8.bf16 %v2302_v11  ;;  %v2665_v18 = vunpack.c.l.s8.bf16 %v2308_v4 }
 0x7a7   :  { %2923 = vmatprep.subr.bf16.mxu1 %v2609_v28  ;;  %3087 = vmatprep.subr.bf16.mxu0 %v2611_v22  ;;  %v2667_v28 = vunpack.c.l.s8.bf16 %v2310_v14  ;;  %v2307_v22 = vld [vmem:[#allocation3 + $0x428] sm:$0xff] }
 0x7a8   :  { %v2664_v29 = vunpack.c.l.s8.bf16 %v2307_v22  ;;  %v2671_v24 = vunpack.c.h.s8.bf16 %v2307_v22  ;;  %v2337_v22 = vld [vmem:[#allocation3 + $0x518] sm:$0xff] }
 0x7aa   :  { %2924 = vmatpush1.bf16.msra.mxu1 %v2608_v30  ;;  %3088 = vmatpush1.bf16.msra.mxu0 %v2610_v43  ;;  %v2666_v30 = vunpack.c.l.s8.bf16 %v2309_v25  ;;  %v2672_v43 = vunpack.c.h.s8.bf16 %v2308_v4  ;;  %v2338_v4 = vld [vmem:[#allocation3 + $0x520] sm:$0xff] }
 0x7ab   :  { %2925 = vmatprep.subr.bf16.mxu1 %v2616_v31  ;;  %3089 = vmatprep.subr.bf16.mxu0 %v2618_v32  ;;  %v2674_v31 = vunpack.c.h.s8.bf16 %v2310_v14  ;;  %v2315_v32 = vld [vmem:[#allocation3 + $0x468] sm:$0xff] }
 0x7ae   :  { %2926 = vmatpush1.bf16.msra.mxu1 %v2615_v19  ;;  %3090 = vmatpush1.bf16.msra.mxu0 %v2617_v2  ;;  %v2673_v19 = vunpack.c.h.s8.bf16 %v2309_v25  ;;  %v2679_v2 = vunpack.c.l.s8.bf16 %v2315_v32 }
 0x7af   :  { %2936 = vmatprep.subr.bf16.mxu1 %v2623_v60  ;;  %3100 = vmatprep.subr.bf16.mxu0 %v2625_v59  ;;  %v2681_v60 = vunpack.c.l.s8.bf16 %v2317_v44  ;;  %v2314_v59 = vld [vmem:[#allocation3 + $0x460] sm:$0xff] }
 0x7b0   :  { %v2678_v37 = vunpack.c.l.s8.bf16 %v2314_v59  ;;  %v2685_v42 = vunpack.c.h.s8.bf16 %v2314_v59  ;;  %v2344_v59 = vld [vmem:[#allocation3 + $0x550] sm:$0xff] }
 0x7b1   :  { %2928 = vmatmul.mubr.bf16.vlgmr.msra.gmra.mrb[16].mxu1 %v5043_v38  ;;  %3092 = vmatmul.mubr.bf16.vlgmr.msra.gmra.mrb[20].mxu0 %v5043_v38 }
 0x7b2   :  { %2937 = vmatpush1.bf16.msra.mxu1 %v2622_v34  ;;  %3101 = vmatpush1.bf16.msra.mxu0 %v2624_v39  ;;  %v2680_v34 = vunpack.c.l.s8.bf16 %v2316_v54  ;;  %v2686_v39 = vunpack.c.h.s8.bf16 %v2315_v32  ;;  %v2345_v32 = vld [vmem:[#allocation3 + $0x558] sm:$0xff] }
 0x7b3   :  { %2938 = vmatprep.subr.bf16.mxu1 %v2630_v40  ;;  %3102 = vmatprep.subr.bf16.mxu0 %v2632_v46  ;;  %v2688_v40 = vunpack.c.h.s8.bf16 %v2317_v44  ;;  %v2322_v46 = vld [vmem:[#allocation3 + $0x4a0] sm:$0xff] }
 0x7b4   :  { %2968 = vmatprep.mubr.bf16.mxu1 %v5047_v10  ;;  %3132 = vmatprep.mubr.bf16.mxu0 %v5047_v10 }
 0x7b6   :  { %2939 = vmatpush1.bf16.msra.mxu1 %v2629_v47  ;;  %3103 = vmatpush1.bf16.msra.mxu0 %v2631_v20  ;;  %v2687_v47 = vunpack.c.h.s8.bf16 %v2316_v54  ;;  %v2693_v20 = vunpack.c.l.s8.bf16 %v2322_v46  ;;  %v5055_v54 = vpack.c.bf16 %v5015_v15, %v5015_v15 }
 0x7b7   :  { %2940 = vmatprep.subr.bf16.mxu1 %v2637_v49  ;;  %3104 = vmatprep.subr.bf16.mxu0 %v2639_v55  ;;  %v2695_v49 = vunpack.c.l.s8.bf16 %v2324_v41  ;;  %v2321_v55 = vld [vmem:[#allocation3 + $0x498] sm:$0xff] }
 0x7b8   :  { %v2692_v57 = vunpack.c.l.s8.bf16 %v2321_v55  ;;  %v2699_v6 = vunpack.c.h.s8.bf16 %v2321_v55  ;;  %v2349_v55 = vld [vmem:[#allocation3 + $0x578] sm:$0xff] }
 0x7ba   :  { %2941 = vmatpush1.bf16.msra.mxu1 %v2636_v45  ;;  %3105 = vmatpush1.bf16.msra.mxu0 %v2638_v58  ;;  %v2694_v45 = vunpack.c.l.s8.bf16 %v2323_v56  ;;  %v2700_v58 = vunpack.c.h.s8.bf16 %v2322_v46  ;;  %v2350_v46 = vld [vmem:[#allocation3 + $0x580] sm:$0xff] }
 0x7bb   :  { %2942 = vmatprep.subr.bf16.mxu1 %v2644_v50  ;;  %3106 = vmatprep.subr.bf16.mxu0 %v2646_v61  ;;  %v2702_v50 = vunpack.c.h.s8.bf16 %v2324_v41  ;;  %v2329_v61 = vld [vmem:[#allocation3 + $0x4d8] sm:$0xff]  ;;  %v2352_v41 = vld [vmem:[#allocation3 + $0x590] sm:$0xff] }
 0x7be   :  { %2943 = vmatpush1.bf16.msra.mxu1 %v2643_v63  ;;  %3107 = vmatpush1.bf16.msra.mxu0 %v2645_v26  ;;  %v2701_v63 = vunpack.c.h.s8.bf16 %v2323_v56  ;;  %v2707_v26 = vunpack.c.l.s8.bf16 %v2329_v61  ;;  %v2351_v56 = vld [vmem:[#allocation3 + $0x588] sm:$0xff] }
 0x7bf   :  { %2944 = vmatprep.subr.bf16.mxu1 %v2651_v0  ;;  %3108 = vmatprep.subr.bf16.mxu0 %v2653_v1  ;;  %v2709_v0 = vunpack.c.l.s8.bf16 %v2331_v62  ;;  %v2328_v1 = vld [vmem:[#allocation3 + $0x4d0] sm:$0xff] }
 0x7c0   :  { %v2706_v11 = vunpack.c.l.s8.bf16 %v2328_v1  ;;  %v2713_v14 = vunpack.c.h.s8.bf16 %v2328_v1  ;;  %v2358_v1 = vld [vmem:[#allocation3 + $0x5c0] sm:$0xff] }
 0x7c2   :  { %2945 = vmatpush1.bf16.msra.mxu1 %v2650_v12  ;;  %3109 = vmatpush1.bf16.msra.mxu0 %v2652_v17  ;;  %v2708_v12 = vunpack.c.l.s8.bf16 %v2330_v3  ;;  %v2714_v17 = vunpack.c.h.s8.bf16 %v2329_v61  ;;  %v2359_v61 = vld [vmem:[#allocation3 + $0x5c8] sm:$0xff] }
 0x7c3   :  { %2946 = vmatprep.subr.bf16.mxu1 %v2658_v13  ;;  %3110 = vmatprep.subr.bf16.mxu0 %v2660_v27  ;;  %v2716_v13 = vunpack.c.h.s8.bf16 %v2331_v62  ;;  %v2336_v27 = vld [vmem:[#allocation3 + $0x510] sm:$0xff]  ;;  %v2755_v62 = vunpack.c.h.s8.bf16 %v2349_v55 }
 0x7c6   :  { %2947 = vmatpush1.bf16.msra.mxu1 %v2657_v16  ;;  %3111 = vmatpush1.bf16.msra.mxu0 %v2659_v7  ;;  %v2715_v16 = vunpack.c.h.s8.bf16 %v2330_v3  ;;  %v2721_v7 = vunpack.c.l.s8.bf16 %v2336_v27 }
 0x7c7   :  { %2948 = vmatprep.subr.bf16.mxu1 %v2665_v18  ;;  %3112 = vmatprep.subr.bf16.mxu0 %v2667_v28  ;;  %v2723_v18 = vunpack.c.l.s8.bf16 %v2338_v4  ;;  %v2335_v28 = vld [vmem:[#allocation3 + $0x508] sm:$0xff] }
 0x7c8   :  { %v2720_v25 = vunpack.c.l.s8.bf16 %v2335_v28  ;;  %v2727_v44 = vunpack.c.h.s8.bf16 %v2335_v28  ;;  %v2365_v28 = vld [vmem:[#allocation3 + $0x5f8] sm:$0xff] }
 0x7ca   :  { %2949 = vmatpush1.bf16.msra.mxu1 %v2664_v29  ;;  %3113 = vmatpush1.bf16.msra.mxu0 %v2666_v30  ;;  %v2722_v29 = vunpack.c.l.s8.bf16 %v2337_v22  ;;  %v2728_v30 = vunpack.c.h.s8.bf16 %v2336_v27  ;;  %v2366_v27 = vld [vmem:[#allocation3 + $0x600] sm:$0xff] }
 0x7cb   :  { %2950 = vmatprep.subr.bf16.mxu1 %v2672_v43  ;;  %3114 = vmatprep.subr.bf16.mxu0 %v2674_v31  ;;  %v2730_v43 = vunpack.c.h.s8.bf16 %v2338_v4  ;;  %v2343_v31 = vld [vmem:[#allocation3 + $0x548] sm:$0xff] }
 0x7ce   :  { %2951 = vmatpush1.bf16.msra.mxu1 %v2671_v24  ;;  %3115 = vmatpush1.bf16.msra.mxu0 %v2673_v19  ;;  %v2729_v24 = vunpack.c.h.s8.bf16 %v2337_v22  ;;  %v2735_v19 = vunpack.c.l.s8.bf16 %v2343_v31 }
 0x7cf   :  { %2952 = vmatprep.subr.bf16.mxu1 %v2679_v2  ;;  %3116 = vmatprep.subr.bf16.mxu0 %v2681_v60  ;;  %v2737_v2 = vunpack.c.l.s8.bf16 %v2345_v32  ;;  %v2342_v60 = vld [vmem:[#allocation3 + $0x540] sm:$0xff] }
 0x7d0   :  { %v2741_v15 = vunpack.c.h.s8.bf16 %v2342_v60 }
 0x7d2   :  { %2953 = vmatpush1.bf16.msra.mxu1 %v2678_v37  ;;  %3117 = vmatpush1.bf16.msra.mxu0 %v2680_v34  ;;  %v2734_v37 = vunpack.c.l.s8.bf16 %v2342_v60  ;;  %v2736_v34 = vunpack.c.l.s8.bf16 %v2344_v59  ;;  %v2372_v60 = vld [vmem:[#allocation3 + $0x630] sm:$0xff] }
 0x7d3   :  { %2954 = vmatprep.subr.bf16.mxu1 %v2686_v39  ;;  %3118 = vmatprep.subr.bf16.mxu0 %v2688_v40  ;;  %v2742_v39 = vunpack.c.h.s8.bf16 %v2343_v31  ;;  %v2744_v40 = vunpack.c.h.s8.bf16 %v2345_v32  ;;  %v2373_v31 = vld [vmem:[#allocation3 + $0x638] sm:$0xff] }
 0x7d6   :  { %2955 = vmatpush1.bf16.msra.mxu1 %v2685_v42  ;;  %3119 = vmatpush1.bf16.msra.mxu0 %v2687_v47  ;;  %v5059_v42 = vpack.c.bf16 %v5021_v36, %v5021_v36  ;;  %v2743_v47 = vunpack.c.h.s8.bf16 %v2344_v59  ;;  %v2748_v36 = vunpack.c.l.s8.bf16 %v2349_v55  ;;  %v2379_v55 = vld [vmem:[#allocation3 + $0x668] sm:$0xff] }
 0x7d7   :  { %2956 = vmatprep.subr.bf16.mxu1 %v2693_v20  ;;  %3120 = vmatprep.subr.bf16.mxu0 %v2695_v49  ;;  %v2749_v20 = vunpack.c.l.s8.bf16 %v2350_v46  ;;  %v2751_v49 = vunpack.c.l.s8.bf16 %v2352_v41 }
 0x7da   :  { %2957 = vmatpush1.bf16.msra.mxu1 %v2692_v57  ;;  %3121 = vmatpush1.bf16.msra.mxu0 %v2694_v45  ;;  %v2750_v57 = vunpack.c.l.s8.bf16 %v2351_v56  ;;  %v2756_v45 = vunpack.c.h.s8.bf16 %v2350_v46  ;;  %v2380_v46 = vld [vmem:[#allocation3 + $0x670] sm:$0xff] }
 0x7db   :  { %2958 = vmatprep.subr.bf16.mxu1 %v2700_v58  ;;  %3122 = vmatprep.subr.bf16.mxu0 %v2702_v50  ;;  %v2758_v58 = vunpack.c.h.s8.bf16 %v2352_v41  ;;  %v2357_v50 = vld [vmem:[#allocation3 + $0x5b8] sm:$0xff] }
 0x7de   :  { %2959 = vmatpush1.bf16.msra.mxu1 %v2699_v6  ;;  %3123 = vmatpush1.bf16.msra.mxu0 %v2701_v63  ;;  %v2757_v6 = vunpack.c.h.s8.bf16 %v2351_v56  ;;  %v2763_v63 = vunpack.c.l.s8.bf16 %v2357_v50 }
 0x7df   :  { %2960 = vmatprep.subr.bf16.mxu1 %v2707_v26  ;;  %3124 = vmatprep.subr.bf16.mxu0 %v2709_v0  ;;  %v2765_v26 = vunpack.c.l.s8.bf16 %v2359_v61  ;;  %v2356_v0 = vld [vmem:[#allocation3 + $0x5b0] sm:$0xff] }
 0x7e0   :  { %v2762_v3 = vunpack.c.l.s8.bf16 %v2356_v0  ;;  %v2769_v4 = vunpack.c.h.s8.bf16 %v2356_v0  ;;  %v2386_v0 = vld [vmem:[#allocation3 + $0x6a0] sm:$0xff] }
 0x7e2   :  { %2961 = vmatpush1.bf16.msra.mxu1 %v2706_v11  ;;  %3125 = vmatpush1.bf16.msra.mxu0 %v2708_v12  ;;  %v2764_v11 = vunpack.c.l.s8.bf16 %v2358_v1  ;;  %v2770_v12 = vunpack.c.h.s8.bf16 %v2357_v50  ;;  %v2387_v50 = vld [vmem:[#allocation3 + $0x6a8] sm:$0xff] }
 0x7e3   :  { %2962 = vmatprep.subr.bf16.mxu1 %v2714_v17  ;;  %3126 = vmatprep.subr.bf16.mxu0 %v2716_v13  ;;  %v2772_v17 = vunpack.c.h.s8.bf16 %v2359_v61  ;;  %v2364_v13 = vld [vmem:[#allocation3 + $0x5f0] sm:$0xff] }
 0x7e6   :  { %2963 = vmatpush1.bf16.msra.mxu1 %v2713_v14  ;;  %3127 = vmatpush1.bf16.msra.mxu0 %v2715_v16  ;;  %v2771_v14 = vunpack.c.h.s8.bf16 %v2358_v1  ;;  %v2777_v16 = vunpack.c.l.s8.bf16 %v2364_v13 }
 0x7e7   :  { %2964 = vmatprep.subr.bf16.mxu1 %v2721_v7  ;;  %3128 = vmatprep.subr.bf16.mxu0 %v2723_v18  ;;  %v2779_v7 = vunpack.c.l.s8.bf16 %v2366_v27  ;;  %v2363_v18 = vld [vmem:[#allocation3 + $0x5e8] sm:$0xff] }
 0x7e8   :  { %v2776_v22 = vunpack.c.l.s8.bf16 %v2363_v18  ;;  %v2783_v32 = vunpack.c.h.s8.bf16 %v2363_v18  ;;  %v2393_v18 = vld [vmem:[#allocation3 + $0x6d8] sm:$0xff] }
 0x7ea   :  { %2965 = vmatpush1.bf16.msra.mxu1 %v2720_v25  ;;  %3129 = vmatpush1.bf16.msra.mxu0 %v2722_v29  ;;  %v2778_v25 = vunpack.c.l.s8.bf16 %v2365_v28  ;;  %v2784_v29 = vunpack.c.h.s8.bf16 %v2364_v13  ;;  %v2394_v13 = vld [vmem:[#allocation3 + $0x6e0] sm:$0xff] }
 0x7eb   :  { %2966 = vmatprep.subr.bf16.mxu1 %v2728_v30  ;;  %3130 = vmatprep.subr.bf16.mxu0 %v2730_v43  ;;  %v2786_v30 = vunpack.c.h.s8.bf16 %v2366_v27  ;;  %v2371_v43 = vld [vmem:[#allocation3 + $0x628] sm:$0xff] }
 0x7ee   :  { %2967 = vmatpush1.bf16.msra.mxu1 %v2727_v44  ;;  %3131 = vmatpush1.bf16.msra.mxu0 %v2729_v24  ;;  %v2785_v44 = vunpack.c.h.s8.bf16 %v2365_v28  ;;  %v2791_v24 = vunpack.c.l.s8.bf16 %v2371_v43 }
 0x7ef   :  { %2977 = vmatprep.subr.bf16.mxu1 %v2735_v19  ;;  %3141 = vmatprep.subr.bf16.mxu0 %v2737_v2  ;;  %v2793_v19 = vunpack.c.l.s8.bf16 %v2373_v31  ;;  %v2370_v2 = vld [vmem:[#allocation3 + $0x620] sm:$0xff] }
 0x7f0   :  { %v2790_v59 = vunpack.c.l.s8.bf16 %v2370_v2  ;;  %v2797_v41 = vunpack.c.h.s8.bf16 %v2370_v2  ;;  %v2180_v2 = vld [vmem:[#allocation3 + $0x30] sm:$0xff] }
 0x7f1   :  { %2969 = vmatmul.mubr.bf16.vlgmr.msra.gmra.mrb[16].mxu1 %v5055_v54  ;;  %3133 = vmatmul.mubr.bf16.vlgmr.msra.gmra.mrb[20].mxu0 %v5055_v54 }
 0x7f2   :  { %2978 = vmatpush1.bf16.msra.mxu1 %v2734_v37  ;;  %3142 = vmatpush1.bf16.msra.mxu0 %v2736_v34  ;;  %v2792_v37 = vunpack.c.l.s8.bf16 %v2372_v60  ;;  %v2798_v34 = vunpack.c.h.s8.bf16 %v2371_v43  ;;  %v2208_v43 = vld [vmem:[#allocation3 + $0x110] sm:$0xff] }
 0x7f3   :  { %2979 = vmatprep.subr.bf16.mxu1 %v2742_v39  ;;  %3143 = vmatprep.subr.bf16.mxu0 %v2744_v40  ;;  %v2800_v39 = vunpack.c.h.s8.bf16 %v2373_v31  ;;  %v2378_v40 = vld [vmem:[#allocation3 + $0x660] sm:$0xff] }
 0x7f4   :  { %3009 = vmatprep.mubr.bf16.mxu1 %v5059_v42  ;;  %3173 = vmatprep.mubr.bf16.mxu0 %v5059_v42 }
 0x7f6   :  { %2980 = vmatpush1.bf16.msra.mxu1 %v2741_v15  ;;  %3144 = vmatpush1.bf16.msra.mxu0 %v2743_v47  ;;  %v2799_v15 = vunpack.c.h.s8.bf16 %v2372_v60  ;;  %v2805_v47 = vunpack.c.l.s8.bf16 %v2378_v40  ;;  %v5067_v60 = vpack.c.bf16 %v5017_v35, %v5017_v35 }
 0x7f7   :  { %2981 = vmatprep.subr.bf16.mxu1 %v2749_v20  ;;  %3145 = vmatprep.subr.bf16.mxu0 %v2751_v49  ;;  %v2807_v20 = vunpack.c.l.s8.bf16 %v2380_v46  ;;  %v2377_v49 = vld [vmem:[#allocation3 + $0x658] sm:$0xff] }
 0x7f8   :  { %v2804_v56 = vunpack.c.l.s8.bf16 %v2377_v49  ;;  %v2811_v61 = vunpack.c.h.s8.bf16 %v2377_v49  ;;  %v2187_v49 = vld [vmem:[#allocation3 + $0x68] sm:$0xff] }
 0x7fa   :  { %2982 = vmatpush1.bf16.msra.mxu1 %v2748_v36  ;;  %3146 = vmatpush1.bf16.msra.mxu0 %v2750_v57  ;;  %v2806_v36 = vunpack.c.l.s8.bf16 %v2379_v55  ;;  %v2812_v57 = vunpack.c.h.s8.bf16 %v2378_v40  ;;  %v2186_v40 = vld [vmem:[#allocation3 + $0x60] sm:$0xff] }
 0x7fb   :  { %2983 = vmatprep.subr.bf16.mxu1 %v2756_v45  ;;  %3147 = vmatprep.subr.bf16.mxu0 %v2758_v58  ;;  %v2814_v45 = vunpack.c.h.s8.bf16 %v2380_v46  ;;  %v2385_v58 = vld [vmem:[#allocation3 + $0x698] sm:$0xff]  ;;  %v2215_v46 = vld [vmem:[#allocation3 + $0x148] sm:$0xff]  ;;  %v2417_v35 = vunpack.c.l.s8.bf16 %v2186_v40 }
 0x7fe   :  { %2984 = vmatpush1.bf16.msra.mxu1 %v2755_v62  ;;  %3148 = vmatpush1.bf16.msra.mxu0 %v2757_v6  ;;  %v2813_v62 = vunpack.c.h.s8.bf16 %v2379_v55  ;;  %v2819_v6 = vunpack.c.l.s8.bf16 %v2385_v58 }
 0x7ff   :  { %2985 = vmatprep.subr.bf16.mxu1 %v2763_v63  ;;  %3149 = vmatprep.subr.bf16.mxu0 %v2765_v26  ;;  %v2821_v63 = vunpack.c.l.s8.bf16 %v2387_v50  ;;  %v2384_v26 = vld [vmem:[#allocation3 + $0x690] sm:$0xff] }
 0x800   :  { %v2818_v1 = vunpack.c.l.s8.bf16 %v2384_v26  ;;  %v2825_v27 = vunpack.c.h.s8.bf16 %v2384_v26 }
 0x802   :  { %2986 = vmatpush1.bf16.msra.mxu1 %v2762_v3  ;;  %3150 = vmatpush1.bf16.msra.mxu0 %v2764_v11  ;;  %v2820_v3 = vunpack.c.l.s8.bf16 %v2386_v0  ;;  %v2826_v11 = vunpack.c.h.s8.bf16 %v2385_v58  ;;  %v2222_v58 = vld [vmem:[#allocation3 + $0x180] sm:$0xff] }
 0x803   :  { %2987 = vmatprep.subr.bf16.mxu1 %v2770_v12  ;;  %3151 = vmatprep.subr.bf16.mxu0 %v2772_v17  ;;  %v2828_v12 = vunpack.c.h.s8.bf16 %v2387_v50  ;;  %v2392_v17 = vld [vmem:[#allocation3 + $0x6d0] sm:$0xff] }
 0x806   :  { %2988 = vmatpush1.bf16.msra.mxu1 %v2769_v4  ;;  %3152 = vmatpush1.bf16.msra.mxu0 %v2771_v14  ;;  %v2827_v4 = vunpack.c.h.s8.bf16 %v2386_v0  ;;  %v2833_v14 = vunpack.c.l.s8.bf16 %v2392_v17 }
 0x807   :  { %2989 = vmatprep.subr.bf16.mxu1 %v2777_v16  ;;  %3153 = vmatprep.subr.bf16.mxu0 %v2779_v7  ;;  %v2835_v16 = vunpack.c.l.s8.bf16 %v2394_v13  ;;  %v2391_v7 = vld [vmem:[#allocation3 + $0x6c8] sm:$0xff] }
 0x808   :  { %v2832_v28 = vunpack.c.l.s8.bf16 %v2391_v7  ;;  %v2839_v31 = vunpack.c.h.s8.bf16 %v2391_v7 }
 0x80a   :  { %2990 = vmatpush1.bf16.msra.mxu1 %v2776_v22  ;;  %3154 = vmatpush1.bf16.msra.mxu0 %v2778_v25  ;;  %v2834_v22 = vunpack.c.l.s8.bf16 %v2393_v18  ;;  %v2840_v25 = vunpack.c.h.s8.bf16 %v2392_v17 }
 0x80b   :  { %2991 = vmatprep.subr.bf16.mxu1 %v2784_v29  ;;  %3155 = vmatprep.subr.bf16.mxu0 %v2786_v30  ;;  %v2842_v29 = vunpack.c.h.s8.bf16 %v2394_v13  ;;  %v2179_v30 = vld [vmem:[#allocation3 + $0x28] sm:$0xff] }
 0x80e   :  { %2992 = vmatpush1.bf16.msra.mxu1 %v2783_v32  ;;  %3156 = vmatpush1.bf16.msra.mxu0 %v2785_v44  ;;  %v2841_v32 = vunpack.c.h.s8.bf16 %v2393_v18  ;;  %v2403_v44 = vunpack.c.l.s8.bf16 %v2179_v30 }
 0x80f   :  { %2993 = vmatprep.subr.bf16.mxu1 %v2791_v24  ;;  %3157 = vmatprep.subr.bf16.mxu0 %v2793_v19  ;;  %v2178_v24 = vld [vmem:[#allocation3 + $0x20] sm:$0xff]  ;;  %v2460_v19 = vunpack.c.l.s8.bf16 %v2208_v43 }
 0x812   :  { %2994 = vmatpush1.bf16.msra.mxu1 %v2790_v59  ;;  %3158 = vmatpush1.bf16.msra.mxu0 %v2792_v37  ;;  %v2402_v59 = vunpack.c.l.s8.bf16 %v2178_v24  ;;  %v2404_v37 = vunpack.c.l.s8.bf16 %v2180_v2 }
 0x813   :  { %2995 = vmatprep.subr.bf16.mxu1 %v2798_v34  ;;  %3159 = vmatprep.subr.bf16.mxu0 %v2800_v39  ;;  %v2410_v34 = vunpack.c.h.s8.bf16 %v2179_v30  ;;  %v2467_v39 = vunpack.c.h.s8.bf16 %v2208_v43 }
 0x816   :  { %2996 = vmatpush1.bf16.msra.mxu1 %v2797_v41  ;;  %3160 = vmatpush1.bf16.msra.mxu0 %v2799_v15  ;;  %v2409_v41 = vunpack.c.h.s8.bf16 %v2178_v24  ;;  %v2411_v15 = vunpack.c.h.s8.bf16 %v2180_v2  ;;  %v2236_v24 = vld [vmem:[#allocation3 + $0x1f0] sm:$0xff] }
 0x817   :  { %2997 = vmatprep.subr.bf16.mxu1 %v2805_v47  ;;  %3161 = vmatprep.subr.bf16.mxu0 %v2807_v20  ;;  %v2185_v47 = vld [vmem:[#allocation3 + $0x58] sm:$0xff]  ;;  %v2474_v20 = vunpack.c.l.s8.bf16 %v2215_v46  ;;  %v2516_v2 = vunpack.c.l.s8.bf16 %v2236_v24 }
 0x818   :  { %v2416_v55 = vunpack.c.l.s8.bf16 %v2185_v47  ;;  %v2423_v50 = vunpack.c.h.s8.bf16 %v2185_v47  ;;  %v2243_v47 = vld [vmem:[#allocation3 + $0x228] sm:$0xff] }
 0x81a   :  { %2998 = vmatpush1.bf16.msra.mxu1 %v2804_v56  ;;  %3162 = vmatpush1.bf16.msra.mxu0 %v2806_v36  ;;  %v2418_v56 = vunpack.c.l.s8.bf16 %v2187_v49  ;;  %v2424_v36 = vunpack.c.h.s8.bf16 %v2186_v40 }
 0x81b   :  { %2999 = vmatprep.subr.bf16.mxu1 %v2812_v57  ;;  %3163 = vmatprep.subr.bf16.mxu0 %v2814_v45  ;;  %v2481_v57 = vunpack.c.h.s8.bf16 %v2215_v46  ;;  %v2193_v45 = vld [vmem:[#allocation3 + $0x98] sm:$0xff]  ;;  %v2523_v46 = vunpack.c.h.s8.bf16 %v2236_v24 }
 0x81e   :  { %3000 = vmatpush1.bf16.msra.mxu1 %v2811_v61  ;;  %3164 = vmatpush1.bf16.msra.mxu0 %v2813_v62  ;;  %v2425_v61 = vunpack.c.h.s8.bf16 %v2187_v49  ;;  %v2431_v62 = vunpack.c.l.s8.bf16 %v2193_v45  ;;  %v2530_v49 = vunpack.c.l.s8.bf16 %v2243_v47 }
 0x81f   :  { %3001 = vmatprep.subr.bf16.mxu1 %v2819_v6  ;;  %3165 = vmatprep.subr.bf16.mxu0 %v2821_v63  ;;  %v2192_v6 = vld [vmem:[#allocation3 + $0x90] sm:$0xff]  ;;  %v2488_v63 = vunpack.c.l.s8.bf16 %v2222_v58 }
 0x820   :  { %v2430_v26 = vunpack.c.l.s8.bf16 %v2192_v6  ;;  %v2437_v17 = vunpack.c.h.s8.bf16 %v2192_v6  ;;  %v2250_v6 = vld [vmem:[#allocation3 + $0x260] sm:$0xff] }
 0x822   :  { %3002 = vmatpush1.bf16.msra.mxu1 %v2818_v1  ;;  %3166 = vmatpush1.bf16.msra.mxu0 %v2820_v3  ;;  %v2438_v1 = vunpack.c.h.s8.bf16 %v2193_v45  ;;  %v2495_v3 = vunpack.c.h.s8.bf16 %v2222_v58  ;;  %v2537_v58 = vunpack.c.h.s8.bf16 %v2243_v47 }
 0x823   :  { %3003 = vmatprep.subr.bf16.mxu1 %v2826_v11  ;;  %3167 = vmatprep.subr.bf16.mxu0 %v2828_v12  ;;  %v2200_v11 = vld [vmem:[#allocation3 + $0xd0] sm:$0xff]  ;;  %v2229_v12 = vld [vmem:[#allocation3 + $0x1b8] sm:$0xff] }
 0x826   :  { %3004 = vmatpush1.bf16.msra.mxu1 %v2825_v27  ;;  %3168 = vmatpush1.bf16.msra.mxu0 %v2827_v4  ;;  %v2445_v27 = vunpack.c.l.s8.bf16 %v2200_v11  ;;  %v2199_v4 = vld [vmem:[#allocation3 + $0xc8] sm:$0xff] }
 0x827   :  { %3005 = vmatprep.subr.bf16.mxu1 %v2833_v14  ;;  %3169 = vmatprep.subr.bf16.mxu0 %v2835_v16  ;;  %v2502_v14 = vunpack.c.l.s8.bf16 %v2229_v12  ;;  %v2201_v16 = vld [vmem:[#allocation3 + $0xd8] sm:$0xff]  ;;  %v2444_v7 = vunpack.c.l.s8.bf16 %v2199_v4  ;;  %v2451_v30 = vunpack.c.h.s8.bf16 %v2199_v4 }
 0x828   :  { %v2446_v18 = vunpack.c.l.s8.bf16 %v2201_v16  ;;  %v2453_v43 = vunpack.c.h.s8.bf16 %v2201_v16  ;;  %v2257_v4 = vld [vmem:[#allocation3 + $0x298] sm:$0xff] }
 0x829   :  { %v2558_v16 = vunpack.c.l.s8.bf16 %v2257_v4 }
 0x82a   :  { %3006 = vmatpush1.bf16.msra.mxu1 %v2832_v28  ;;  %3170 = vmatpush1.bf16.msra.mxu0 %v2834_v22  ;;  %v2452_v28 = vunpack.c.h.s8.bf16 %v2200_v11  ;;  %v2509_v22 = vunpack.c.h.s8.bf16 %v2229_v12  ;;  %v2551_v12 = vunpack.c.h.s8.bf16 %v2250_v6 }
 0x82b   :  { %3007 = vmatprep.subr.bf16.mxu1 %v2840_v25  ;;  %3171 = vmatprep.subr.bf16.mxu0 %v2842_v29  ;;  %v2207_v25 = vld [vmem:[#allocation3 + $0x108] sm:$0xff]  ;;  %v2264_v29 = vld [vmem:[#allocation3 + $0x2d0] sm:$0xff] }
 0x82e   :  { %3008 = vmatpush1.bf16.msra.mxu1 %v2839_v31  ;;  %3172 = vmatpush1.bf16.msra.mxu0 %v2841_v32  ;;  %v2459_v31 = vunpack.c.l.s8.bf16 %v2207_v25  ;;  %v2206_v32 = vld [vmem:[#allocation3 + $0x100] sm:$0xff] }
 0x82f   :  { %3182 = vmatprep.subr.bf16.mxu1 %v2403_v44  ;;  %3658 = vmatprep.subr.bf16.mxu0 %v2460_v19  ;;  %v2572_v44 = vunpack.c.l.s8.bf16 %v2264_v29  ;;  %v2458_v19 = vunpack.c.l.s8.bf16 %v2206_v32  ;;  %v2465_v40 = vunpack.c.h.s8.bf16 %v2206_v32  ;;  %v2292_v32 = vld [vmem:[#allocation3 + $0x3b0] sm:$0xff] }
 0x830   :  { %v2628_v24 = vunpack.c.l.s8.bf16 %v2292_v32 }
 0x831   :  { %3010 = vmatmul.mubr.bf16.vlgmr.msra.gmra.mrb[16].mxu1 %v5067_v60  ;;  %3174 = vmatmul.mubr.bf16.vlgmr.msra.gmra.mrb[20].mxu0 %v5067_v60 }
 0x832   :  { %3183 = vmatpush1.bf16.msra.mxu1 %v2402_v59  ;;  %3659 = vmatpush3.bf16.msra.mxu0 %v2404_v37  ;;  %v2466_v59 = vunpack.c.h.s8.bf16 %v2207_v25  ;;  %v2579_v37 = vunpack.c.h.s8.bf16 %v2264_v29  ;;  %v2565_v29 = vunpack.c.h.s8.bf16 %v2257_v4 }
 0x833   :  { %3184 = vmatprep.subr.bf16.mxu1 %v2410_v34  ;;  %3660 = vmatprep.subr.bf16.mxu0 %v2467_v39  ;;  %v2214_v34 = vld [vmem:[#allocation3 + $0x140] sm:$0xff]  ;;  %v2271_v39 = vld [vmem:[#allocation3 + $0x308] sm:$0xff] }
 0x834   :  { %3214 = vmatprep.mubr.bf16.mxu1 %v5025_v33  ;;  %3378 = vmatprep.mubr.bf16.mxu0 %v5025_v33  ;;  %v2194_v33 = vld [vmem:[#allocation3 + $0xa0] sm:$0xff] }
 0x835   :  { %v2432_v0 = vunpack.c.l.s8.bf16 %v2194_v33  ;;  %v2439_v13 = vunpack.c.h.s8.bf16 %v2194_v33  ;;  %v2544_v33 = vunpack.c.l.s8.bf16 %v2250_v6 }
 0x836   :  { %3185 = vmatpush1.bf16.msra.mxu1 %v2409_v41  ;;  %3661 = vmatpush3.bf16.msra.mxu0 %v2411_v15  ;;  %v2473_v41 = vunpack.c.l.s8.bf16 %v2214_v34  ;;  %v2213_v15 = vld [vmem:[#allocation3 + $0x138] sm:$0xff] }
 0x837   :  { %3186 = vmatprep.subr.bf16.mxu1 %v2417_v35  ;;  %3662 = vmatprep.subr.bf16.mxu0 %v2474_v20  ;;  %v2586_v35 = vunpack.c.l.s8.bf16 %v2271_v39  ;;  %v2472_v20 = vunpack.c.l.s8.bf16 %v2213_v15  ;;  %v2479_v45 = vunpack.c.h.s8.bf16 %v2213_v15  ;;  %v2299_v15 = vld [vmem:[#allocation3 + $0x3e8] sm:$0xff] }
 0x83a   :  { %3187 = vmatpush1.bf16.msra.mxu1 %v2416_v55  ;;  %3663 = vmatpush3.bf16.msra.mxu0 %v2418_v56  ;;  %v2480_v55 = vunpack.c.h.s8.bf16 %v2214_v34  ;;  %v2593_v56 = vunpack.c.h.s8.bf16 %v2271_v39  ;;  %v2635_v39 = vunpack.c.h.s8.bf16 %v2292_v32 }
 0x83b   :  { %3188 = vmatprep.subr.bf16.mxu1 %v2424_v36  ;;  %3664 = vmatprep.subr.bf16.mxu0 %v2481_v57  ;;  %v2221_v36 = vld [vmem:[#allocation3 + $0x178] sm:$0xff]  ;;  %v2278_v57 = vld [vmem:[#allocation3 + $0x340] sm:$0xff] }
 0x83e   :  { %3189 = vmatpush1.bf16.msra.mxu1 %v2423_v50  ;;  %3665 = vmatpush3.bf16.msra.mxu0 %v2425_v61  ;;  %v2487_v50 = vunpack.c.l.s8.bf16 %v2221_v36  ;;  %v2220_v61 = vld [vmem:[#allocation3 + $0x170] sm:$0xff] }
 0x83f   :  { %3190 = vmatprep.subr.bf16.mxu1 %v2431_v62  ;;  %3666 = vmatprep.subr.bf16.mxu0 %v2488_v63  ;;  %v2600_v62 = vunpack.c.l.s8.bf16 %v2278_v57  ;;  %v2486_v63 = vunpack.c.l.s8.bf16 %v2220_v61  ;;  %v2493_v11 = vunpack.c.h.s8.bf16 %v2220_v61 }
 0x842   :  { %3191 = vmatpush1.bf16.msra.mxu1 %v2430_v26  ;;  %3667 = vmatpush3.bf16.msra.mxu0 %v2432_v0  ;;  %v2494_v26 = vunpack.c.h.s8.bf16 %v2221_v36  ;;  %v2607_v0 = vunpack.c.h.s8.bf16 %v2278_v57  ;;  %v2649_v36 = vunpack.c.h.s8.bf16 %v2299_v15 }
 0x843   :  { %3192 = vmatprep.subr.bf16.mxu1 %v2438_v1  ;;  %3668 = vmatprep.subr.bf16.mxu0 %v2495_v3  ;;  %v2228_v1 = vld [vmem:[#allocation3 + $0x1b0] sm:$0xff]  ;;  %v2285_v3 = vld [vmem:[#allocation3 + $0x378] sm:$0xff] }
 0x846   :  { %3193 = vmatpush1.bf16.msra.mxu1 %v2437_v17  ;;  %3669 = vmatpush3.bf16.msra.mxu0 %v2439_v13  ;;  %v2501_v17 = vunpack.c.l.s8.bf16 %v2228_v1  ;;  %v2227_v13 = vld [vmem:[#allocation3 + $0x1a8] sm:$0xff] }
 0x847   :  { %3194 = vmatprep.subr.bf16.mxu1 %v2445_v27  ;;  %3670 = vmatprep.subr.bf16.mxu0 %v2502_v14  ;;  %v2614_v27 = vunpack.c.l.s8.bf16 %v2285_v3  ;;  %v2500_v14 = vunpack.c.l.s8.bf16 %v2227_v13  ;;  %v2507_v25 = vunpack.c.h.s8.bf16 %v2227_v13 }
 0x84a   :  { %3195 = vmatpush1.bf16.msra.mxu1 %v2444_v7  ;;  %3671 = vmatpush3.bf16.msra.mxu0 %v2446_v18  ;;  %v2508_v7 = vunpack.c.h.s8.bf16 %v2228_v1  ;;  %v2621_v18 = vunpack.c.h.s8.bf16 %v2285_v3  ;;  %v2255_v3 = vld [vmem:[#allocation3 + $0x288] sm:$0xff] }
 0x84b   :  { %3196 = vmatprep.subr.bf16.mxu1 %v2452_v28  ;;  %3672 = vmatprep.subr.bf16.mxu0 %v2509_v22  ;;  %v2235_v28 = vld [vmem:[#allocation3 + $0x1e8] sm:$0xff]  ;;  %v2320_v22 = vld [vmem:[#allocation3 + $0x490] sm:$0xff] }
 0x84e   :  { %3197 = vmatpush1.bf16.msra.mxu1 %v2451_v30  ;;  %3673 = vmatpush3.bf16.msra.mxu0 %v2453_v43  ;;  %v2515_v30 = vunpack.c.l.s8.bf16 %v2235_v28  ;;  %v2234_v43 = vld [vmem:[#allocation3 + $0x1e0] sm:$0xff] }
 0x84f   :  { %3198 = vmatprep.subr.bf16.mxu1 %v2459_v31  ;;  %3680 = vmatprep.subr.bf16.mxu0 %v2572_v44  ;;  %v2684_v31 = vunpack.c.l.s8.bf16 %v2320_v22  ;;  %v2514_v44 = vunpack.c.l.s8.bf16 %v2234_v43  ;;  %v2521_v34 = vunpack.c.h.s8.bf16 %v2234_v43 }
 0x851   :  { %3379 = vmatmul.mubr.bf16.vlgmr.msra.gmra.mrb[24].mxu0 %v5031_v5 }
 0x852   :  { %3199 = vmatpush1.bf16.msra.mxu1 %v2458_v19  ;;  %3681 = vmatpush3.bf16.msra.mxu0 %v2516_v2  ;;  %v2522_v19 = vunpack.c.h.s8.bf16 %v2235_v28  ;;  %v2691_v2 = vunpack.c.h.s8.bf16 %v2320_v22  ;;  %v2262_v22 = vld [vmem:[#allocation3 + $0x2c0] sm:$0xff] }
 0x853   :  { %3200 = vmatprep.subr.bf16.mxu1 %v2466_v59  ;;  %3682 = vmatprep.subr.bf16.mxu0 %v2579_v37  ;;  %v2242_v59 = vld [vmem:[#allocation3 + $0x220] sm:$0xff]  ;;  %v2327_v37 = vld [vmem:[#allocation3 + $0x4c8] sm:$0xff] }
 0x854   :  { %3418 = vmatprep.mubr.bf16.mxu0 %v5035_v48  ;;  %v2536_v47 = vunpack.c.h.s8.bf16 %v2242_v59 }
 0x856   :  { %3201 = vmatpush1.bf16.msra.mxu1 %v2465_v40  ;;  %3683 = vmatpush3.bf16.msra.mxu0 %v2523_v46  ;;  %v2529_v40 = vunpack.c.l.s8.bf16 %v2242_v59  ;;  %v2241_v46 = vld [vmem:[#allocation3 + $0x218] sm:$0xff] }
 0x857   :  { %3202 = vmatprep.subr.bf16.mxu1 %v2473_v41  ;;  %3684 = vmatprep.subr.bf16.mxu0 %v2586_v35  ;;  %v2698_v41 = vunpack.c.l.s8.bf16 %v2327_v37  ;;  %v2528_v35 = vunpack.c.l.s8.bf16 %v2241_v46 }
 0x85a   :  { %3203 = vmatpush1.bf16.msra.mxu1 %v2472_v20  ;;  %3685 = vmatpush3.bf16.msra.mxu0 %v2530_v49  ;;  %v2705_v20 = vunpack.c.h.s8.bf16 %v2327_v37  ;;  %v2249_v49 = vld [vmem:[#allocation3 + $0x258] sm:$0xff] }
 0x85b   :  { %3204 = vmatprep.subr.bf16.mxu1 %v2480_v55  ;;  %3686 = vmatprep.subr.bf16.mxu0 %v2593_v56  ;;  %v2334_v55 = vld [vmem:[#allocation3 + $0x500] sm:$0xff]  ;;  %v2535_v56 = vunpack.c.h.s8.bf16 %v2241_v46  ;;  %v2543_v57 = vunpack.c.l.s8.bf16 %v2249_v49  ;;  %v2269_v37 = vld [vmem:[#allocation3 + $0x2f8] sm:$0xff] }
 0x85c   :  { %v2719_v6 = vunpack.c.h.s8.bf16 %v2334_v55 }
 0x85e   :  { %3205 = vmatpush1.bf16.msra.mxu1 %v2479_v45  ;;  %3687 = vmatpush3.bf16.msra.mxu0 %v2537_v58  ;;  %v2248_v45 = vld [vmem:[#allocation3 + $0x250] sm:$0xff]  ;;  %v2306_v58 = vld [vmem:[#allocation3 + $0x420] sm:$0xff] }
 0x85f   :  { %3206 = vmatprep.subr.bf16.mxu1 %v2487_v50  ;;  %3688 = vmatprep.subr.bf16.mxu0 %v2600_v62  ;;  %v2542_v50 = vunpack.c.l.s8.bf16 %v2248_v45  ;;  %v2656_v61 = vunpack.c.l.s8.bf16 %v2306_v58  ;;  %v2550_v62 = vunpack.c.h.s8.bf16 %v2249_v49 }
 0x862   :  { %3207 = vmatpush1.bf16.msra.mxu1 %v2486_v63  ;;  %3689 = vmatpush3.bf16.msra.mxu0 %v2544_v33  ;;  %v2256_v63 = vld [vmem:[#allocation3 + $0x290] sm:$0xff]  ;;  %v2341_v33 = vld [vmem:[#allocation3 + $0x538] sm:$0xff] }
 0x863   :  { %3208 = vmatprep.subr.bf16.mxu1 %v2494_v26  ;;  %3690 = vmatprep.subr.bf16.mxu0 %v2607_v0  ;;  %v2549_v26 = vunpack.c.h.s8.bf16 %v2248_v45  ;;  %v2663_v0 = vunpack.c.h.s8.bf16 %v2306_v58  ;;  %v2557_v1 = vunpack.c.l.s8.bf16 %v2256_v63  ;;  %v2733_v4 = vunpack.c.h.s8.bf16 %v2341_v33 }
 0x866   :  { %3209 = vmatpush1.bf16.msra.mxu1 %v2493_v11  ;;  %3691 = vmatpush3.bf16.msra.mxu0 %v2551_v12  ;;  %v2726_v11 = vunpack.c.l.s8.bf16 %v2341_v33  ;;  %v2313_v12 = vld [vmem:[#allocation3 + $0x458] sm:$0xff]  ;;  %v2283_v33 = vld [vmem:[#allocation3 + $0x368] sm:$0xff] }
 0x867   :  { %3210 = vmatprep.subr.bf16.mxu1 %v2501_v17  ;;  %3692 = vmatprep.subr.bf16.mxu0 %v2614_v27  ;;  %v2556_v17 = vunpack.c.l.s8.bf16 %v2255_v3  ;;  %v2670_v13 = vunpack.c.l.s8.bf16 %v2313_v12  ;;  %v2564_v27 = vunpack.c.h.s8.bf16 %v2256_v63 }
 0x86a   :  { %3211 = vmatpush1.bf16.msra.mxu1 %v2500_v14  ;;  %3693 = vmatpush3.bf16.msra.mxu0 %v2558_v16  ;;  %v2263_v14 = vld [vmem:[#allocation3 + $0x2c8] sm:$0xff]  ;;  %v2376_v16 = vld [vmem:[#allocation3 + $0x650] sm:$0xff] }
 0x86b   :  { %3212 = vmatprep.subr.bf16.mxu1 %v2508_v7  ;;  %3694 = vmatprep.subr.bf16.mxu0 %v2621_v18  ;;  %v2563_v7 = vunpack.c.h.s8.bf16 %v2255_v3  ;;  %v2677_v18 = vunpack.c.h.s8.bf16 %v2313_v12  ;;  %v2571_v28 = vunpack.c.l.s8.bf16 %v2263_v14  ;;  %v2803_v32 = vunpack.c.h.s8.bf16 %v2376_v16 }
 0x86e   :  { %3213 = vmatpush1.bf16.msra.mxu1 %v2507_v25  ;;  %3695 = vmatpush3.bf16.msra.mxu0 %v2565_v29  ;;  %v2796_v25 = vunpack.c.l.s8.bf16 %v2376_v16  ;;  %v2348_v29 = vld [vmem:[#allocation3 + $0x570] sm:$0xff] }
 0x86f   :  { %3223 = vmatprep.subr.bf16.mxu1 %v2515_v30  ;;  %3702 = vmatprep.subr.bf16.mxu0 %v2684_v31  ;;  %v2570_v30 = vunpack.c.l.s8.bf16 %v2262_v22  ;;  %v2740_v43 = vunpack.c.l.s8.bf16 %v2348_v29  ;;  %v2578_v31 = vunpack.c.h.s8.bf16 %v2263_v14  ;;  %v2290_v14 = vld [vmem:[#allocation3 + $0x3a0] sm:$0xff] }
 0x870   :  { %v2626_v16 = vunpack.c.l.s8.bf16 %v2290_v14 }
 0x871   :  { %3215 = vmatmul.mubr.bf16.vlgmr.msra.gmra.mrb[20].mxu1 %v5031_v5  ;;  %3419 = vmatmul.mubr.bf16.vlgmr.msra.gmra.mrb[28].mxu0 %v5043_v38  ;;  %v2642_v5 = vunpack.c.l.s8.bf16 %v2299_v15 }
 0x872   :  { %3224 = vmatpush1.bf16.msra.mxu1 %v2514_v44  ;;  %3703 = vmatpush3.bf16.msra.mxu0 %v2628_v24  ;;  %v2270_v44 = vld [vmem:[#allocation3 + $0x300] sm:$0xff]  ;;  %v2383_v24 = vld [vmem:[#allocation3 + $0x688] sm:$0xff] }
 0x873   :  { %3225 = vmatprep.subr.bf16.mxu1 %v2522_v19  ;;  %3704 = vmatprep.subr.bf16.mxu0 %v2691_v2  ;;  %v2577_v19 = vunpack.c.h.s8.bf16 %v2262_v22  ;;  %v2747_v2 = vunpack.c.h.s8.bf16 %v2348_v29  ;;  %v2585_v59 = vunpack.c.l.s8.bf16 %v2270_v44  ;;  %v2817_v15 = vunpack.c.h.s8.bf16 %v2383_v24 }
 0x874   :  { %3255 = vmatprep.mubr.bf16.mxu1 %v5035_v48  ;;  %3458 = vmatprep.mubr.bf16.mxu0 %v5047_v10  ;;  %v2712_v48 = vunpack.c.l.s8.bf16 %v2334_v55  ;;  %v2276_v55 = vld [vmem:[#allocation3 + $0x330] sm:$0xff] }
 0x876   :  { %3226 = vmatpush1.bf16.msra.mxu1 %v2521_v34  ;;  %3705 = vmatpush3.bf16.msra.mxu0 %v2635_v39  ;;  %v2810_v34 = vunpack.c.l.s8.bf16 %v2383_v24  ;;  %v2355_v39 = vld [vmem:[#allocation3 + $0x5a8] sm:$0xff] }
 0x877   :  { %3227 = vmatprep.subr.bf16.mxu1 %v2529_v40  ;;  %3706 = vmatprep.subr.bf16.mxu0 %v2698_v41  ;;  %v2584_v40 = vunpack.c.l.s8.bf16 %v2269_v37  ;;  %v2754_v46 = vunpack.c.l.s8.bf16 %v2355_v39  ;;  %v2592_v41 = vunpack.c.h.s8.bf16 %v2270_v44  ;;  %v2304_v44 = vld [vmem:[#allocation3 + $0x410] sm:$0xff] }
 0x87a   :  { %3228 = vmatpush1.bf16.msra.mxu1 %v2528_v35  ;;  %3707 = vmatpush3.bf16.msra.mxu0 %v2642_v5  ;;  %v2277_v35 = vld [vmem:[#allocation3 + $0x338] sm:$0xff]  ;;  %v2390_v5 = vld [vmem:[#allocation3 + $0x6c0] sm:$0xff] }
 0x87b   :  { %3229 = vmatprep.subr.bf16.mxu1 %v2536_v47  ;;  %3708 = vmatprep.subr.bf16.mxu0 %v2705_v20  ;;  %v2591_v47 = vunpack.c.h.s8.bf16 %v2269_v37  ;;  %v2761_v20 = vunpack.c.h.s8.bf16 %v2355_v39  ;;  %v2599_v49 = vunpack.c.l.s8.bf16 %v2277_v35  ;;  %v2831_v58 = vunpack.c.h.s8.bf16 %v2390_v5  ;;  %v2319_v39 = vld [vmem:[#allocation3 + $0x488] sm:$0xff] }
 0x87e   :  { %3230 = vmatpush1.bf16.msra.mxu1 %v2535_v56  ;;  %3709 = vmatpush3.bf16.msra.mxu0 %v2649_v36  ;;  %v2824_v56 = vunpack.c.l.s8.bf16 %v2390_v5  ;;  %v2362_v36 = vld [vmem:[#allocation3 + $0x5e0] sm:$0xff] }
 0x87f   :  { %3231 = vmatprep.subr.bf16.mxu1 %v2543_v57  ;;  %3710 = vmatprep.subr.bf16.mxu0 %v2712_v48  ;;  %v2598_v57 = vunpack.c.l.s8.bf16 %v2276_v55  ;;  %v2768_v45 = vunpack.c.l.s8.bf16 %v2362_v36  ;;  %v2606_v48 = vunpack.c.h.s8.bf16 %v2277_v35  ;;  %v2690_v35 = vunpack.c.h.s8.bf16 %v2319_v39  ;;  %v2326_v5 = vld [vmem:[#allocation3 + $0x4c0] sm:$0xff] }
 0x882   :  { %3232 = vmatpush1.bf16.msra.mxu1 %v2542_v50  ;;  %3711 = vmatpush3.bf16.msra.mxu0 %v2656_v61  ;;  %v2284_v50 = vld [vmem:[#allocation3 + $0x370] sm:$0xff]  ;;  %v2397_v61 = vld [vmem:[#allocation3 + $0x6f8] sm:$0xff] }
 0x883   :  { %3233 = vmatprep.subr.bf16.mxu1 %v2550_v62  ;;  %3712 = vmatprep.subr.bf16.mxu0 %v2719_v6  ;;  %v2605_v62 = vunpack.c.h.s8.bf16 %v2276_v55  ;;  %v2775_v6 = vunpack.c.h.s8.bf16 %v2362_v36  ;;  %v2613_v63 = vunpack.c.l.s8.bf16 %v2284_v50  ;;  %v2845_v12 = vunpack.c.h.s8.bf16 %v2397_v61  ;;  %v2333_v36 = vld [vmem:[#allocation3 + $0x4f8] sm:$0xff] }
 0x886   :  { %3234 = vmatpush1.bf16.msra.mxu1 %v2549_v26  ;;  %3713 = vmatpush3.bf16.msra.mxu0 %v2663_v0  ;;  %v2838_v26 = vunpack.c.l.s8.bf16 %v2397_v61  ;;  %v2369_v0 = vld [vmem:[#allocation3 + $0x618] sm:$0xff]  ;;  %v2340_v61 = vld [vmem:[#allocation3 + $0x530] sm:$0xff] }
 0x887   :  { %3235 = vmatprep.subr.bf16.mxu1 %v2557_v1  ;;  %3714 = vmatprep.subr.bf16.mxu0 %v2726_v11  ;;  %v2612_v1 = vunpack.c.l.s8.bf16 %v2283_v33  ;;  %v2782_v3 = vunpack.c.l.s8.bf16 %v2369_v0  ;;  %v2620_v11 = vunpack.c.h.s8.bf16 %v2284_v50  ;;  %v2718_v50 = vunpack.c.h.s8.bf16 %v2333_v36 }
 0x88a   :  { %3236 = vmatpush1.bf16.msra.mxu1 %v2556_v17  ;;  %3715 = vmatpush3.bf16.msra.mxu0 %v2670_v13  ;;  %v2291_v17 = vld [vmem:[#allocation3 + $0x3a8] sm:$0xff]  ;;  %v2619_v13 = vunpack.c.h.s8.bf16 %v2283_v33 }
 0x88b   :  { %3237 = vmatprep.subr.bf16.mxu1 %v2564_v27  ;;  %3716 = vmatprep.subr.bf16.mxu0 %v2733_v4  ;;  %v2789_v27 = vunpack.c.h.s8.bf16 %v2369_v0  ;;  %v2627_v4 = vunpack.c.l.s8.bf16 %v2291_v17  ;;  %v2347_v0 = vld [vmem:[#allocation3 + $0x568] sm:$0xff] }
 0x88e   :  { %3238 = vmatpush1.bf16.msra.mxu1 %v2563_v7  ;;  %3717 = vmatpush3.bf16.msra.mxu0 %v2677_v18  ;;  %v2634_v7 = vunpack.c.h.s8.bf16 %v2291_v17  ;;  %v2298_v18 = vld [vmem:[#allocation3 + $0x3e0] sm:$0xff]  ;;  %v2746_v17 = vunpack.c.h.s8.bf16 %v2347_v0 }
 0x88f   :  { %3239 = vmatprep.subr.bf16.mxu1 %v2571_v28  ;;  %3724 = vmatprep.subr.bf16.mxu0 %v2796_v25  ;;  %v2633_v28 = vunpack.c.h.s8.bf16 %v2290_v14  ;;  %v2641_v22 = vunpack.c.l.s8.bf16 %v2298_v18  ;;  %v2297_v25 = vld [vmem:[#allocation3 + $0x3d8] sm:$0xff] }
 0x890   :  { %v2640_v29 = vunpack.c.l.s8.bf16 %v2297_v25  ;;  %v2353_v14 = vld [vmem:[#allocation3 + $0x598] sm:$0xff] }
 0x891   :  { %3459 = vmatmul.mubr.bf16.vlgmr.msra.gmra.mrb[32].mxu0 %v5055_v54 }
 0x892   :  { %3240 = vmatpush1.bf16.msra.mxu1 %v2570_v30  ;;  %3725 = vmatpush3.bf16.msra.mxu0 %v2740_v43  ;;  %v2648_v30 = vunpack.c.h.s8.bf16 %v2298_v18  ;;  %v2305_v43 = vld [vmem:[#allocation3 + $0x418] sm:$0xff] }
 0x893   :  { %3241 = vmatprep.subr.bf16.mxu1 %v2578_v31  ;;  %3726 = vmatprep.subr.bf16.mxu0 %v2803_v32  ;;  %v2647_v31 = vunpack.c.h.s8.bf16 %v2297_v25  ;;  %v2655_v32 = vunpack.c.l.s8.bf16 %v2305_v43  ;;  %v2662_v24 = vunpack.c.h.s8.bf16 %v2305_v43  ;;  %v2361_v18 = vld [vmem:[#allocation3 + $0x5d8] sm:$0xff]  ;;  %v2360_v25 = vld [vmem:[#allocation3 + $0x5d0] sm:$0xff] }
 0x894   :  { %3498 = vmatprep.mubr.bf16.mxu0 %v5059_v42  ;;  %v2368_v43 = vld [vmem:[#allocation3 + $0x610] sm:$0xff] }
 0x896   :  { %3242 = vmatpush1.bf16.msra.mxu1 %v2577_v19  ;;  %3727 = vmatpush3.bf16.msra.mxu0 %v2747_v2  ;;  %v2312_v19 = vld [vmem:[#allocation3 + $0x450] sm:$0xff] }
 0x897   :  { %3243 = vmatprep.subr.bf16.mxu1 %v2585_v59  ;;  %3728 = vmatprep.subr.bf16.mxu0 %v2810_v34  ;;  %v2669_v2 = vunpack.c.l.s8.bf16 %v2312_v19  ;;  %v2311_v59 = vld [vmem:[#allocation3 + $0x448] sm:$0xff]  ;;  %v2676_v34 = vunpack.c.h.s8.bf16 %v2312_v19 }
 0x898   :  { %v2668_v37 = vunpack.c.l.s8.bf16 %v2311_v59 }
 0x89a   :  { %3244 = vmatpush1.bf16.msra.mxu1 %v2584_v40  ;;  %3729 = vmatpush3.bf16.msra.mxu0 %v2754_v46  ;;  %v2675_v40 = vunpack.c.h.s8.bf16 %v2311_v59  ;;  %v2683_v46 = vunpack.c.l.s8.bf16 %v2319_v39  ;;  %v2367_v59 = vld [vmem:[#allocation3 + $0x608] sm:$0xff] }
 0x89b   :  { %3245 = vmatprep.subr.bf16.mxu1 %v2592_v41  ;;  %3730 = vmatprep.subr.bf16.mxu0 %v2817_v15  ;;  %v2318_v41 = vld [vmem:[#allocation3 + $0x480] sm:$0xff] }
 0x89c   :  { %v2682_v15 = vunpack.c.l.s8.bf16 %v2318_v41 }
 0x89e   :  { %3246 = vmatpush1.bf16.msra.mxu1 %v2591_v47  ;;  %3731 = vmatpush3.bf16.msra.mxu0 %v2761_v20  ;;  %v2689_v47 = vunpack.c.h.s8.bf16 %v2318_v41  ;;  %v2697_v20 = vunpack.c.l.s8.bf16 %v2326_v5 }
 0x89f   :  { %3247 = vmatprep.subr.bf16.mxu1 %v2599_v49  ;;  %3732 = vmatprep.subr.bf16.mxu0 %v2824_v56  ;;  %v2325_v49 = vld [vmem:[#allocation3 + $0x4b8] sm:$0xff]  ;;  %v2704_v56 = vunpack.c.h.s8.bf16 %v2326_v5 }
 0x8a0   :  { %v2696_v55 = vunpack.c.l.s8.bf16 %v2325_v49 }
 0x8a2   :  { %3248 = vmatpush1.bf16.msra.mxu1 %v2598_v57  ;;  %3733 = vmatpush3.bf16.msra.mxu0 %v2768_v45  ;;  %v2703_v57 = vunpack.c.h.s8.bf16 %v2325_v49  ;;  %v2711_v45 = vunpack.c.l.s8.bf16 %v2333_v36 }
 0x8a3   :  { %3249 = vmatprep.subr.bf16.mxu1 %v2606_v48  ;;  %3734 = vmatprep.subr.bf16.mxu0 %v2831_v58  ;;  %v2332_v48 = vld [vmem:[#allocation3 + $0x4f0] sm:$0xff] }
 0x8a4   :  { %v2710_v58 = vunpack.c.l.s8.bf16 %v2332_v48 }
 0x8a6   :  { %3250 = vmatpush1.bf16.msra.mxu1 %v2605_v62  ;;  %3735 = vmatpush3.bf16.msra.mxu0 %v2775_v6  ;;  %v2717_v62 = vunpack.c.h.s8.bf16 %v2332_v48  ;;  %v2725_v6 = vunpack.c.l.s8.bf16 %v2340_v61  ;;  %v2375_v48 = vld [vmem:[#allocation3 + $0x648] sm:$0xff] }
 0x8a7   :  { %3251 = vmatprep.subr.bf16.mxu1 %v2613_v63  ;;  %3736 = vmatprep.subr.bf16.mxu0 %v2838_v26  ;;  %v2339_v63 = vld [vmem:[#allocation3 + $0x528] sm:$0xff]  ;;  %v2732_v26 = vunpack.c.h.s8.bf16 %v2340_v61 }
 0x8a8   :  { %v2724_v33 = vunpack.c.l.s8.bf16 %v2339_v63 }
 0x8aa   :  { %3252 = vmatpush1.bf16.msra.mxu1 %v2612_v1  ;;  %3737 = vmatpush3.bf16.msra.mxu0 %v2782_v3  ;;  %v2731_v1 = vunpack.c.h.s8.bf16 %v2339_v63  ;;  %v2739_v3 = vunpack.c.l.s8.bf16 %v2347_v0  ;;  %v2381_v0 = vld [vmem:[#allocation3 + $0x678] sm:$0xff] }
 0x8ab   :  { %3253 = vmatprep.subr.bf16.mxu1 %v2620_v11  ;;  %3738 = vmatprep.subr.bf16.mxu0 %v2845_v12  ;;  %v2346_v11 = vld [vmem:[#allocation3 + $0x560] sm:$0xff] }
 0x8ac   :  { %v2738_v12 = vunpack.c.l.s8.bf16 %v2346_v11 }
 0x8ae   :  { %3254 = vmatpush1.bf16.msra.mxu1 %v2619_v13  ;;  %3739 = vmatpush3.bf16.msra.mxu0 %v2789_v27  ;;  %v2354_v13 = vld [vmem:[#allocation3 + $0x5a0] sm:$0xff]  ;;  %v2745_v27 = vunpack.c.h.s8.bf16 %v2346_v11 }
 0x8af   :  { %3264 = vmatprep.subr.bf16.mxu1 %v2627_v4  ;;  %v2753_v4 = vunpack.c.l.s8.bf16 %v2354_v13 }
 0x8b1   :  { %3256 = vmatmul.mubr.bf16.vlgmr.msra.gmra.mrb[20].mxu1 %v5043_v38  ;;  %3499 = vmatmul.mubr.bf16.vlgmr.msra.gmra.mrb[36].mxu0 %v5067_v60  ;;  %v2654_v38 = vunpack.c.l.s8.bf16 %v2304_v44 }
 0x8b2   :  { %3265 = vmatpush1.bf16.msra.mxu1 %v2626_v16  ;;  %3296 = vmatprep.mubr.bf16.mxu1 %v5047_v10  ;;  %v2661_v10 = vunpack.c.h.s8.bf16 %v2304_v44  ;;  %v2752_v16 = vunpack.c.l.s8.bf16 %v2353_v14 }
 0x8b3   :  { %3266 = vmatprep.subr.bf16.mxu1 %v2634_v7  ;;  %v2760_v7 = vunpack.c.h.s8.bf16 %v2354_v13  ;;  %v2389_v13 = vld [vmem:[#allocation3 + $0x6b8] sm:$0xff] }
 0x8b6   :  { %3267 = vmatpush1.bf16.msra.mxu1 %v2633_v28  ;;  %v2759_v28 = vunpack.c.h.s8.bf16 %v2353_v14  ;;  %v2388_v14 = vld [vmem:[#allocation3 + $0x6b0] sm:$0xff] }
 0x8b7   :  { %3268 = vmatprep.subr.bf16.mxu1 %v2641_v22  ;;  %v2767_v22 = vunpack.c.l.s8.bf16 %v2361_v18 }
 0x8ba   :  { %3269 = vmatpush1.bf16.msra.mxu1 %v2640_v29  ;;  %v2766_v29 = vunpack.c.l.s8.bf16 %v2360_v25 }
 0x8bb   :  { %3270 = vmatprep.subr.bf16.mxu1 %v2648_v30  ;;  %v2774_v30 = vunpack.c.h.s8.bf16 %v2361_v18  ;;  %v2396_v18 = vld [vmem:[#allocation3 + $0x6f0] sm:$0xff] }
 0x8be   :  { %3271 = vmatpush1.bf16.msra.mxu1 %v2647_v31 }
 0x8bf   :  { %3272 = vmatprep.subr.bf16.mxu1 %v2655_v32 }
 0x8c2   :  { %3273 = vmatpush1.bf16.msra.mxu1 %v2654_v38 }
 0x8c3   :  { %3274 = vmatprep.subr.bf16.mxu1 %v2662_v24  ;;  %v2773_v24 = vunpack.c.h.s8.bf16 %v2360_v25  ;;  %v2395_v25 = vld [vmem:[#allocation3 + $0x6e8] sm:$0xff] }
 0x8c6   :  { %3275 = vmatpush1.bf16.msra.mxu1 %v2661_v10 }
 0x8c7   :  { %3276 = vmatprep.subr.bf16.mxu1 %v2669_v2  ;;  %v2781_v2 = vunpack.c.l.s8.bf16 %v2368_v43 }
 0x8ca   :  { %3277 = vmatpush1.bf16.msra.mxu1 %v2668_v37 }
 0x8cb   :  { %3278 = vmatprep.subr.bf16.mxu1 %v2676_v34 }
 0x8ce   :  { %3279 = vmatpush1.bf16.msra.mxu1 %v2675_v40 }
 0x8cf   :  { %3280 = vmatprep.subr.bf16.mxu1 %v2683_v46 }
 0x8d2   :  { %3281 = vmatpush1.bf16.msra.mxu1 %v2682_v15 }
 0x8d3   :  { %3282 = vmatprep.subr.bf16.mxu1 %v2690_v35 }
 0x8d6   :  { %3283 = vmatpush1.bf16.msra.mxu1 %v2689_v47 }
 0x8d7   :  { %3284 = vmatprep.subr.bf16.mxu1 %v2697_v20 }
 0x8da   :  { %3285 = vmatpush1.bf16.msra.mxu1 %v2696_v55 }
 0x8db   :  { %3286 = vmatprep.subr.bf16.mxu1 %v2704_v56 }
 0x8de   :  { %3287 = vmatpush1.bf16.msra.mxu1 %v2703_v57  ;;  %v2788_v57 = vunpack.c.h.s8.bf16 %v2368_v43  ;;  %v2836_v43 = vunpack.c.l.s8.bf16 %v2395_v25 }
 0x8df   :  { %3288 = vmatprep.subr.bf16.mxu1 %v2711_v45 }
 0x8e2   :  { %3289 = vmatpush1.bf16.msra.mxu1 %v2710_v58  ;;  %v2795_v58 = vunpack.c.l.s8.bf16 %v2375_v48 }
 0x8e3   :  { %3290 = vmatprep.subr.bf16.mxu1 %v2718_v50  ;;  %v2374_v50 = vld [vmem:[#allocation3 + $0x640] sm:$0xff] }
 0x8e4   :  { %v2794_v61 = vunpack.c.l.s8.bf16 %v2374_v50  ;;  %v2801_v63 = vunpack.c.h.s8.bf16 %v2374_v50 }
 0x8e6   :  { %3291 = vmatpush1.bf16.msra.mxu1 %v2717_v62  ;;  %v2802_v62 = vunpack.c.h.s8.bf16 %v2375_v48 }
 0x8e7   :  { %3292 = vmatprep.subr.bf16.mxu1 %v2725_v6  ;;  %v2382_v6 = vld [vmem:[#allocation3 + $0x680] sm:$0xff] }
 0x8ea   :  { %3293 = vmatpush1.bf16.msra.mxu1 %v2724_v33 }
 0x8eb   :  { %3294 = vmatprep.subr.bf16.mxu1 %v2732_v26  ;;  %v2809_v26 = vunpack.c.l.s8.bf16 %v2382_v6 }
 0x8ee   :  { %3295 = vmatpush1.bf16.msra.mxu1 %v2731_v1 }
 0x8ef   :  { %3305 = vmatprep.subr.bf16.mxu1 %v2739_v3 }
 0x8f1   :  { %3297 = vmatmul.mubr.bf16.vlgmr.msra.gmra.mrb[20].mxu1 %v5055_v54  ;;  %v5086_v54 = vld [vmem:[#allocation28] sm:$0xff] }
 0x8f2   :  { %3306 = vmatpush1.bf16.msra.mxu1 %v2738_v12  ;;  %3337 = vmatprep.mubr.bf16.mxu1 %v5059_v42  ;;  %v5088_v42 = vld [vmem:[#allocation30] sm:$0xff]  ;;  %v3511_v31 = vrot.slane %v5086_v54, %v4736_v8  ;;  %v3519_v32 = vrot.slane %v5086_v54, %v4810_v21  ;;  %v3515_v44 = vrot.slane %v5086_v54, %v4739_v9  ;;  %v2808_v12 = vunpack.c.l.s8.bf16 %v2381_v0 }
 0x8f3   :  { %3307 = vmatprep.subr.bf16.mxu1 %v2746_v17  ;;  %v3523_v38 = vrot.slane %v5086_v54, %v4813_v23  ;;  %v3555_v19 = vrot.slane %v5088_v42, %v4736_v8  ;;  %v3563_v10 = vrot.slane %v5088_v42, %v4810_v21  ;;  %v3559_v39 = vrot.slane %v5088_v42, %v4739_v9 }
 0x8f4   :  { %v3567_v40 = vrot.slane %v5088_v42, %v4813_v23  ;;  %v2780_v21 = vunpack.c.l.s8.bf16 %v2367_v59  ;;  %v2787_v23 = vunpack.c.h.s8.bf16 %v2367_v59  ;;  %v2816_v17 = vunpack.c.h.s8.bf16 %v2382_v6 }
 0x8f5   :  { %v3571_v48 = vrot.slane %v5088_v42, %v4944_v51 }
 0x8f6   :  { %3308 = vmatpush1.bf16.msra.mxu1 %v2745_v27  ;;  %v2815_v27 = vunpack.c.h.s8.bf16 %v2381_v0 }
 0x8f7   :  { %3309 = vmatprep.subr.bf16.mxu1 %v2753_v4  ;;  %v2823_v4 = vunpack.c.l.s8.bf16 %v2389_v13 }
 0x8fa   :  { %3310 = vmatpush1.bf16.msra.mxu1 %v2752_v16  ;;  %v2822_v16 = vunpack.c.l.s8.bf16 %v2388_v14 }
 0x8fb   :  { %3311 = vmatprep.subr.bf16.mxu1 %v2760_v7  ;;  %v2830_v7 = vunpack.c.h.s8.bf16 %v2389_v13 }
 0x8fe   :  { %3312 = vmatpush1.bf16.msra.mxu1 %v2759_v28  ;;  %v2829_v28 = vunpack.c.h.s8.bf16 %v2388_v14 }
 0x8ff   :  { %3313 = vmatprep.subr.bf16.mxu1 %v2767_v22  ;;  %v2837_v22 = vunpack.c.l.s8.bf16 %v2396_v18 }
 0x902   :  { %3314 = vmatpush1.bf16.msra.mxu1 %v2766_v29 }
 0x903   :  { %3315 = vmatprep.subr.bf16.mxu1 %v2774_v30 }
 0x904   :  { %v3011_v37 = vpop.f32.mrb[16].mxu1  ;;  %v3175_v34 = vpop.f32.mrb[20].mxu0 }
 0x905   :  { %v3543_v46 = vmul.f32 %v3511_v31, %v3011_v37  ;;  %v3545_v41 = vmul.f32 %v3519_v32, %v3175_v34  ;;  %v3013_v15 = vpop.f32.mrb[17].mxu1  ;;  %v3177_v35 = vpop.f32.mrb[21].mxu0 }
 0x906   :  { %v3544_v5 = vmul.f32 %v3515_v44, %v3013_v15  ;;  %v3546_v8 = vmul.f32 %v3523_v38, %v3177_v35  ;;  %v3015_v47 = vpop.f32.mrb[18].mxu1  ;;  %v3179_v20 = vpop.f32.mrb[22].mxu0  ;;  %3316 = vmatpush1.bf16.msra.mxu1 %v2773_v24  ;;  %v2844_v44 = vunpack.c.h.s8.bf16 %v2396_v18  ;;  %v2843_v24 = vunpack.c.h.s8.bf16 %v2395_v25 }
 0x907   :  { %v3587_v49 = vadd.f32 %v3555_v19, %v3543_v46  ;;  %v3589_v55 = vadd.f32 %v3563_v10, %v3545_v41  ;;  %v3016_v56 = vpop.f32.mrb[19].mxu1  ;;  %v3180_v36 = vpop.f32.mrb[23].mxu0  ;;  %3317 = vmatprep.subr.bf16.mxu1 %v2781_v2  ;;  %v3535_v20 = vrot.slane %v5086_v54, %v4947_v52 }
 0x908   :  { %v3588_v9 = vadd.f32 %v3559_v39, %v3544_v5  ;;  %v3590_v45 = vadd.f32 %v3567_v40, %v3546_v8 }
 0x909   :  { %3883 = vtanh.f32 %v3587_v49 }
 0x90a   :  { %3885 = vtanh.f32 %v3589_v55  ;;  %3318 = vmatpush1.bf16.msra.mxu1 %v2780_v21  ;;  %v3579_v55 = vrot.slane %v5088_v42, %v4947_v52  ;;  %v3575_v52 = vrot.slane %v5088_v42, %v4950_v53 }
 0x90b   :  { %3887 = vtanh.f32 %v3588_v9  ;;  %3319 = vmatprep.subr.bf16.mxu1 %v2788_v57  ;;  %v3527_v9 = vrot.slane %v5086_v54, %v4944_v51 }
 0x90c   :  { %3889 = vtanh.f32 %v3590_v45  ;;  %v3531_v45 = vrot.slane %v5086_v54, %v4950_v53 }
 0x90e   :  { %3320 = vmatpush1.bf16.msra.mxu1 %v2787_v23 }
 0x90f   :  { %3321 = vmatprep.subr.bf16.mxu1 %v2795_v58 }
 0x912   :  { %3322 = vmatpush1.bf16.msra.mxu1 %v2794_v61 }
 0x913   :  { %v3884_v33 = vpop.eup %3883  ;;  %3323 = vmatprep.subr.bf16.mxu1 %v2802_v62 }
 0x914   :  { %v3886_v1 = vpop.eup %3885  ;;  %3601 = vst [vmem:[%s5194_s16] sm:$0xff] %v3884_v33 }
 0x915   :  { %v3888_v3 = vpop.eup %3887  ;;  %3603 = vst [vmem:[%s5194_s16 + $0x10] sm:$0xff] %v3886_v1 }
 0x916   :  { %v3890_v11 = vpop.eup %3889  ;;  %3602 = vst [vmem:[%s5194_s16 + $0x8] sm:$0xff] %v3888_v3  ;;  %3324 = vmatpush1.bf16.msra.mxu1 %v2801_v63 }
 0x917   :  { %3604 = vst [vmem:[%s5194_s16 + $0x18] sm:$0xff] %v3890_v11  ;;  %3325 = vmatprep.subr.bf16.mxu1 %v2809_v26 }
 0x91a   :  { %3326 = vmatpush1.bf16.msra.mxu1 %v2808_v12 }
 0x91b   :  { %3327 = vmatprep.subr.bf16.mxu1 %v2816_v17 }
 0x91e   :  { %3328 = vmatpush1.bf16.msra.mxu1 %v2815_v27 }
 0x91f   :  { %3329 = vmatprep.subr.bf16.mxu1 %v2823_v4 }
 0x922   :  { %3330 = vmatpush1.bf16.msra.mxu1 %v2822_v16 }
 0x923   :  { %3331 = vmatprep.subr.bf16.mxu1 %v2830_v7 }
 0x924   :  { %v3674_v29 = vpop.f32.mrb[24].mxu0 }
 0x925   :  { %v3675_v30 = vpop.f32.mrb[25].mxu0 }
 0x926   :  { %3332 = vmatpush1.bf16.msra.mxu1 %v2829_v28  ;;  %v3676_v31 = vadd.f32 %v3675_v30, %v3674_v29  ;;  %v3677_v32 = vpop.f32.mrb[26].mxu0 }
 0x927   :  { %3333 = vmatprep.subr.bf16.mxu1 %v2837_v22  ;;  %v3678_v38 = vpop.f32.mrb[27].mxu0 }
 0x92a   :  { %3334 = vmatpush1.bf16.msra.mxu1 %v2836_v43 }
 0x92b   :  { %3335 = vmatprep.subr.bf16.mxu1 %v2844_v44 }
 0x92e   :  { %3336 = vmatpush1.bf16.msra.mxu1 %v2843_v24 }
 0x931   :  { %3338 = vmatmul.mubr.bf16.vlgmr.msra.gmra.mrb[20].mxu1 %v5067_v60 }
 0x944   :  { %v3696_v19 = vpop.f32.mrb[28].mxu0 }
 0x945   :  { %v3697_v10 = vpop.f32.mrb[29].mxu0 }
 0x946   :  { %v3698_v2 = vadd.f32 %v3697_v10, %v3696_v19  ;;  %v3699_v59 = vpop.f32.mrb[30].mxu0 }
 0x947   :  { %v3700_v37 = vpop.f32.mrb[31].mxu0 }
 0x948   :  { %v3421_v34 = vadd.f32 %v3698_v2, %v3676_v31 }
 0x964   :  { %v3718_v39 = vpop.f32.mrb[32].mxu0 }
 0x965   :  { %v3719_v40 = vpop.f32.mrb[33].mxu0 }
 0x966   :  { %v3720_v46 = vadd.f32 %v3719_v40, %v3718_v39  ;;  %v3721_v41 = vpop.f32.mrb[34].mxu0 }
 0x967   :  { %v3722_v15 = vpop.f32.mrb[35].mxu0 }
 0x968   :  { %v3461_v35 = vadd.f32 %v3720_v46, %v3421_v34 }
 0x984   :  { %v3740_v5 = vpop.f32.mrb[36].mxu0 }
 0x985   :  { %v3741_v8 = vpop.f32.mrb[37].mxu0 }
 0x986   :  { %v3742_v47 = vadd.f32 %v3741_v8, %v3740_v5  ;;  %v3743_v21 = vpop.f32.mrb[38].mxu0 }
 0x987   :  { %v3744_v60 = vpop.f32.mrb[39].mxu0 }
 0x988   :  { %v3501_v49 = vadd.f32 %v3742_v47, %v3461_v35 }
 0x98a   :  { %v3549_v56 = vmul.f32 %v3535_v20, %v3501_v49 }
 0x98c   :  { %v3593_v36 = vadd.f32 %v3579_v55, %v3549_v56 }
 0x98e   :  { %3891 = vtanh.f32 %v3593_v36 }
 0x998   :  { %v3892_v57 = vpop.eup %3891 }
 0x999   :  { %3607 = vst [vmem:[%s5194_s16 + $0x30] sm:$0xff] %v3892_v57 }
 0xa04   :  { %v3339_v23 = vpop.f32.mrb[20].mxu1 }
 0xa05   :  { %v3547_v58 = vmul.f32 %v3527_v9, %v3339_v23  ;;  %v3341_v50 = vpop.f32.mrb[21].mxu1 }
 0xa06   :  { %v3548_v61 = vmul.f32 %v3531_v45, %v3341_v50  ;;  %v3343_v62 = vpop.f32.mrb[22].mxu1 }
 0xa07   :  { %v3591_v6 = vadd.f32 %v3571_v48, %v3547_v58  ;;  %v3344_v63 = vpop.f32.mrb[23].mxu1 }
 0xa08   :  { %v3592_v33 = vadd.f32 %v3575_v52, %v3548_v61 }
 0xa09   :  { %3893 = vtanh.f32 %v3591_v6 }
 0xa0a   :  { %3895 = vtanh.f32 %v3592_v33 }
 0xa13   :  { %v3894_v26 = vpop.eup %3893 }
 0xa14   :  { %v3896_v0 = vpop.eup %3895  ;;  %3605 = vst [vmem:[%s5194_s16 + $0x20] sm:$0xff] %v3894_v26 }
 0xa15   :  { %3606 = vst [vmem:[%s5194_s16 + $0x28] sm:$0xff] %v3896_v0 }
 0xa16   :  { %3612 = vsyncpa [#allocation6], 1 }
 0xa17   :  { %3613 = vsyncpa [#allocation8], 1 }
 0xa18   :  { %3614 = vsyncpa [#allocation11], 1 }
 0xa19   :  { %3615 = vsyncpa [#allocation14], 1 }
 0xa1a   :  { %3616 = vsyncpa [#allocation17], 1 }
 0xa1b   :  { %3617 = vsyncpa [#allocation20], 1 }
 0xa1c   :  { %3618 = vsyncpa [#allocation23], 1 }
 0xa1d   :  { %3619 = vsyncpa [#allocation26], 1 }
 0xa1e   :  { %3620 = vsyncpa [#allocation29], 1 }
 0xa1f   :  { %3621 = vsyncmov [#allocation4] }
 0xa22   :  { %s3622_s9 = vpop.sfrf %3621 }
 0xa23   :  { %p3645_p12 = scmp.ne.s32.totalorder %s3622_s9, 0 }
 0xa25   :  { %3626 = shalt.err (%p3645_p12)  }
 0xa26   :  { %3628 = vsyncmov [#allocation4 + $0x1] }
 0xa29   :  { %s3629_s3 = vpop.sfrf %3628 }
 0xa2a   :  { %p3646_p13 = scmp.ne.s32.totalorder %s3629_s3, 0 }
 0xa2c   :  { %3633 = shalt.err (%p3646_p13)  }

</bundles_post_ra>
